<compile_context>
chip_gen: v7x
topology: tpu7x:2x2x1
jax: 0.10.0
libtpu: 0.0.40
codegen_flags: <defaults>
</compile_context>

<pallas_src>
import functools

import jax
import jax.numpy as jnp
from jax.experimental import pallas as pl
from jax.experimental.pallas import tpu as pltpu


# ---------------------------------------------------------------------------
# tiling helpers
# ---------------------------------------------------------------------------
def _pick_tile(m, cap):
    """Largest row-tile <= cap that divides m (multiple of 8), else m itself."""
    if m <= cap:
        return m
    start = cap - (cap % 8)
    for t in range(start, 7, -8):
        if m % t == 0:
            return t
    return m


def _pick_tm(m, k, n, out_bytes, cap=512, budget=12 * 1024 * 1024):
    """Row tile: <= cap, divides m, and the double-buffered working set
    (bf16 LHS/RHS tiles + out tile) stays within a v5e-safe VMEM budget."""
    tm = _pick_tile(m, cap)
    while tm > 8:
        need = 2 * (tm * k * 2 + tm * n * out_bytes) + 2 * (k * n * 2)
        if need <= budget:
            break
        smaller = _pick_tile(m, max(8, tm // 2))
        if smaller >= tm:
            break
        tm = smaller
    return tm


# ---------------------------------------------------------------------------
# Pallas GEMM kernels (fused tanh epilogue, optional BN partial stats)
# ---------------------------------------------------------------------------
def _gemm_kernel(x_ref, w_ref, o_ref, *, activation):
    acc = jnp.dot(x_ref[...], w_ref[...], preferred_element_type=jnp.float32)
    if activation == "tanh":
        acc = jnp.tanh(acc)
    o_ref[...] = acc.astype(o_ref.dtype)


def _gemm_stats_kernel(x_ref, w_ref, o_ref, sum_ref, ssq_ref, *, activation):
    acc = jnp.dot(x_ref[...], w_ref[...], preferred_element_type=jnp.float32)
    if activation == "tanh":
        acc = jnp.tanh(acc)
    o_ref[...] = acc.astype(o_ref.dtype)
    # Per-tile BatchNorm partial statistics on the f32 accumulator (reduced
    # to per-channel mean/var outside the kernel -> saves the XLA stats passes
    # over the stored activation).
    sum_ref[...] = jnp.sum(acc, axis=0, keepdims=True)
    ssq_ref[...] = jnp.sum(acc * acc, axis=0, keepdims=True)


def pallas_gemm(x, w, *, activation=None, out_dtype=jnp.bfloat16,
                emit_stats=False):
    """x: (M, K) bf16 ; w: (K, N) bf16 -> (M, N) out_dtype (f32 MXU accum).

    If emit_stats, additionally returns per-M-tile partial sum and
    sum-of-squares of the f32 accumulator, each shaped (tiles, 1, N) f32."""
    m, k = x.shape
    kw, n = w.shape
    assert k == kw
    out_bytes = jnp.dtype(out_dtype).itemsize
    tm = _pick_tm(m, k, n, out_bytes)
    assert m % tm == 0, (m, tm)
    tiles = m // tm

    need = 2 * (tm * k * 2 + tm * n * out_bytes) + 2 * (k * n * 2)
    vmem_limit = min(max(2 * need, 16 * 1024 * 1024), 64 * 1024 * 1024)

    stats_bytes = (2 * tiles * n * 4) if emit_stats else 0
    cost = pl.CostEstimate(
        flops=2 * m * k * n,
        transcendentals=(m * n) if activation == "tanh" else 0,
        bytes_accessed=2 * (m * k + k * n) + out_bytes * m * n + stats_bytes,
    )

    in_specs = [
        pl.BlockSpec((tm, k), lambda i: (i, 0)),
        pl.BlockSpec((k, n), lambda i: (0, 0)),
    ]
    if emit_stats:
        kernel = functools.partial(_gemm_stats_kernel, activation=activation)
        out_shape = (
            jax.ShapeDtypeStruct((m, n), out_dtype),
            jax.ShapeDtypeStruct((tiles, 1, n), jnp.float32),
            jax.ShapeDtypeStruct((tiles, 1, n), jnp.float32),
        )
        out_specs = (
            pl.BlockSpec((tm, n), lambda i: (i, 0)),
            pl.BlockSpec((None, 1, n), lambda i: (i, 0, 0)),
            pl.BlockSpec((None, 1, n), lambda i: (i, 0, 0)),
        )
    else:
        kernel = functools.partial(_gemm_kernel, activation=activation)
        out_shape = jax.ShapeDtypeStruct((m, n), out_dtype)
        out_specs = pl.BlockSpec((tm, n), lambda i: (i, 0))

    return pl.pallas_call(
        kernel,
        out_shape=out_shape,
        grid=(tiles,),
        in_specs=in_specs,
        out_specs=out_specs,
        compiler_params=pltpu.CompilerParams(
            dimension_semantics=("parallel",),
            vmem_limit_bytes=vmem_limit),
        cost_estimate=cost,
    )(x, w)


# ---------------------------------------------------------------------------
# ConvTranspose2d(k=4, s=2, p=1) shared-patch (sub-pixel) decomposition
# ---------------------------------------------------------------------------
# Output position (2q+r) along one axis uses input offsets d in {-1,0,+1}
# around q with these 4x4-kernel taps (-1 == unused, weight row is zero):
_TAPS = ((3, 1, -1), (-1, 2, 0))      # _TAPS[r][d]  (d index 0,1,2 <-> -1,0,+1)


def make_shared_patch_weight(w):
    """PyTorch ConvTranspose2d weight (Cin, Cout, 4, 4) -> GEMM weight
    (9*Cin, 4*Cout).  Rows ordered (dh, dw, cin); cols ordered (rh, rw, cout)."""
    cin, cout, _, _ = w.shape
    zero = jnp.zeros((cin, cout), w.dtype)
    rows_h = []
    for dh in range(3):
        rows_w = []
        for dw in range(3):
            phases_h = []
            for rh in range(2):
                phases_w = []
                for rw in range(2):
                    th, tw = _TAPS[rh][dh], _TAPS[rw][dw]
                    phases_w.append(zero if (th < 0 or tw < 0)
                                    else w[:, :, th, tw])
                phases_h.append(jnp.stack(phases_w, axis=1))    # (cin, 2, cout)
            blk = jnp.stack(phases_h, axis=1)                   # (cin, 2, 2, cout)
            rows_w.append(blk.reshape(cin, 4 * cout))
        rows_h.append(jnp.stack(rows_w, axis=0))                # (3, cin, 4*cout)
    w9 = jnp.stack(rows_h, axis=0)                              # (3, 3, cin, 4*cout)
    return w9.reshape(9 * cin, 4 * cout)


def im2col_3x3(x):
    """x: (N, H, W, C) bf16 -> (N*H*W, 9*C) bf16, zero-padded 3x3 windows,
    column order (dh, dw, c) matching make_shared_patch_weight."""
    n, h, wd, c = x.shape
    xp = jnp.pad(x, ((0, 0), (1, 1), (1, 1), (0, 0)))
    cols = [xp[:, dh:dh + h, dw:dw + wd, :]
            for dh in range(3) for dw in range(3)]
    return jnp.concatenate(cols, axis=-1).reshape(n * h * wd, 9 * c)


def interleave_phases(y, n, h, wd, cout):
    """(N*H*W, 4*Cout) with cols (rh, rw, cout) -> NHWC (N, 2H, 2W, Cout)."""
    y = y.reshape(n, h, wd, 2, 2, cout)
    y = jnp.transpose(y, (0, 1, 3, 2, 4, 5))
    return y.reshape(n, 2 * h, 2 * wd, cout)


def bn_scale_shift(psum, pssq, groups, count, gamma, beta, eps=1e-5):
    """Reduce GEMM-epilogue partial stats (tiles, 1, groups*Cout) to the
    per-channel BatchNorm (train-mode, biased var) scale/shift."""
    cout = gamma.shape[0]
    s = jnp.sum(psum, axis=(0, 1)).reshape(groups, cout).sum(axis=0)
    q = jnp.sum(pssq, axis=(0, 1)).reshape(groups, cout).sum(axis=0)
    mean = s / count
    var = jnp.maximum(q / count - mean * mean, 0.0)
    scale = gamma * jax.lax.rsqrt(var + eps)
    shift = beta - mean * scale
    return scale, shift


# ---------------------------------------------------------------------------
# Generator parameters
# ---------------------------------------------------------------------------
def init_generator_params(key, img_channels, z_dim, feature_dim):
    chans = [z_dim, feature_dim * 8, feature_dim * 4, feature_dim * 2,
             feature_dim, img_channels]
    params = {}
    for li in range(5):
        key, sub = jax.random.split(key)
        cin, cout = chans[li], chans[li + 1]
        # PyTorch ConvTranspose2d weight layout: (Cin, Cout, kH, kW)
        params[f"conv{li}_w"] = 0.02 * jax.random.normal(
            sub, (cin, cout, 4, 4), jnp.float32)
        if li < 4:
            params[f"bn{li}_gamma"] = jnp.ones((cout,), jnp.float32)
            params[f"bn{li}_beta"] = jnp.zeros((cout,), jnp.float32)
    return params


def prepare_generator_params(params):
    """One-time preprocessing: phase-decompose and bf16-cast the GEMM weights
    (done once at init, not per forward call)."""
    prep = {}
    w0 = params["conv0_w"]                                      # (z, 8f, 4, 4)
    cin0, cout0 = w0.shape[0], w0.shape[1]
    prep["w0"] = jnp.transpose(w0, (0, 2, 3, 1)).reshape(
        cin0, 16 * cout0).astype(jnp.bfloat16)
    for li in range(1, 5):
        prep[f"w{li}"] = make_shared_patch_weight(
            params[f"conv{li}_w"]).astype(jnp.bfloat16)
    for li in range(4):
        prep[f"bn{li}_gamma"] = params[f"bn{li}_gamma"]
        prep[f"bn{li}_beta"] = params[f"bn{li}_beta"]
    return prep


# ---------------------------------------------------------------------------
# Forward pass
# ---------------------------------------------------------------------------
def generator_forward(prep, z_nchw):
    b = z_nchw.shape[0]
    z = z_nchw.reshape(b, -1).astype(jnp.bfloat16)

    # layer 0: ConvTranspose(z_dim, 8f, k4, s1, p0) on a 1x1 input == dense
    # GEMM; BN0 partial stats come straight out of the epilogue.
    cout = prep["w0"].shape[1] // 16
    y, ps, pq = pallas_gemm(z, prep["w0"], emit_stats=True)
    scale, shift = bn_scale_shift(ps, pq, 16, b * 16,
                                  prep["bn0_gamma"], prep["bn0_beta"])
    x = y.reshape(b, 4, 4, cout)                  # raw conv0 output, bf16 NHWC
    h = wd = 4

    # layers 1..4: ConvTranspose(k4, s2, p1).  BN(i-1)+ReLU is folded into the
    # im2col of layer i (XLA fuses the affine into the patch concat).
    for li in range(1, 5):
        x_act = jnp.maximum(
            x.astype(jnp.float32) * scale + shift, 0.0).astype(jnp.bfloat16)
        patch = im2col_3x3(x_act)                 # (b*h*wd, 9*cin) bf16
        cout = prep[f"w{li}"].shape[1] // 4
        if li == 4:
            # final layer: Tanh fused into the GEMM epilogue, f32 output
            y = pallas_gemm(patch, prep[f"w{li}"], activation="tanh",
                            out_dtype=jnp.float32)
        else:
            y, ps, pq = pallas_gemm(patch, prep[f"w{li}"], emit_stats=True)
            scale, shift = bn_scale_shift(ps, pq, 4, 4 * b * h * wd,
                                          prep[f"bn{li}_gamma"],
                                          prep[f"bn{li}_beta"])
        x = interleave_phases(y, b, h, wd, cout)
        h, wd = 2 * h, 2 * wd

    return jnp.transpose(x, (0, 3, 1, 2))         # NHWC -> NCHW


# ---------------------------------------------------------------------------
# Pure-JAX f32 reference (zero-insert identity via lhs-dilated conv)
# ---------------------------------------------------------------------------
def _reference_forward(params, x_nchw):
    x = x_nchw.astype(jnp.float32)
    cfgs = [(1, 0), (2, 1), (2, 1), (2, 1), (2, 1)]
    eps = 1e-5
    for li, (s, p) in enumerate(cfgs):
        w = params[f"conv{li}_w"]
        k = w.shape[-1]
        w_conv = jnp.transpose(w[:, :, ::-1, ::-1], (1, 0, 2, 3))  # OIHW
        pad = k - 1 - p
        x = jax.lax.conv_general_dilated(
            x, w_conv, window_strides=(1, 1),
            padding=((pad, pad), (pad, pad)), lhs_dilation=(s, s),
            dimension_numbers=("NCHW", "OIHW", "NCHW"))
        if li < 4:
            mean = jnp.mean(x, axis=(0, 2, 3), keepdims=True)
            var = jnp.mean(jnp.square(x - mean), axis=(0, 2, 3), keepdims=True)
            g = params[f"bn{li}_gamma"].reshape(1, -1, 1, 1)
            b = params[f"bn{li}_beta"].reshape(1, -1, 1, 1)
            x = jnp.maximum(g * (x - mean) / jnp.sqrt(var + eps) + b, 0.0)
        else:
            x = jnp.tanh(x)
    return x


if __name__ == "__main__":
    IMG_CHANNELS, Z_DIM, FEATURE_DIM, BATCH = 3, 16, 8, 2

    key = jax.random.PRNGKey(0)
    key_p, key_z = jax.random.split(key)
    params = init_generator_params(key_p, IMG_CHANNELS, Z_DIM, FEATURE_DIM)
    prep = prepare_generator_params(params)
    z = jax.random.normal(key_z, (BATCH, Z_DIM, 1, 1), jnp.float32)

    out = jax.jit(generator_forward)(prep, z)
    out = jax.block_until_ready(out)

    assert out.shape == (BATCH, IMG_CHANNELS, 64, 64), out.shape
    assert bool(jnp.all(jnp.isfinite(out)))
    assert bool(jnp.all(jnp.abs(out) <= 1.0 + 1e-6))   # tanh range

    # numerical check vs f32 XLA reference (loose tol: bf16 GEMMs + bf16
    # activation storage; BN renormalizes each layer)
    ref = _reference_forward(params, z)
    max_err = float(jnp.max(jnp.abs(out - ref)))
    assert max_err < 0.1, f"max abs err vs reference: {max_err}"

    print("KERNEL_OK")
</pallas_src>

<mosaic_0001>
module attributes {stable_mosaic.version = 11 : i64} {
  func.func @_gemm_stats_kernel(%arg0: i32, %arg1: memref<2x16xbf16, #tpu.memory_space<vmem>>, %arg2: memref<16x1024xbf16, #tpu.memory_space<vmem>>, %arg3: memref<2x1024xbf16, #tpu.memory_space<vmem>>, %arg4: memref<1x1x1024xf32, #tpu.memory_space<vmem>>, %arg5: memref<1x1x1024xf32, #tpu.memory_space<vmem>>) attributes {dimension_semantics = [#tpu.dimension_semantics<parallel>], iteration_bounds = array<i64: 1>, scalar_prefetch = 0 : i64, scratch_operands = 0 : i64, tpu.core_type = #tpu.core_type<tc>, window_params = [{transform_indices = @transform_0, window_bounds = array<i64: 2, 16>}, {pipeline_mode = #tpu.pipeline_mode<synchronous>, transform_indices = @transform_1, window_bounds = array<i64: 16, 1024>}, {transform_indices = @transform_2, window_bounds = array<i64: 2, 1024>}, {transform_indices = @transform_3, window_bounds = array<i64: 1, 1, 1024>}, {transform_indices = @transform_4, window_bounds = array<i64: 1, 1, 1024>}]} {
    %c0 = arith.constant 0 : index
    %c0_0 = arith.constant 0 : index
    %0 = vector.load %arg1[%c0, %c0_0] : memref<2x16xbf16, #tpu.memory_space<vmem>>, vector<2x16xbf16>
    %c0_1 = arith.constant 0 : index
    %c0_2 = arith.constant 0 : index
    %1 = vector.load %arg2[%c0_1, %c0_2] : memref<16x1024xbf16, #tpu.memory_space<vmem>>, vector<16x1024xbf16>
    %cst = arith.constant dense<0.000000e+00> : vector<2x1024xf32>
    %2 = tpu.matmul %0, %1, %cst {dimension_numbers = #tpu.dot_dimension_numbers<[1], [0], [0], [1], [0, 0, 1, 1], [], []>} : vector<2x16xbf16>, vector<16x1024xbf16>, vector<2x1024xf32> -> vector<2x1024xf32>
    %3 = arith.truncf %2 : vector<2x1024xf32> to vector<2x1024xbf16>
    %c0_3 = arith.constant 0 : index
    %c0_4 = arith.constant 0 : index
    %4 = vector.load %arg3[%c0_3, %c0_4] : memref<2x1024xbf16, #tpu.memory_space<vmem>>, vector<2x1024xbf16>
    tpu.vector_store %arg3[%c0_3, %c0_4], %3 {strides = array<i32>} : memref<2x1024xbf16, #tpu.memory_space<vmem>>, vector<2x1024xbf16>,
    %cst_5 = arith.constant dense<0.000000e+00> : vector<1024xf32>
    %5 = vector.multi_reduction <add>, %2, %cst_5 [0] : vector<2x1024xf32> to vector<1024xf32>
    %6 = vector.shape_cast %5 : vector<1024xf32> to vector<1x1024xf32>
    %c0_6 = arith.constant 0 : index
    %c0_7 = arith.constant 0 : index
    %c0_8 = arith.constant 0 : index
    %7 = vector.load %arg4[%c0_6, %c0_7, %c0_8] : memref<1x1x1024xf32, #tpu.memory_space<vmem>>, vector<1x1x1024xf32>
    %8 = vector.shape_cast %7 : vector<1x1x1024xf32> to vector<1x1024xf32>
    %9 = vector.shape_cast %6 : vector<1x1024xf32> to vector<1x1x1024xf32>
    tpu.vector_store %arg4[%c0_6, %c0_7, %c0_8], %9 {strides = array<i32>} : memref<1x1x1024xf32, #tpu.memory_space<vmem>>, vector<1x1x1024xf32>,
    %10 = arith.mulf %2, %2 : vector<2x1024xf32>
    %cst_9 = arith.constant dense<0.000000e+00> : vector<1024xf32>
    %11 = vector.multi_reduction <add>, %10, %cst_9 [0] : vector<2x1024xf32> to vector<1024xf32>
    %12 = vector.shape_cast %11 : vector<1024xf32> to vector<1x1024xf32>
    %c0_10 = arith.constant 0 : index
    %c0_11 = arith.constant 0 : index
    %c0_12 = arith.constant 0 : index
    %13 = vector.load %arg5[%c0_10, %c0_11, %c0_12] : memref<1x1x1024xf32, #tpu.memory_space<vmem>>, vector<1x1x1024xf32>
    %14 = vector.shape_cast %13 : vector<1x1x1024xf32> to vector<1x1024xf32>
    %15 = vector.shape_cast %12 : vector<1x1024xf32> to vector<1x1x1024xf32>
    tpu.vector_store %arg5[%c0_10, %c0_11, %c0_12], %15 {strides = array<i32>} : memref<1x1x1024xf32, #tpu.memory_space<vmem>>, vector<1x1x1024xf32>,
    return
  }
  func.func @transform_0(%arg0: i32) -> (i32, i32) {
    %c0_i32 = arith.constant 0 : i32
    %c0_i32_0 = arith.constant 0 : i32
    return %arg0, %c0_i32 : i32, i32
  }
  func.func @transform_1(%arg0: i32) -> (i32, i32) {
    %c0_i32 = arith.constant 0 : i32
    %c0_i32_0 = arith.constant 0 : i32
    %c0_i32_1 = arith.constant 0 : i32
    return %c0_i32, %c0_i32_0 : i32, i32
  }
  func.func @transform_2(%arg0: i32) -> (i32, i32) {
    %c0_i32 = arith.constant 0 : i32
    %c0_i32_0 = arith.constant 0 : i32
    return %arg0, %c0_i32 : i32, i32
  }
  func.func @transform_3(%arg0: i32) -> (i32, i32, i32) {
    %c0_i32 = arith.constant 0 : i32
    %c0_i32_0 = arith.constant 0 : i32
    %c0_i32_1 = arith.constant 0 : i32
    return %arg0, %c0_i32, %c0_i32_0 : i32, i32, i32
  }
  func.func @transform_4(%arg0: i32) -> (i32, i32, i32) {
    %c0_i32 = arith.constant 0 : i32
    %c0_i32_0 = arith.constant 0 : i32
    %c0_i32_1 = arith.constant 0 : i32
    return %arg0, %c0_i32, %c0_i32_0 : i32, i32, i32
  }
}

module attributes {stable_mosaic.version = 11 : i64} {
  func.func @_gemm_stats_kernel(%arg0: i32, %arg1: memref<32x576xbf16, #tpu.memory_space<vmem>>, %arg2: memref<576x128xbf16, #tpu.memory_space<vmem>>, %arg3: memref<32x128xbf16, #tpu.memory_space<vmem>>, %arg4: memref<1x1x128xf32, #tpu.memory_space<vmem>>, %arg5: memref<1x1x128xf32, #tpu.memory_space<vmem>>) attributes {dimension_semantics = [#tpu.dimension_semantics<parallel>], iteration_bounds = array<i64: 1>, scalar_prefetch = 0 : i64, scratch_operands = 0 : i64, tpu.core_type = #tpu.core_type<tc>, window_params = [{transform_indices = @transform_0, window_bounds = array<i64: 32, 576>}, {pipeline_mode = #tpu.pipeline_mode<synchronous>, transform_indices = @transform_1, window_bounds = array<i64: 576, 128>}, {transform_indices = @transform_2, window_bounds = array<i64: 32, 128>}, {transform_indices = @transform_3, window_bounds = array<i64: 1, 1, 128>}, {transform_indices = @transform_4, window_bounds = array<i64: 1, 1, 128>}]} {
    %c0 = arith.constant 0 : index
    %c0_0 = arith.constant 0 : index
    %0 = vector.load %arg1[%c0, %c0_0] : memref<32x576xbf16, #tpu.memory_space<vmem>>, vector<32x576xbf16>
    %c0_1 = arith.constant 0 : index
    %c0_2 = arith.constant 0 : index
    %1 = vector.load %arg2[%c0_1, %c0_2] : memref<576x128xbf16, #tpu.memory_space<vmem>>, vector<576x128xbf16>
    %cst = arith.constant dense<0.000000e+00> : vector<32x128xf32>
    %2 = tpu.matmul %0, %1, %cst {dimension_numbers = #tpu.dot_dimension_numbers<[1], [0], [0], [1], [0, 0, 1, 1], [], []>} : vector<32x576xbf16>, vector<576x128xbf16>, vector<32x128xf32> -> vector<32x128xf32>
    %3 = arith.truncf %2 : vector<32x128xf32> to vector<32x128xbf16>
    %c0_3 = arith.constant 0 : index
    %c0_4 = arith.constant 0 : index
    %4 = vector.load %arg3[%c0_3, %c0_4] : memref<32x128xbf16, #tpu.memory_space<vmem>>, vector<32x128xbf16>
    tpu.vector_store %arg3[%c0_3, %c0_4], %3 {strides = array<i32>} : memref<32x128xbf16, #tpu.memory_space<vmem>>, vector<32x128xbf16>,
    %cst_5 = arith.constant dense<0.000000e+00> : vector<128xf32>
    %5 = vector.multi_reduction <add>, %2, %cst_5 [0] : vector<32x128xf32> to vector<128xf32>
    %6 = vector.shape_cast %5 : vector<128xf32> to vector<1x128xf32>
    %c0_6 = arith.constant 0 : index
    %c0_7 = arith.constant 0 : index
    %c0_8 = arith.constant 0 : index
    %7 = vector.load %arg4[%c0_6, %c0_7, %c0_8] : memref<1x1x128xf32, #tpu.memory_space<vmem>>, vector<1x1x128xf32>
    %8 = vector.shape_cast %7 : vector<1x1x128xf32> to vector<1x128xf32>
    %9 = vector.shape_cast %6 : vector<1x128xf32> to vector<1x1x128xf32>
    tpu.vector_store %arg4[%c0_6, %c0_7, %c0_8], %9 {strides = array<i32>} : memref<1x1x128xf32, #tpu.memory_space<vmem>>, vector<1x1x128xf32>,
    %10 = arith.mulf %2, %2 : vector<32x128xf32>
    %cst_9 = arith.constant dense<0.000000e+00> : vector<128xf32>
    %11 = vector.multi_reduction <add>, %10, %cst_9 [0] : vector<32x128xf32> to vector<128xf32>
    %12 = vector.shape_cast %11 : vector<128xf32> to vector<1x128xf32>
    %c0_10 = arith.constant 0 : index
    %c0_11 = arith.constant 0 : index
    %c0_12 = arith.constant 0 : index
    %13 = vector.load %arg5[%c0_10, %c0_11, %c0_12] : memref<1x1x128xf32, #tpu.memory_space<vmem>>, vector<1x1x128xf32>
    %14 = vector.shape_cast %13 : vector<1x1x128xf32> to vector<1x128xf32>
    %15 = vector.shape_cast %12 : vector<1x128xf32> to vector<1x1x128xf32>
    tpu.vector_store %arg5[%c0_10, %c0_11, %c0_12], %15 {strides = array<i32>} : memref<1x1x128xf32, #tpu.memory_space<vmem>>, vector<1x1x128xf32>,
    return
  }
  func.func @transform_0(%arg0: i32) -> (i32, i32) {
    %c0_i32 = arith.constant 0 : i32
    %c0_i32_0 = arith.constant 0 : i32
    return %arg0, %c0_i32 : i32, i32
  }
  func.func @transform_1(%arg0: i32) -> (i32, i32) {
    %c0_i32 = arith.constant 0 : i32
    %c0_i32_0 = arith.constant 0 : i32
    %c0_i32_1 = arith.constant 0 : i32
    return %c0_i32, %c0_i32_0 : i32, i32
  }
  func.func @transform_2(%arg0: i32) -> (i32, i32) {
    %c0_i32 = arith.constant 0 : i32
    %c0_i32_0 = arith.constant 0 : i32
    return %arg0, %c0_i32 : i32, i32
  }
  func.func @transform_3(%arg0: i32) -> (i32, i32, i32) {
    %c0_i32 = arith.constant 0 : i32
    %c0_i32_0 = arith.constant 0 : i32
    %c0_i32_1 = arith.constant 0 : i32
    return %arg0, %c0_i32, %c0_i32_0 : i32, i32, i32
  }
  func.func @transform_4(%arg0: i32) -> (i32, i32, i32) {
    %c0_i32 = arith.constant 0 : i32
    %c0_i32_0 = arith.constant 0 : i32
    %c0_i32_1 = arith.constant 0 : i32
    return %arg0, %c0_i32, %c0_i32_0 : i32, i32, i32
  }
}

module attributes {stable_mosaic.version = 11 : i64} {
  func.func @_gemm_stats_kernel(%arg0: i32, %arg1: memref<128x288xbf16, #tpu.memory_space<vmem>>, %arg2: memref<288x64xbf16, #tpu.memory_space<vmem>>, %arg3: memref<128x64xbf16, #tpu.memory_space<vmem>>, %arg4: memref<1x1x64xf32, #tpu.memory_space<vmem>>, %arg5: memref<1x1x64xf32, #tpu.memory_space<vmem>>) attributes {dimension_semantics = [#tpu.dimension_semantics<parallel>], iteration_bounds = array<i64: 1>, scalar_prefetch = 0 : i64, scratch_operands = 0 : i64, tpu.core_type = #tpu.core_type<tc>, window_params = [{transform_indices = @transform_0, window_bounds = array<i64: 128, 288>}, {pipeline_mode = #tpu.pipeline_mode<synchronous>, transform_indices = @transform_1, window_bounds = array<i64: 288, 64>}, {transform_indices = @transform_2, window_bounds = array<i64: 128, 64>}, {transform_indices = @transform_3, window_bounds = array<i64: 1, 1, 64>}, {transform_indices = @transform_4, window_bounds = array<i64: 1, 1, 64>}]} {
    %c0 = arith.constant 0 : index
    %c0_0 = arith.constant 0 : index
    %0 = vector.load %arg1[%c0, %c0_0] : memref<128x288xbf16, #tpu.memory_space<vmem>>, vector<128x288xbf16>
    %c0_1 = arith.constant 0 : index
    %c0_2 = arith.constant 0 : index
    %1 = vector.load %arg2[%c0_1, %c0_2] : memref<288x64xbf16, #tpu.memory_space<vmem>>, vector<288x64xbf16>
    %cst = arith.constant dense<0.000000e+00> : vector<128x64xf32>
    %2 = tpu.matmul %0, %1, %cst {dimension_numbers = #tpu.dot_dimension_numbers<[1], [0], [0], [1], [0, 0, 1, 1], [], []>} : vector<128x288xbf16>, vector<288x64xbf16>, vector<128x64xf32> -> vector<128x64xf32>
    %3 = arith.truncf %2 : vector<128x64xf32> to vector<128x64xbf16>
    %c0_3 = arith.constant 0 : index
    %c0_4 = arith.constant 0 : index
    %4 = vector.load %arg3[%c0_3, %c0_4] : memref<128x64xbf16, #tpu.memory_space<vmem>>, vector<128x64xbf16>
    tpu.vector_store %arg3[%c0_3, %c0_4], %3 {strides = array<i32>} : memref<128x64xbf16, #tpu.memory_space<vmem>>, vector<128x64xbf16>,
    %cst_5 = arith.constant dense<0.000000e+00> : vector<64xf32>
    %5 = vector.multi_reduction <add>, %2, %cst_5 [0] : vector<128x64xf32> to vector<64xf32>
    %6 = vector.shape_cast %5 : vector<64xf32> to vector<1x64xf32>
    %c0_6 = arith.constant 0 : index
    %c0_7 = arith.constant 0 : index
    %c0_8 = arith.constant 0 : index
    %7 = vector.load %arg4[%c0_6, %c0_7, %c0_8] : memref<1x1x64xf32, #tpu.memory_space<vmem>>, vector<1x1x64xf32>
    %8 = vector.shape_cast %7 : vector<1x1x64xf32> to vector<1x64xf32>
    %9 = vector.shape_cast %6 : vector<1x64xf32> to vector<1x1x64xf32>
    tpu.vector_store %arg4[%c0_6, %c0_7, %c0_8], %9 {strides = array<i32>} : memref<1x1x64xf32, #tpu.memory_space<vmem>>, vector<1x1x64xf32>,
    %10 = arith.mulf %2, %2 : vector<128x64xf32>
    %cst_9 = arith.constant dense<0.000000e+00> : vector<64xf32>
    %11 = vector.multi_reduction <add>, %10, %cst_9 [0] : vector<128x64xf32> to vector<64xf32>
    %12 = vector.shape_cast %11 : vector<64xf32> to vector<1x64xf32>
    %c0_10 = arith.constant 0 : index
    %c0_11 = arith.constant 0 : index
    %c0_12 = arith.constant 0 : index
    %13 = vector.load %arg5[%c0_10, %c0_11, %c0_12] : memref<1x1x64xf32, #tpu.memory_space<vmem>>, vector<1x1x64xf32>
    %14 = vector.shape_cast %13 : vector<1x1x64xf32> to vector<1x64xf32>
    %15 = vector.shape_cast %12 : vector<1x64xf32> to vector<1x1x64xf32>
    tpu.vector_store %arg5[%c0_10, %c0_11, %c0_12], %15 {strides = array<i32>} : memref<1x1x64xf32, #tpu.memory_space<vmem>>, vector<1x1x64xf32>,
    return
  }
  func.func @transform_0(%arg0: i32) -> (i32, i32) {
    %c0_i32 = arith.constant 0 : i32
    %c0_i32_0 = arith.constant 0 : i32
    return %arg0, %c0_i32 : i32, i32
  }
  func.func @transform_1(%arg0: i32) -> (i32, i32) {
    %c0_i32 = arith.constant 0 : i32
    %c0_i32_0 = arith.constant 0 : i32
    %c0_i32_1 = arith.constant 0 : i32
    return %c0_i32, %c0_i32_0 : i32, i32
  }
  func.func @transform_2(%arg0: i32) -> (i32, i32) {
    %c0_i32 = arith.constant 0 : i32
    %c0_i32_0 = arith.constant 0 : i32
    return %arg0, %c0_i32 : i32, i32
  }
  func.func @transform_3(%arg0: i32) -> (i32, i32, i32) {
    %c0_i32 = arith.constant 0 : i32
    %c0_i32_0 = arith.constant 0 : i32
    %c0_i32_1 = arith.constant 0 : i32
    return %arg0, %c0_i32, %c0_i32_0 : i32, i32, i32
  }
  func.func @transform_4(%arg0: i32) -> (i32, i32, i32) {
    %c0_i32 = arith.constant 0 : i32
    %c0_i32_0 = arith.constant 0 : i32
    %c0_i32_1 = arith.constant 0 : i32
    return %arg0, %c0_i32, %c0_i32_0 : i32, i32, i32
  }
}

module attributes {stable_mosaic.version = 11 : i64} {
  func.func @_gemm_stats_kernel(%arg0: i32, %arg1: memref<512x144xbf16, #tpu.memory_space<vmem>>, %arg2: memref<144x32xbf16, #tpu.memory_space<vmem>>, %arg3: memref<512x32xbf16, #tpu.memory_space<vmem>>, %arg4: memref<1x1x32xf32, #tpu.memory_space<vmem>>, %arg5: memref<1x1x32xf32, #tpu.memory_space<vmem>>) attributes {dimension_semantics = [#tpu.dimension_semantics<parallel>], iteration_bounds = array<i64: 1>, scalar_prefetch = 0 : i64, scratch_operands = 0 : i64, tpu.core_type = #tpu.core_type<tc>, window_params = [{transform_indices = @transform_0, window_bounds = array<i64: 512, 144>}, {pipeline_mode = #tpu.pipeline_mode<synchronous>, transform_indices = @transform_1, window_bounds = array<i64: 144, 32>}, {transform_indices = @transform_2, window_bounds = array<i64: 512, 32>}, {transform_indices = @transform_3, window_bounds = array<i64: 1, 1, 32>}, {transform_indices = @transform_4, window_bounds = array<i64: 1, 1, 32>}]} {
    %c0 = arith.constant 0 : index
    %c0_0 = arith.constant 0 : index
    %0 = vector.load %arg1[%c0, %c0_0] : memref<512x144xbf16, #tpu.memory_space<vmem>>, vector<512x144xbf16>
    %c0_1 = arith.constant 0 : index
    %c0_2 = arith.constant 0 : index
    %1 = vector.load %arg2[%c0_1, %c0_2] : memref<144x32xbf16, #tpu.memory_space<vmem>>, vector<144x32xbf16>
    %cst = arith.constant dense<0.000000e+00> : vector<512x32xf32>
    %2 = tpu.matmul %0, %1, %cst {dimension_numbers = #tpu.dot_dimension_numbers<[1], [0], [0], [1], [0, 0, 1, 1], [], []>} : vector<512x144xbf16>, vector<144x32xbf16>, vector<512x32xf32> -> vector<512x32xf32>
    %3 = arith.truncf %2 : vector<512x32xf32> to vector<512x32xbf16>
    %c0_3 = arith.constant 0 : index
    %c0_4 = arith.constant 0 : index
    %4 = vector.load %arg3[%c0_3, %c0_4] : memref<512x32xbf16, #tpu.memory_space<vmem>>, vector<512x32xbf16>
    tpu.vector_store %arg3[%c0_3, %c0_4], %3 {strides = array<i32>} : memref<512x32xbf16, #tpu.memory_space<vmem>>, vector<512x32xbf16>,
    %cst_5 = arith.constant dense<0.000000e+00> : vector<32xf32>
    %5 = vector.multi_reduction <add>, %2, %cst_5 [0] : vector<512x32xf32> to vector<32xf32>
    %6 = vector.shape_cast %5 : vector<32xf32> to vector<1x32xf32>
    %c0_6 = arith.constant 0 : index
    %c0_7 = arith.constant 0 : index
    %c0_8 = arith.constant 0 : index
    %7 = vector.load %arg4[%c0_6, %c0_7, %c0_8] : memref<1x1x32xf32, #tpu.memory_space<vmem>>, vector<1x1x32xf32>
    %8 = vector.shape_cast %7 : vector<1x1x32xf32> to vector<1x32xf32>
    %9 = vector.shape_cast %6 : vector<1x32xf32> to vector<1x1x32xf32>
    tpu.vector_store %arg4[%c0_6, %c0_7, %c0_8], %9 {strides = array<i32>} : memref<1x1x32xf32, #tpu.memory_space<vmem>>, vector<1x1x32xf32>,
    %10 = arith.mulf %2, %2 : vector<512x32xf32>
    %cst_9 = arith.constant dense<0.000000e+00> : vector<32xf32>
    %11 = vector.multi_reduction <add>, %10, %cst_9 [0] : vector<512x32xf32> to vector<32xf32>
    %12 = vector.shape_cast %11 : vector<32xf32> to vector<1x32xf32>
    %c0_10 = arith.constant 0 : index
    %c0_11 = arith.constant 0 : index
    %c0_12 = arith.constant 0 : index
    %13 = vector.load %arg5[%c0_10, %c0_11, %c0_12] : memref<1x1x32xf32, #tpu.memory_space<vmem>>, vector<1x1x32xf32>
    %14 = vector.shape_cast %13 : vector<1x1x32xf32> to vector<1x32xf32>
    %15 = vector.shape_cast %12 : vector<1x32xf32> to vector<1x1x32xf32>
    tpu.vector_store %arg5[%c0_10, %c0_11, %c0_12], %15 {strides = array<i32>} : memref<1x1x32xf32, #tpu.memory_space<vmem>>, vector<1x1x32xf32>,
    return
  }
  func.func @transform_0(%arg0: i32) -> (i32, i32) {
    %c0_i32 = arith.constant 0 : i32
    %c0_i32_0 = arith.constant 0 : i32
    return %arg0, %c0_i32 : i32, i32
  }
  func.func @transform_1(%arg0: i32) -> (i32, i32) {
    %c0_i32 = arith.constant 0 : i32
    %c0_i32_0 = arith.constant 0 : i32
    %c0_i32_1 = arith.constant 0 : i32
    return %c0_i32, %c0_i32_0 : i32, i32
  }
  func.func @transform_2(%arg0: i32) -> (i32, i32) {
    %c0_i32 = arith.constant 0 : i32
    %c0_i32_0 = arith.constant 0 : i32
    return %arg0, %c0_i32 : i32, i32
  }
  func.func @transform_3(%arg0: i32) -> (i32, i32, i32) {
    %c0_i32 = arith.constant 0 : i32
    %c0_i32_0 = arith.constant 0 : i32
    %c0_i32_1 = arith.constant 0 : i32
    return %arg0, %c0_i32, %c0_i32_0 : i32, i32, i32
  }
  func.func @transform_4(%arg0: i32) -> (i32, i32, i32) {
    %c0_i32 = arith.constant 0 : i32
    %c0_i32_0 = arith.constant 0 : i32
    %c0_i32_1 = arith.constant 0 : i32
    return %arg0, %c0_i32, %c0_i32_0 : i32, i32, i32
  }
}

module attributes {stable_mosaic.version = 11 : i64} {
  func.func @_gemm_kernel(%arg0: i32, %arg1: memref<512x72xbf16, #tpu.memory_space<vmem>>, %arg2: memref<72x12xbf16, #tpu.memory_space<vmem>>, %arg3: memref<512x12xf32, #tpu.memory_space<vmem>>) attributes {dimension_semantics = [#tpu.dimension_semantics<parallel>], iteration_bounds = array<i64: 4>, scalar_prefetch = 0 : i64, scratch_operands = 0 : i64, tpu.core_type = #tpu.core_type<tc>, window_params = [{transform_indices = @transform_0, window_bounds = array<i64: 512, 72>}, {pipeline_mode = #tpu.pipeline_mode<synchronous>, transform_indices = @transform_1, window_bounds = array<i64: 72, 12>}, {transform_indices = @transform_2, window_bounds = array<i64: 512, 12>}]} {
    %c0 = arith.constant 0 : index
    %c0_0 = arith.constant 0 : index
    %0 = vector.load %arg1[%c0, %c0_0] : memref<512x72xbf16, #tpu.memory_space<vmem>>, vector<512x72xbf16>
    %c0_1 = arith.constant 0 : index
    %c0_2 = arith.constant 0 : index
    %1 = vector.load %arg2[%c0_1, %c0_2] : memref<72x12xbf16, #tpu.memory_space<vmem>>, vector<72x12xbf16>
    %cst = arith.constant dense<0.000000e+00> : vector<512x12xf32>
    %2 = tpu.matmul %0, %1, %cst {dimension_numbers = #tpu.dot_dimension_numbers<[1], [0], [0], [1], [0, 0, 1, 1], [], []>} : vector<512x72xbf16>, vector<72x12xbf16>, vector<512x12xf32> -> vector<512x12xf32>
    %3 = math.tanh %2 : vector<512x12xf32>
    %c0_3 = arith.constant 0 : index
    %c0_4 = arith.constant 0 : index
    %4 = vector.load %arg3[%c0_3, %c0_4] : memref<512x12xf32, #tpu.memory_space<vmem>>, vector<512x12xf32>
    tpu.vector_store %arg3[%c0_3, %c0_4], %3 {strides = array<i32>} : memref<512x12xf32, #tpu.memory_space<vmem>>, vector<512x12xf32>,
    return
  }
  func.func @transform_0(%arg0: i32) -> (i32, i32) {
    %c0_i32 = arith.constant 0 : i32
    %c0_i32_0 = arith.constant 0 : i32
    return %arg0, %c0_i32 : i32, i32
  }
  func.func @transform_1(%arg0: i32) -> (i32, i32) {
    %c0_i32 = arith.constant 0 : i32
    %c0_i32_0 = arith.constant 0 : i32
    %c0_i32_1 = arith.constant 0 : i32
    return %c0_i32, %c0_i32_0 : i32, i32
  }
  func.func @transform_2(%arg0: i32) -> (i32, i32) {
    %c0_i32 = arith.constant 0 : i32
    %c0_i32_0 = arith.constant 0 : i32
    return %arg0, %c0_i32 : i32, i32
  }
}

</mosaic_0001>

<bundles_post_ra>
// kernel: generator_forward.5
= control target key start
LH: loop header
LB: loop body
LE: loop exit
PB: predicated region body
PF: predicated region fallthrough
CT: control target
= control target key end

     0   :  { %10 = vsyncpa [#allocation3], 0  ;;  %s610_s15 = smov [#allocation2]   ;;  %s739_s0 = inlined_call_operand.vmem [shape: bf16[2,16], index: 0, kind: input, shape index: {}]   ;;  %s740_s1 = inlined_call_operand.hbm [shape: bf16[16,1024], index: 1, kind: input, shape index: {}]   ;;  %s741_s2 = inlined_call_operand.vmem [shape: bf16[2,1024], index: 2, kind: output, shape index: {0}]   ;;  %s742_s3 = inlined_call_operand.vmem [shape: f32[1,1,1024], index: 3, kind: output, shape index: {1}]   ;;  %s743_s4 = inlined_call_operand.vmem [shape: f32[1,1,1024], index: 4, kind: output, shape index: {2}]  }
   0x1   :  { %s18_s16 = sshll.u32 %s610_s15, 4  ;;  %s586_s19 = scalar_lea.hbm %s740_s1, 1024  ;;  %s19_s16 = int_to_ptr.vmem [resolvable:$true] %s18_s16 }
   0x2   :  { %p587_p0 = scmp.ne.s32.totalorder %s740_s1, %s586_s19  ;;  %p590_p1 = scmp.lt.u32.totalorder %s586_s19, %s740_s1 }
   0x4   :  { %p592_p2 = pnand %p590_p1, %p587_p0 }
   0x6   :  { %595 = shalt.err (!%p592_p2)
}
   0x7   :  { %s596_s24 = scalar_lea.vmem %s19_s16, 1024  ;;  %p601_p4 = scmp.lt.s32.totalorder %s19_s16, %s19_s16 }
   0x8   :  { %p597_p3 = scmp.ne.s32.totalorder %s19_s16, %s596_s24  ;;  %p602_p5 = scmp.lt.s32.totalorder %s596_s24, %s596_s24 }
   0xa   :  { %p603_p6 = por %p602_p5, %p601_p4 }
   0xc   :  { %p604_p7 = pnand %p603_p6, %p597_p3 }
   0xe   :  { %607 = shalt.err (!%p604_p7)
}
   0xf   :  { %s611_s25 = smov 512   ;;  %s612_s26 = smov 32  }
  0x10   :  { %24 = dma.hbm_to_vmem [thread:$0]  %s740_s1, 1024, %s19_s16, [#allocation3], %s611_s25, %s611_s25, %s612_s26  }
  0x11   :  { %608 = dma.done.wait [#allocation3], 1024  }
  0x12   :  { %609 = vsyncadd [#allocation3], 4294966272  ;;  %v613_v0 = vmov 0   ;;  %v30_v1 = vld [vmem:[#allocation2] sm:$0xff]  ;;  %v31_v3 = vld [vmem:[#allocation2 + $0x8] sm:$0xff]  ;;  %vm78_vm0 = vcmask 130048   ;;  %v269_v20 = vlaneseq }
  0x13   :  { %114 = vmatprep.mubr.bf16.mxu0 %v613_v0  ;;  %155 = vmatprep.mubr.bf16.mxu1 %v613_v0  ;;  %v34_v2 = vld [vmem:[#allocation2 + $0x20] sm:$0xff]  ;;  %v35_v5 = vld [vmem:[#allocation2 + $0x28] sm:$0xff]  ;;  %v32_v7 = vld [vmem:[#allocation2 + $0x10] sm:$0xff]  ;;  %v614_v18 = vmov 1966171168   ;;  %vm313_vm1 = vcmask 1041408  }
  0x14   :  { %v566_v4 = vcombine.high %v30_v1, %v34_v2  ;;  %v565_v6 = vcombine.low %v30_v1, %v34_v2  ;;  %v568_v8 = vcombine.high %v31_v3, %v35_v5  ;;  %v567_v9 = vcombine.low %v31_v3, %v35_v5  ;;  %v36_v10 = vld [vmem:[#allocation2 + $0x30] sm:$0xff]  ;;  %v33_v11 = vld [vmem:[#allocation2 + $0x18] sm:$0xff]  ;;  %v29_v15 = vld [vmem:[%s739_s0] sm:$0x1] }
  0x15   :  { %v37_v12 = vld [vmem:[#allocation2 + $0x38] sm:$0xff]  ;;  %v570_v13 = vcombine.high %v32_v7, %v36_v10  ;;  %v569_v16 = vcombine.low %v32_v7, %v36_v10  ;;  %v267_v19 = vunpack.c.l.s4 %v614_v18  ;;  %v270_v22 = vshrl.u32 %v269_v20, 7 }
  0x16   :  { %82 = vmatprep.subr.bf16.mxu0 %v566_v4  ;;  %v572_v14 = vcombine.high %v33_v11, %v37_v12  ;;  %123 = vmatprep.subr.bf16.mxu1 %v568_v8  ;;  %v571_v17 = vcombine.low %v33_v11, %v37_v12 }
  0x17   :  { %83 = vmatpush1.bf16.msra.mxu0 %v565_v6  ;;  %124 = vmatpush1.bf16.msra.mxu1 %v567_v9  ;;  %v268_v21 = vunpack.c.0.s8 %v267_v19 }
  0x18   :  { %164 = vmatprep.subr.bf16.mxu0 %v570_v13  ;;  %205 = vmatprep.subr.bf16.mxu1 %v572_v14 }
  0x19   :  { %v655_v24 = vsub.s32 %v268_v21, %v270_v22 }
  0x1a   :  { %573 = vmatmul.mubr.msk.bf16.vlgmr.msra.gmra.mrb[0].mxu0 %vm78_vm0, %v29_v15  ;;  %574 = vmatmul.mubr.msk.bf16.vlgmr.msra.gmra.mrb[0].mxu1 %vm78_vm0, %v29_v15 }
  0x1b   :  { %165 = vmatpush1.bf16.msra.mxu0 %v569_v16  ;;  %206 = vmatpush1.bf16.msra.mxu1 %v571_v17 }
  0x1c   :  { %196 = vmatprep.mubr.bf16.mxu0 %v613_v0  ;;  %237 = vmatprep.mubr.bf16.mxu1 %v613_v0 }
  0x22   :  { %575 = vmatmul.mubr.msk.bf16.vlgmr.msra.gmra.mrb[4].mxu0 %vm78_vm0, %v29_v15  ;;  %576 = vmatmul.mubr.msk.bf16.vlgmr.msra.gmra.mrb[4].mxu1 %vm78_vm0, %v29_v15 }
  0xed   :  { %v116_v23 = vpop.f32.mrb[0].mxu0  ;;  %v157_v27 = vpop.f32.mrb[0].mxu1 }
  0xee   :  { %v314_v25 = vsel %vm313_vm1, %v116_v23, 0.0  ;;  %v429_v26 = vmul.f32 %v116_v23, %v116_v23  ;;  %v118_v28 = vpop.f32.mrb[1].mxu0  ;;  %v328_v30 = vsel %vm313_vm1, %v157_v27, 0.0  ;;  %v431_v31 = vmul.f32 %v157_v27, %v157_v27  ;;  %v159_v33 = vpop.f32.mrb[1].mxu1 }
  0xef   :  { %v315_v29 = vrot.slane %v314_v25, 4  ;;  %v577_v32 = vpack.c.bf16 %v118_v28, %v116_v23  ;;  %v120_v34 = vpop.f32.mrb[2].mxu0  ;;  %v329_v36 = vrot.slane %v328_v30, 4  ;;  %v321_v37 = vsel %vm313_vm1, %v118_v28, 0.0  ;;  %v161_v39 = vpop.f32.mrb[2].mxu1 }
  0xf0   :  { %v437_v35 = vsel %vm313_vm1, %v429_v26, 0.0  ;;  %v430_v38 = vmul.f32 %v118_v28, %v118_v28  ;;  %v121_v40 = vpop.f32.mrb[3].mxu0  ;;  %v451_v43 = vsel %vm313_vm1, %v431_v31, 0.0  ;;  %v162_v45 = vpop.f32.mrb[3].mxu1  ;;  %v322_v48 = vrot.slane %v321_v37, 4 }
  0xf1   :  { %v316_v41 = vadd.f32 %v315_v29, %v314_v25  ;;  %v438_v42 = vrot.slane %v437_v35, 4  ;;  %v663_v44 = vrot.slane %v577_v32, %v655_v24  ;;  %v330_v46 = vadd.f32 %v329_v36, %v328_v30 }
  0xf2   :  { %v452_v47 = vrot.slane %v451_v43, 4  ;;  %v444_v49 = vsel %vm313_vm1, %v430_v38, 0.0  ;;  %v578_v53 = vpack.c.bf16 %v159_v33, %v157_v27  ;;  %v323_v56 = vadd.f32 %v322_v48, %v321_v37 }
  0xf3   :  { %v317_v50 = vrot.slane %v316_v41, 2  ;;  %v439_v51 = vadd.f32 %v438_v42, %v437_v35  ;;  %v445_v52 = vrot.slane %v444_v49, 4  ;;  %v331_v54 = vrot.slane %v330_v46, 2 }
  0xf4   :  { %v453_v55 = vadd.f32 %v452_v47, %v451_v43  ;;  %v335_v57 = vsel %vm313_vm1, %v159_v33, 0.0  ;;  %v668_v61 = vrot.slane %v578_v53, %v655_v24  ;;  %v324_v1 = vrot.slane %v323_v56, 2 }
  0xf5   :  { %v318_v58 = vadd.f32 %v317_v50, %v316_v41  ;;  %v440_v59 = vrot.slane %v439_v51, 2  ;;  %v446_v60 = vadd.f32 %v445_v52, %v444_v49  ;;  %v670_v62 = vpop.f32.mrb[4].mxu0  ;;  %v332_v63 = vadd.f32 %v331_v54, %v330_v46  ;;  %v672_v3 = vpop.f32.mrb[4].mxu1 }
  0xf6   :  { %v454_v0 = vrot.slane %v453_v55, 2  ;;  %v336_v2 = vrot.slane %v335_v57, 4  ;;  %v674_v4 = vpop.f32.mrb[5].mxu0  ;;  %v294_v8 = vcombine.low %v663_v44, %v668_v61  ;;  %v678_v9 = vpop.f32.mrb[5].mxu1  ;;  %v325_v12 = vadd.f32 %v324_v1, %v323_v56 }
  0xf7   :  { %v319_v5 = vrot.slane %v318_v58, 1  ;;  %v441_v6 = vadd.f32 %v440_v59, %v439_v51  ;;  %v447_v7 = vrot.slane %v446_v60, 2  ;;  %v202_v10 = vpop.f32.mrb[6].mxu0  ;;  %v333_v11 = vrot.slane %v332_v63, 1  ;;  %v243_v14 = vpop.f32.mrb[6].mxu1 }
  0xf8   :  { %v337_v13 = vadd.f32 %v336_v2, %v335_v57  ;;  %v203_v15 = vpop.f32.mrb[7].mxu0  ;;  %v244_v18 = vpop.f32.mrb[7].mxu1  ;;  %v455_v20 = vadd.f32 %v454_v0, %v453_v55  ;;  %v326_v21 = vrot.slane %v325_v12, 1  ;;  %v432_v26 = vmul.f32 %v159_v33, %v159_v33 }
  0xf9   :  { %v442_v16 = vrot.slane %v441_v6, 1  ;;  %v448_v17 = vadd.f32 %v447_v7, %v446_v60  ;;  %v320_v19 = vadd.f32 %v319_v5, %v318_v58  ;;  %v342_v27 = vsel %vm313_vm1, %v670_v62, 0.0 }
  0xfa   :  { %v338_v22 = vrot.slane %v337_v13, 2  ;;  %v334_v28 = vadd.f32 %v333_v11, %v332_v63  ;;  %v327_v29 = vadd.f32 %v326_v21, %v325_v12  ;;  %v343_v31 = vrot.slane %v342_v27, 4 }
  0xfb   :  { %v443_v23 = vadd.f32 %v442_v16, %v441_v6  ;;  %v449_v25 = vrot.slane %v448_v17, 1  ;;  %v458_v34 = vsel %vm313_vm1, %v432_v26, 0.0  ;;  %v433_v35 = vmul.f32 %v670_v62, %v670_v62 }
  0xfc   :  { %v339_v30 = vadd.f32 %v338_v22, %v337_v13  ;;  %v356_v36 = vsel %vm313_vm1, %v672_v3, 0.0  ;;  %v378_v37 = vcombine.low %v320_v19, %v327_v29  ;;  %v459_v39 = vrot.slane %v458_v34, 4 }
  0xfd   :  { %v450_v32 = vadd.f32 %v449_v25, %v448_v17  ;;  %v344_v33 = vadd.f32 %v343_v31, %v342_v27  ;;  %v465_v41 = vsel %vm313_vm1, %v433_v35, 0.0  ;;  %v357_v42 = vrot.slane %v356_v36, 4 }
  0xfe   :  { %v340_v38 = vrot.slane %v339_v30, 1  ;;  %v435_v43 = vmul.f32 %v672_v3, %v672_v3  ;;  %v460_v45 = vadd.f32 %v459_v39, %v458_v34  ;;  %v456_v47 = vrot.slane %v455_v20, 1 }
  0xff   :  { %v501_v40 = vcombine.low %v443_v23, %v450_v32  ;;  %v345_v46 = vrot.slane %v344_v33, 2  ;;  %v691_v48 = vrot.slane %v378_v37, %v655_v24  ;;  %v466_v49 = vrot.slane %v465_v41, 4 }
 0x100   :  { %v341_v44 = vadd.f32 %v340_v38, %v339_v30  ;;  %v479_v50 = vsel %vm313_vm1, %v435_v43, 0.0  ;;  %v461_v52 = vrot.slane %v460_v45, 2  ;;  %v358_v53 = vadd.f32 %v357_v42, %v356_v36 }
 0x101   :  { %v480_v54 = vrot.slane %v479_v50, 4  ;;  %v346_v55 = vadd.f32 %v345_v46, %v344_v33  ;;  %v467_v56 = vadd.f32 %v466_v49, %v465_v41  ;;  %v579_v57 = vpack.c.bf16 %v674_v4, %v670_v62 }
 0x102   :  { %v379_v51 = vcombine.low %v334_v28, %v341_v44  ;;  %v349_v58 = vsel %vm313_vm1, %v674_v4, 0.0  ;;  %v462_v60 = vadd.f32 %v461_v52, %v460_v45  ;;  %v457_v1 = vadd.f32 %v456_v47, %v455_v20 }
 0x103   :  { %v481_v61 = vadd.f32 %v480_v54, %v479_v50  ;;  %v468_v63 = vrot.slane %v467_v56, 2  ;;  %v350_v0 = vrot.slane %v349_v58, 4  ;;  %v359_v6 = vrot.slane %v358_v53, 2 }
 0x104   :  { %v699_v59 = vrot.slane %v379_v51, %v655_v24  ;;  %v463_v5 = vrot.slane %v462_v60, 1  ;;  %v302_v7 = vrot.slane %v294_v8, %v655_v24  ;;  %v347_v10 = vrot.slane %v346_v55, 1 }
 0x105   :  { %v351_v62 = vadd.f32 %v350_v0, %v349_v58  ;;  %v434_v11 = vmul.f32 %v674_v4, %v674_v4  ;;  %v482_v13 = vrot.slane %v481_v61, 2  ;;  %v286_v14 = vrot.slane %v579_v57, %v655_v24 }
 0x106   :  { %v410_v2 = vcombine.low %v691_v48, %v699_v59  ;;  %v464_v12 = vadd.f32 %v463_v5, %v462_v60  ;;  %v580_v15 = vpack.c.bf16 %v678_v9, %v672_v3  ;;  %v511_v16 = vrot.slane %v501_v40, %v655_v24 }
 0x107   :  { %v469_v17 = vadd.f32 %v468_v63, %v467_v56  ;;  %v352_v18 = vrot.slane %v351_v62, 2  ;;  %v472_v19 = vsel %vm313_vm1, %v434_v11, 0.0  ;;  %v360_v8 = vadd.f32 %v359_v6, %v358_v53 }
 0x108   :  { %v502_v20 = vcombine.low %v457_v1, %v464_v12  ;;  %v473_v21 = vrot.slane %v472_v19, 4  ;;  %v293_v22 = vrot.slane %v580_v15, %v655_v24  ;;  %v348_v23 = vadd.f32 %v347_v10, %v346_v55 }
 0x109   :  { %v353_v4 = vadd.f32 %v352_v18, %v351_v62  ;;  %v363_v25 = vsel %vm313_vm1, %v678_v9, 0.0  ;;  %v436_v26 = vmul.f32 %v678_v9, %v678_v9  ;;  %v483_v27 = vadd.f32 %v482_v13, %v481_v61 }
 0x10a   :  { %v518_v3 = vrot.slane %v502_v20, %v655_v24  ;;  %v474_v28 = vadd.f32 %v473_v21, %v472_v19  ;;  %v295_v29 = vcombine.low %v286_v14, %v293_v22  ;;  %v470_v30 = vrot.slane %v469_v17, 1 }
 0x10b   :  { %v354_v31 = vrot.slane %v353_v4, 1  ;;  %v364_v32 = vrot.slane %v363_v25, 4  ;;  %v486_v34 = vsel %vm313_vm1, %v436_v26, 0.0  ;;  %v361_v42 = vrot.slane %v360_v8, 1 }
 0x10c   :  { %v533_v35 = vcombine.low %v511_v16, %v518_v3  ;;  %v475_v36 = vrot.slane %v474_v28, 2  ;;  %v309_v37 = vrot.slane %v295_v29, %v655_v24  ;;  %v487_v38 = vrot.slane %v486_v34, 4 }
 0x10d   :  { %v355_v39 = vadd.f32 %v354_v31, %v353_v4  ;;  %v365_v33 = vadd.f32 %v364_v32, %v363_v25  ;;  %v471_v45 = vadd.f32 %v470_v30, %v469_v17  ;;  %v484_v46 = vrot.slane %v483_v27, 1 }
 0x10e   :  { %v476_v40 = vadd.f32 %v475_v36, %v474_v28  ;;  %v310_v41 = vcombine.low %v302_v7, %v309_v37  ;;  %v488_v9 = vadd.f32 %v487_v38, %v486_v34  ;;  %v362_v53 = vadd.f32 %v361_v42, %v360_v8 }
 0x10f   :  { %v380_v43 = vcombine.low %v348_v23, %v355_v39  ;;  %v366_v44 = vrot.slane %v365_v33, 2  ;;  %v485_v55 = vadd.f32 %v484_v46, %v483_v27  ;;  %v418_v62 = vrot.slane %v410_v2, %v655_v24 }
 0x110   :  { %v477_v47 = vrot.slane %v476_v40, 1  ;;  %312 = vst [vmem:[%s741_s2] sm:$0xff] %v310_v41  ;;  %v489_v49 = vrot.slane %v488_v9, 2  ;;  %v541_v12 = vrot.slane %v533_v35, %v655_v24 }
 0x111   :  { %v367_v50 = vadd.f32 %v366_v44, %v365_v33  ;;  %v402_v61 = vrot.slane %v380_v43, %v655_v24 }
 0x112   :  { %v478_v51 = vadd.f32 %v477_v47, %v476_v40  ;;  %v490_v52 = vadd.f32 %v489_v49, %v488_v9 }
 0x113   :  { %v368_v54 = vrot.slane %v367_v50, 1 }
 0x114   :  { %v503_v56 = vcombine.low %v471_v45, %v478_v51  ;;  %v491_v57 = vrot.slane %v490_v52, 1 }
 0x115   :  { %v369_v58 = vadd.f32 %v368_v54, %v367_v50 }
 0x116   :  { %v492_v60 = vadd.f32 %v491_v57, %v490_v52  ;;  %v525_v0 = vrot.slane %v503_v56, %v655_v24 }
 0x117   :  { %v381_v63 = vcombine.low %v362_v53, %v369_v58 }
 0x118   :  { %v504_v1 = vcombine.low %v485_v55, %v492_v60 }
 0x119   :  { %v409_v5 = vrot.slane %v381_v63, %v655_v24 }
 0x11a   :  { %v532_v6 = vrot.slane %v504_v1, %v655_v24 }
 0x11b   :  { %v411_v7 = vcombine.low %v402_v61, %v409_v5 }
 0x11c   :  { %v534_v10 = vcombine.low %v525_v0, %v532_v6 }
 0x11d   :  { %v425_v11 = vrot.slane %v411_v7, %v655_v24 }
 0x11e   :  { %v548_v13 = vrot.slane %v534_v10, %v655_v24 }
 0x11f   :  { %v426_v14 = vcombine.low %v418_v62, %v425_v11 }
 0x120   :  { %v549_v15 = vcombine.low %v541_v12, %v548_v13 }
 0x121   :  { %428 = vst [vmem:[%s742_s3] sm:$0xff] %v426_v14 }
 0x122   :  { %551 = vst [vmem:[%s743_s4] sm:$0xff] %v549_v15 }
 0x123   :  { %564 = vsyncpa [#allocation3], 1 }

// kernel: generator_forward.6
= control target key start
LH: loop header
LB: loop body
LE: loop exit
PB: predicated region body
PF: predicated region fallthrough
CT: control target
= control target key end

     0   :  { %10 = vsyncpa [#allocation3], 0  ;;  %s808_s15 = smov [#allocation2]   ;;  %s890_s0 = inlined_call_operand.vmem [shape: bf16[32,576], index: 0, kind: input, shape index: {}]   ;;  %s891_s1 = inlined_call_operand.hbm [shape: bf16[576,128], index: 1, kind: input, shape index: {}]   ;;  %s892_s2 = inlined_call_operand.vmem [shape: bf16[32,128], index: 2, kind: output, shape index: {0}]   ;;  %s893_s3 = inlined_call_operand.vmem [shape: f32[1,1,128], index: 3, kind: output, shape index: {1}]   ;;  %s894_s4 = inlined_call_operand.vmem [shape: f32[1,1,128], index: 4, kind: output, shape index: {2}]  }
   0x1   :  { %s18_s16 = sshll.u32 %s808_s15, 4  ;;  %s784_s19 = scalar_lea.hbm %s891_s1, 4608  ;;  %s19_s16 = int_to_ptr.vmem [resolvable:$true] %s18_s16 }
   0x2   :  { %p785_p0 = scmp.ne.s32.totalorder %s891_s1, %s784_s19  ;;  %p788_p1 = scmp.lt.u32.totalorder %s784_s19, %s891_s1 }
   0x4   :  { %p790_p2 = pnand %p788_p1, %p785_p0 }
   0x6   :  { %793 = shalt.err (!%p790_p2)
}
   0x7   :  { %s794_s24 = scalar_lea.vmem %s19_s16, 4608  ;;  %p799_p4 = scmp.lt.s32.totalorder %s19_s16, %s19_s16 }
   0x8   :  { %p795_p3 = scmp.ne.s32.totalorder %s19_s16, %s794_s24  ;;  %p800_p5 = scmp.lt.s32.totalorder %s794_s24, %s794_s24 }
   0xa   :  { %p801_p6 = por %p800_p5, %p799_p4 }
   0xc   :  { %p802_p7 = pnand %p801_p6, %p795_p3 }
   0xe   :  { %805 = shalt.err (!%p802_p7)
}
   0xf   :  { %s809_s25 = smov 64   ;;  %s810_s26 = smov 4  }
  0x10   :  { %24 = dma.hbm_to_vmem [thread:$0]  %s891_s1, 4608, %s19_s16, [#allocation3], %s809_s25, %s809_s25, %s810_s26  }
  0x11   :  { %806 = dma.done.wait [#allocation3], 4608  }
  0x12   :  { %807 = vsyncadd [#allocation3], 4294962688  ;;  %v734_v0 = vld [vmem:[#allocation2 + $0x40] sm:$0xff]   ;;  %v738_v4 = vld [vmem:[#allocation2 + $0x48] sm:$0xff]   ;;  %vm379_vm0 = vcmask 523264  }
  0x13   :  { %v735_v1 = vld [vmem:[#allocation2 + $0xc0] sm:$0xff]   ;;  %657 = vmatprep.subr.bf16.mxu0 %v734_v0  ;;  %v739_v5 = vld [vmem:[#allocation2 + $0xc8] sm:$0xff]   ;;  %v742_v8 = vld [vmem:[#allocation2 + $0x50] sm:$0xff]  }
  0x14   :  { %v736_v2 = vld [vmem:[#allocation2] sm:$0xff]   ;;  %685 = vmatprep.subr.bf16.mxu1 %v735_v1  ;;  %v740_v6 = vld [vmem:[#allocation2 + $0x8] sm:$0xff]   ;;  %v743_v9 = vld [vmem:[#allocation2 + $0xd0] sm:$0xff]  }
  0x15   :  { %v737_v3 = vld [vmem:[#allocation2 + $0x80] sm:$0xff]   ;;  %658 = vmatpush3.bf16.msra.mxu0 %v736_v2  ;;  %v741_v7 = vld [vmem:[#allocation2 + $0x88] sm:$0xff]   ;;  %v744_v10 = vld [vmem:[#allocation2 + $0x10] sm:$0xff]  }
  0x16   :  { %686 = vmatpush3.bf16.msra.mxu1 %v737_v3  ;;  %659 = vmatprep.subr.bf16.mxu0 %v738_v4  ;;  %v745_v11 = vld [vmem:[#allocation2 + $0x90] sm:$0xff]   ;;  %v746_v12 = vld [vmem:[#allocation2 + $0x58] sm:$0xff]   ;;  %v750_v16 = vld [vmem:[#allocation2 + $0x60] sm:$0xff]  }
  0x17   :  { %687 = vmatprep.subr.bf16.mxu1 %v739_v5  ;;  %v747_v13 = vld [vmem:[#allocation2 + $0xd8] sm:$0xff]   ;;  %v751_v17 = vld [vmem:[#allocation2 + $0xe0] sm:$0xff]   ;;  %v754_v20 = vld [vmem:[#allocation2 + $0x68] sm:$0xff]  }
  0x18   :  { %v748_v14 = vld [vmem:[#allocation2 + $0x18] sm:$0xff]   ;;  %v752_v18 = vld [vmem:[#allocation2 + $0x20] sm:$0xff]   ;;  %v755_v21 = vld [vmem:[#allocation2 + $0xe8] sm:$0xff]  }
  0x19   :  { %660 = vmatpush3.bf16.msra.mxu0 %v740_v6  ;;  %v749_v15 = vld [vmem:[#allocation2 + $0x98] sm:$0xff]   ;;  %v753_v19 = vld [vmem:[#allocation2 + $0xa0] sm:$0xff]   ;;  %v756_v22 = vld [vmem:[#allocation2 + $0x28] sm:$0xff]  }
  0x1a   :  { %688 = vmatpush3.bf16.msra.mxu1 %v741_v7  ;;  %661 = vmatprep.subr.bf16.mxu0 %v742_v8  ;;  %v757_v23 = vld [vmem:[#allocation2 + $0xa8] sm:$0xff]   ;;  %v758_v24 = vld [vmem:[#allocation2 + $0x70] sm:$0xff]   ;;  %v762_v28 = vld [vmem:[#allocation2 + $0x78] sm:$0xff]  }
  0x1b   :  { %689 = vmatprep.subr.bf16.mxu1 %v743_v9  ;;  %v759_v25 = vld [vmem:[#allocation2 + $0xf0] sm:$0xff]   ;;  %v763_v29 = vld [vmem:[#allocation2 + $0xf8] sm:$0xff]   ;;  %v771_v35 = vld [vmem:[%s890_s0 + $0xc] ss:$20 sps:$4 sm:$0xff]  }
  0x1c   :  { %v760_v26 = vld [vmem:[#allocation2 + $0x30] sm:$0xff]   ;;  %v764_v30 = vld [vmem:[#allocation2 + $0x38] sm:$0xff]   ;;  %v772_v36 = vld [vmem:[#allocation2 + $0x100] sm:$0xff]   ;;  %467 = vmatprep.mubr.bf16.mxu1 %v771_v35 }
  0x1d   :  { %662 = vmatpush3.bf16.msra.mxu0 %v744_v10  ;;  %v761_v27 = vld [vmem:[#allocation2 + $0xb0] sm:$0xff]   ;;  %v765_v31 = vld [vmem:[#allocation2 + $0xb8] sm:$0xff]   ;;  %v773_v37 = vld [vmem:[#allocation2 + $0x108] sm:$0xff]  }
  0x1e   :  { %690 = vmatpush3.bf16.msra.mxu1 %v745_v11  ;;  %663 = vmatprep.subr.bf16.mxu0 %v746_v12  ;;  %v766_v32 = vld [vmem:[%s890_s0] ss:$20 sps:$4 sm:$0xff]   ;;  %v768_v33 = vld [vmem:[%s890_s0 + $0x4] ss:$20 sps:$4 sm:$0xff]   ;;  %v769_v34 = vld [vmem:[%s890_s0 + $0x8] ss:$20 sps:$4 sm:$0xff]  }
  0x1f   :  { %691 = vmatprep.subr.bf16.mxu1 %v747_v13  ;;  %418 = vmatprep.mubr.bf16.mxu0 %v768_v33  ;;  %v774_v38 = vld [vmem:[%s890_s0 + $0x2c] ss:$20 sps:$4 sm:$0xff]   ;;  %v776_v39 = vld [vmem:[%s890_s0 + $0x34] ss:$20 sps:$4 sm:$0xff]   ;;  %v779_v42 = vld [vmem:[%s890_s0 + $0x30] ss:$20 sps:$4 sm:$0xff]  }
  0x20   :  { %v778_v40 = vld [vmem:[%s890_s0 + $0x28] ss:$20 sps:$4 sm:$0xff]   ;;  %v780_v41 = vld [vmem:[#allocation2 + $0x110] sm:$0xff]   ;;  %v783_v45 = vld [vmem:[%s890_s0 + $0x38] ss:$20 sps:$4 sm:$0xff]  }
  0x21   :  { %664 = vmatpush3.bf16.msra.mxu0 %v748_v14  ;;  %v782_v43 = vld [vmem:[%s890_s0 + $0x10] ss:$20 sps:$4 sm:$0xff]   ;;  %v781_v44 = vld [vmem:[#allocation2 + $0x118] sm:$0xff]  }
  0x22   :  { %692 = vmatpush3.bf16.msra.mxu1 %v749_v15  ;;  %665 = vmatprep.subr.bf16.mxu0 %v750_v16 }
  0x23   :  { %693 = vmatprep.subr.bf16.mxu1 %v751_v17 }
  0x25   :  { %666 = vmatpush3.bf16.msra.mxu0 %v752_v18 }
  0x26   :  { %694 = vmatpush3.bf16.msra.mxu1 %v753_v19  ;;  %667 = vmatprep.subr.bf16.mxu0 %v754_v20 }
  0x27   :  { %695 = vmatprep.subr.bf16.mxu1 %v755_v21 }
  0x29   :  { %668 = vmatpush3.bf16.msra.mxu0 %v756_v22 }
  0x2a   :  { %696 = vmatpush3.bf16.msra.mxu1 %v757_v23  ;;  %669 = vmatprep.subr.bf16.mxu0 %v758_v24 }
  0x2b   :  { %697 = vmatprep.subr.bf16.mxu1 %v759_v25 }
  0x2d   :  { %670 = vmatpush3.bf16.msra.mxu0 %v760_v26 }
  0x2e   :  { %698 = vmatpush3.bf16.msra.mxu1 %v761_v27  ;;  %671 = vmatprep.subr.bf16.mxu0 %v762_v28 }
  0x2f   :  { %699 = vmatprep.subr.bf16.mxu1 %v763_v29 }
  0x31   :  { %672 = vmatpush3.bf16.msra.mxu0 %v764_v30 }
  0x32   :  { %700 = vmatpush3.bf16.msra.mxu1 %v765_v31  ;;  %719 = vmatprep.subr.bf16.mxu0 %v772_v36 }
  0x34   :  { %419 = vmatmul.mubr.bf16.vlgmr.msra.gmra.mrb[0].mxu0 %v766_v32 }
  0x35   :  { %468 = vmatmul.mubr.bf16.vlgmr.msra.gmra.mrb[0].mxu1 %v769_v34  ;;  %720 = vmatpush3.bf16.msra.mxu0 %v772_v36 }
  0x36   :  { %721 = vmatprep.subr.bf16.mxu0 %v773_v37  ;;  %426 = vmatprep.mubr.bf16.mxu0 %v774_v38 }
  0x37   :  { %475 = vmatprep.mubr.bf16.mxu1 %v776_v39 }
  0x39   :  { %722 = vmatpush3.bf16.msra.mxu0 %v773_v37 }
  0x3a   :  { %723 = vmatprep.subr.bf16.mxu0 %v780_v41 }
  0x3c   :  { %427 = vmatmul.mubr.bf16.gmra.mrb[4].mxu0 %v778_v40 }
  0x3d   :  { %476 = vmatmul.mubr.bf16.gmra.mrb[4].mxu1 %v779_v42  ;;  %727 = vmatprep.mubr.msk.bf16.mxu0 %vm379_vm0, %v782_v43 }
  0x3e   :  { %724 = vmatpush3.bf16.msra.mxu0 %v780_v41 }
  0x3f   :  { %725 = vmatprep.subr.bf16.mxu0 %v781_v44 }
  0x42   :  { %726 = vmatpush3.bf16.msra.mxu0 %v781_v44 }
  0x45   :  { %728 = vmatmul.mubr.msk.bf16.vlgmr.msra.gmra.mrb[8].mxu0 %vm379_vm0, %v783_v45 }
 0x107   :  { %v673_v46 = vpop.f32.mrb[0].mxu0 }
 0x108   :  { %v701_v47 = vpop.f32.mrb[0].mxu1  ;;  %v674_v48 = vpop.f32.mrb[1].mxu0 }
 0x109   :  { %v675_v49 = vadd.f32 %v674_v48, %v673_v46  ;;  %v702_v50 = vpop.f32.mrb[1].mxu1  ;;  %v676_v51 = vpop.f32.mrb[2].mxu0 }
 0x10a   :  { %v703_v52 = vadd.f32 %v702_v50, %v701_v47  ;;  %v704_v53 = vpop.f32.mrb[2].mxu1  ;;  %v677_v54 = vpop.f32.mrb[3].mxu0 }
 0x10b   :  { %v678_v55 = vadd.f32 %v677_v54, %v676_v51  ;;  %v705_v56 = vpop.f32.mrb[3].mxu1 }
 0x10c   :  { %v706_v57 = vadd.f32 %v705_v56, %v704_v53  ;;  %v470_v58 = vadd.f32 %v703_v52, %v675_v49 }
 0x10e   :  { %v473_v59 = vadd.f32 %v706_v57, %v678_v55 }
 0x10f   :  { %v679_v60 = vpop.f32.mrb[4].mxu0 }
 0x110   :  { %v707_v61 = vpop.f32.mrb[4].mxu1  ;;  %v680_v62 = vpop.f32.mrb[5].mxu0 }
 0x111   :  { %v681_v63 = vadd.f32 %v680_v62, %v679_v60  ;;  %v708_v0 = vpop.f32.mrb[5].mxu1  ;;  %v682_v1 = vpop.f32.mrb[6].mxu0 }
 0x112   :  { %v709_v2 = vadd.f32 %v708_v0, %v707_v61  ;;  %v710_v3 = vpop.f32.mrb[6].mxu1  ;;  %v683_v4 = vpop.f32.mrb[7].mxu0 }
 0x113   :  { %v684_v5 = vadd.f32 %v683_v4, %v682_v1  ;;  %v711_v6 = vpop.f32.mrb[7].mxu1 }
 0x114   :  { %v712_v7 = vadd.f32 %v711_v6, %v710_v3  ;;  %v478_v8 = vadd.f32 %v709_v2, %v681_v63 }
 0x116   :  { %v481_v9 = vadd.f32 %v712_v7, %v684_v5 }
 0x118   :  { %v729_v10 = vpop.f32.mrb[8].mxu0 }
 0x119   :  { %v527_v11 = vadd.f32 %v729_v10, %v478_v8  ;;  %v518_v12 = vpop.f32.mrb[9].mxu0 }
 0x11a   :  { %v519_v13 = vadd.f32 %v518_v12, %v470_v58  ;;  %v730_v14 = vpop.f32.mrb[10].mxu0 }
 0x11b   :  { %v530_v15 = vadd.f32 %v730_v14, %v481_v9  ;;  %v521_v16 = vpop.f32.mrb[11].mxu0  ;;  %v565_v23 = vmul.f32 %v527_v11, %v527_v11 }
 0x11c   :  { %v522_v17 = vadd.f32 %v521_v16, %v473_v59  ;;  %v563_v19 = vmul.f32 %v519_v13, %v519_v13 }
 0x11d   :  { %v654_v18 = vpack.c.bf16 %v530_v15, %v527_v11  ;;  %v566_v26 = vmul.f32 %v530_v15, %v530_v15 }
 0x11e   :  { %v649_v20 = vpack.c.bf16 %v522_v17, %v519_v13  ;;  %v553_v21 = vadd.f32 %v522_v17, %v519_v13  ;;  %v564_v22 = vmul.f32 %v522_v17, %v522_v17 }
 0x11f   :  { %656 = vst [vmem:[%s892_s2 + $0x8] sm:$0xff] %v654_v18  }
 0x120   :  { %650 = vst [vmem:[%s892_s2] sm:$0xff] %v649_v20   ;;  %v554_v24 = vadd.f32 %v553_v21, %v527_v11  ;;  %v567_v25 = vadd.f32 %v564_v22, %v563_v19 }
 0x122   :  { %v555_v27 = vadd.f32 %v554_v24, %v530_v15  ;;  %v568_v28 = vadd.f32 %v567_v25, %v565_v23 }
 0x124   :  { %v556_v29 = vrot.slane %v555_v27, 4  ;;  %v569_v30 = vadd.f32 %v568_v28, %v566_v26 }
 0x126   :  { %v557_v31 = vadd.f32 %v556_v29, %v555_v27  ;;  %v570_v32 = vrot.slane %v569_v30, 4 }
 0x128   :  { %v558_v33 = vrot.slane %v557_v31, 2  ;;  %v571_v34 = vadd.f32 %v570_v32, %v569_v30 }
 0x12a   :  { %v559_v35 = vadd.f32 %v558_v33, %v557_v31  ;;  %v572_v36 = vrot.slane %v571_v34, 2 }
 0x12c   :  { %v560_v37 = vrot.slane %v559_v35, 1  ;;  %v573_v38 = vadd.f32 %v572_v36, %v571_v34 }
 0x12e   :  { %v561_v39 = vadd.f32 %v560_v37, %v559_v35  ;;  %v574_v40 = vrot.slane %v573_v38, 1 }
 0x130   :  { %562 = vst [vmem:[%s893_s3] sm:$0x1] %v561_v39  ;;  %v575_v41 = vadd.f32 %v574_v40, %v573_v38 }
 0x132   :  { %576 = vst [vmem:[%s894_s4] sm:$0x1] %v575_v41 }
 0x133   :  { %589 = vsyncpa [#allocation3], 1 }

// kernel: generator_forward.7
= control target key start
LH: loop header
LB: loop body
LE: loop exit
PB: predicated region body
PF: predicated region fallthrough
CT: control target
= control target key end

     0   :  { %vm311_vm0 = vcmask 261120   ;;  %vm594_vm1 = vcmask 519168   ;;  %vm611_vm2 = vcmask 523264   ;;  %vm649_vm3 = vcmask 516096   ;;  %s1232_s1 = inlined_call_operand.vmem [shape: bf16[288,64], index: 1, kind: input, shape index: {}]   ;;  %s1233_s0 = inlined_call_operand.vmem [shape: bf16[128,288], index: 0, kind: input, shape index: {}]   ;;  %s1234_s2 = inlined_call_operand.vmem [shape: bf16[128,64], index: 2, kind: output, shape index: {0}]   ;;  %s1235_s3 = inlined_call_operand.vmem [shape: f32[1,1,64], index: 3, kind: output, shape index: {1}]   ;;  %s1236_s4 = inlined_call_operand.vmem [shape: f32[1,1,64], index: 4, kind: output, shape index: {2}]  }
   0x1   :  { %v909_v0 = vld [vmem:[%s1232_s1 + $0x40] sm:$0xff]   ;;  %v911_v2 = vld [vmem:[%s1232_s1 + $0x48] sm:$0xff]   ;;  %v913_v4 = vld [vmem:[%s1232_s1 + $0x50] sm:$0xff]  }
   0x2   :  { %v910_v1 = vld [vmem:[%s1232_s1] sm:$0xff]   ;;  %799 = vmatprep.subr.bf16.mxu0 %v909_v0  ;;  %893 = vmatprep.subr.bf16.mxu1 %v909_v0  ;;  %v912_v3 = vld [vmem:[%s1232_s1 + $0x8] sm:$0xff]   ;;  %v914_v5 = vld [vmem:[%s1232_s1 + $0x10] sm:$0xff]  }
   0x3   :  { %800 = vmatpush3.bf16.msra.mxu0 %v910_v1  ;;  %901 = vmatpush3.bf16.msra.mxu1 %v910_v1  ;;  %v915_v6 = vld [vmem:[%s1232_s1 + $0x58] sm:$0xff]   ;;  %v917_v8 = vld [vmem:[%s1232_s1 + $0x60] sm:$0xff]   ;;  %v919_v10 = vld [vmem:[%s1232_s1 + $0x68] sm:$0xff]  }
   0x4   :  { %801 = vmatprep.subr.bf16.mxu0 %v911_v2  ;;  %894 = vmatprep.subr.bf16.mxu1 %v911_v2  ;;  %v916_v7 = vld [vmem:[%s1232_s1 + $0x18] sm:$0xff]   ;;  %v918_v9 = vld [vmem:[%s1232_s1 + $0x20] sm:$0xff]   ;;  %v920_v13 = vld [vmem:[%s1232_s1 + $0x28] sm:$0xff]  }
   0x5   :  { %v927_v11 = vld [vmem:[%s1233_s0 + $0x4] ss:$12 sps:$4 sm:$0xff]   ;;  %v930_v12 = vld [vmem:[%s1233_s0 + $0x94] ss:$12 sps:$4 sm:$0xff]   ;;  %v923_v16 = vld [vmem:[%s1232_s1 + $0x78] sm:$0xff]  }
   0x6   :  { %v921_v14 = vld [vmem:[%s1232_s1 + $0x70] sm:$0xff]   ;;  %368 = vmatprep.mubr.bf16.mxu0 %v927_v11  ;;  %416 = vmatprep.mubr.bf16.mxu1 %v930_v12  ;;  %v924_v17 = vld [vmem:[%s1232_s1 + $0x38] sm:$0xff]   ;;  %v925_v18 = vld [vmem:[%s1233_s0] ss:$12 sps:$4 sm:$0xff]  }
   0x7   :  { %802 = vmatpush3.bf16.msra.mxu0 %v912_v3  ;;  %902 = vmatpush3.bf16.msra.mxu1 %v912_v3  ;;  %v922_v15 = vld [vmem:[%s1232_s1 + $0x30] sm:$0xff]   ;;  %v931_v19 = vld [vmem:[%s1232_s1 + $0x80] sm:$0xff]   ;;  %v932_v21 = vld [vmem:[%s1233_s0 + $0x1c] ss:$12 sps:$4 sm:$0xff]  }
   0x8   :  { %803 = vmatprep.subr.bf16.mxu0 %v913_v4  ;;  %895 = vmatprep.subr.bf16.mxu1 %v913_v4  ;;  %v928_v20 = vld [vmem:[%s1233_s0 + $0x90] ss:$12 sps:$4 sm:$0xff]   ;;  %v934_v22 = vld [vmem:[%s1233_s0 + $0xac] ss:$12 sps:$4 sm:$0xff]   ;;  %v937_v25 = vld [vmem:[%s1233_s0 + $0xa8] ss:$12 sps:$4 sm:$0xff]  }
   0x9   :  { %v938_v23 = vld [vmem:[%s1232_s1 + $0x88] sm:$0xff]   ;;  %v936_v24 = vld [vmem:[%s1233_s0 + $0x18] ss:$12 sps:$4 sm:$0xff]   ;;  %v939_v26 = vld [vmem:[%s1233_s0 + $0x34] ss:$12 sps:$4 sm:$0xff]  }
   0xa   :  { %v941_v27 = vld [vmem:[%s1233_s0 + $0x8] ss:$12 sps:$4 sm:$0xff]   ;;  %v942_v28 = vld [vmem:[%s1233_s0 + $0x30] ss:$12 sps:$4 sm:$0xff]   ;;  %v943_v29 = vld [vmem:[%s1233_s0 + $0x20] ss:$12 sps:$4 sm:$0xff]  }
   0xb   :  { %804 = vmatpush3.bf16.msra.mxu0 %v914_v5  ;;  %903 = vmatpush3.bf16.msra.mxu1 %v914_v5  ;;  %v944_v30 = vld [vmem:[%s1233_s0 + $0x4c] ss:$12 sps:$4 sm:$0xff]   ;;  %v947_v32 = vld [vmem:[%s1233_s0 + $0x48] ss:$12 sps:$4 sm:$0xff]   ;;  %v948_v33 = vld [vmem:[%s1233_s0 + $0x50] ss:$12 sps:$4 sm:$0xff]  }
   0xc   :  { %805 = vmatprep.subr.bf16.mxu0 %v915_v6  ;;  %896 = vmatprep.subr.bf16.mxu1 %v915_v6  ;;  %v946_v31 = vld [vmem:[%s1233_s0 + $0x38] ss:$12 sps:$4 sm:$0xff]   ;;  %v951_v35 = vld [vmem:[%s1233_s0 + $0x68] ss:$12 sps:$4 sm:$0xff]   ;;  %v952_v36 = vld [vmem:[%s1233_s0 + $0x60] ss:$12 sps:$4 sm:$0xff]  }
   0xd   :  { %v949_v34 = vld [vmem:[%s1233_s0 + $0x64] ss:$12 sps:$4 sm:$0xff]   ;;  %v953_v37 = vld [vmem:[%s1233_s0 + $0x80] ss:$12 sps:$4 sm:$0xff]   ;;  %v954_v38 = vld [vmem:[%s1233_s0 + $0x7c] ss:$12 sps:$4 sm:$0xff]  }
   0xe   :  { %v956_v39 = vld [vmem:[%s1233_s0 + $0x98] ss:$12 sps:$4 sm:$0xff]   ;;  %v958_v41 = vld [vmem:[%s1233_s0 + $0xb0] ss:$12 sps:$4 sm:$0xff]  }
   0xf   :  { %806 = vmatpush3.bf16.msra.mxu0 %v916_v7  ;;  %904 = vmatpush3.bf16.msra.mxu1 %v916_v7  ;;  %v957_v40 = vld [vmem:[%s1233_s0 + $0x78] ss:$12 sps:$4 sm:$0xff]  }
  0x10   :  { %807 = vmatprep.subr.bf16.mxu0 %v917_v8  ;;  %897 = vmatprep.subr.bf16.mxu1 %v917_v8 }
  0x13   :  { %808 = vmatpush3.bf16.msra.mxu0 %v918_v9  ;;  %905 = vmatpush3.bf16.msra.mxu1 %v918_v9 }
  0x14   :  { %809 = vmatprep.subr.bf16.mxu0 %v919_v10  ;;  %898 = vmatprep.subr.bf16.mxu1 %v919_v10 }
  0x17   :  { %810 = vmatpush3.bf16.msra.mxu0 %v920_v13  ;;  %906 = vmatpush3.bf16.msra.mxu1 %v920_v13 }
  0x18   :  { %811 = vmatprep.subr.bf16.mxu0 %v921_v14  ;;  %899 = vmatprep.subr.bf16.mxu1 %v921_v14 }
  0x1b   :  { %812 = vmatpush3.bf16.msra.mxu0 %v922_v15  ;;  %907 = vmatpush3.bf16.msra.mxu1 %v922_v15 }
  0x1c   :  { %813 = vmatprep.subr.bf16.mxu0 %v923_v16  ;;  %900 = vmatprep.subr.bf16.mxu1 %v923_v16 }
  0x1f   :  { %814 = vmatpush3.bf16.msra.mxu0 %v924_v17  ;;  %908 = vmatpush3.bf16.msra.mxu1 %v924_v17 }
  0x20   :  { %873 = vmatprep.subr.bf16.mxu1 %v931_v19 }
  0x22   :  { %369 = vmatmul.mubr.bf16.vlgmr.msra.gmra.mrb[0].mxu0 %v925_v18  ;;  %417 = vmatmul.mubr.bf16.vlgmr.msra.gmra.mrb[0].mxu1 %v928_v20 }
  0x23   :  { %874 = vmatpush3.bf16.msra.mxu1 %v931_v19  ;;  %376 = vmatprep.mubr.bf16.mxu0 %v932_v21 }
  0x24   :  { %424 = vmatprep.mubr.bf16.mxu1 %v934_v22  ;;  %875 = vmatprep.subr.bf16.mxu1 %v938_v23 }
  0x27   :  { %876 = vmatpush3.bf16.msra.mxu1 %v938_v23 }
  0x2a   :  { %377 = vmatmul.mubr.bf16.gmra.mrb[4].mxu0 %v936_v24  ;;  %425 = vmatmul.mubr.bf16.gmra.mrb[4].mxu1 %v937_v25 }
  0x2b   :  { %384 = vmatprep.mubr.bf16.mxu0 %v939_v26  ;;  %877 = vmatprep.mubr.msk.bf16.mxu1 %vm311_vm0, %v941_v27 }
  0x32   :  { %385 = vmatmul.mubr.bf16.gmra.mrb[8].mxu0 %v942_v28  ;;  %878 = vmatmul.mubr.msk.bf16.vlgmr.msra.gmra.mrb[8].mxu1 %vm311_vm0, %v943_v29 }
  0x33   :  { %392 = vmatprep.mubr.bf16.mxu0 %v944_v30  ;;  %881 = vmatprep.mubr.msk.bf16.mxu1 %vm311_vm0, %v946_v31 }
  0x3a   :  { %393 = vmatmul.mubr.bf16.gmra.mrb[12].mxu0 %v947_v32  ;;  %882 = vmatmul.mubr.msk.bf16.gmra.mrb[12].mxu1 %vm311_vm0, %v948_v33 }
  0x3b   :  { %400 = vmatprep.mubr.bf16.mxu0 %v949_v34  ;;  %885 = vmatprep.mubr.msk.bf16.mxu1 %vm311_vm0, %v951_v35 }
  0x42   :  { %401 = vmatmul.mubr.bf16.gmra.mrb[16].mxu0 %v952_v36  ;;  %886 = vmatmul.mubr.msk.bf16.gmra.mrb[16].mxu1 %vm311_vm0, %v953_v37 }
  0x43   :  { %408 = vmatprep.mubr.bf16.mxu0 %v954_v38  ;;  %889 = vmatprep.mubr.msk.bf16.mxu1 %vm311_vm0, %v956_v39 }
  0x4a   :  { %409 = vmatmul.mubr.bf16.gmra.mrb[20].mxu0 %v957_v40  ;;  %890 = vmatmul.mubr.msk.bf16.gmra.mrb[20].mxu1 %vm311_vm0, %v958_v41 }
  0xf5   :  { %v815_v42 = vpop.f32.mrb[0].mxu0  ;;  %v851_v43 = vpop.f32.mrb[0].mxu1 }
  0xf6   :  { %v816_v44 = vpop.f32.mrb[1].mxu0  ;;  %v852_v45 = vpop.f32.mrb[1].mxu1 }
  0xf7   :  { %v817_v46 = vadd.f32 %v816_v44, %v815_v42  ;;  %v818_v47 = vpop.f32.mrb[2].mxu0  ;;  %v1118_v48 = vadd.f32 %v852_v45, %v851_v43  ;;  %v854_v49 = vpop.f32.mrb[2].mxu1 }
  0xf8   :  { %v819_v50 = vpop.f32.mrb[3].mxu0  ;;  %v855_v51 = vpop.f32.mrb[3].mxu1 }
  0xf9   :  { %v820_v52 = vadd.f32 %v819_v50, %v818_v47  ;;  %v1120_v53 = vadd.f32 %v855_v51, %v854_v49 }
  0xfd   :  { %v821_v54 = vpop.f32.mrb[4].mxu0  ;;  %v857_v55 = vpop.f32.mrb[4].mxu1 }
  0xfe   :  { %v822_v56 = vpop.f32.mrb[5].mxu0  ;;  %v858_v57 = vpop.f32.mrb[5].mxu1 }
  0xff   :  { %v823_v58 = vadd.f32 %v822_v56, %v821_v54  ;;  %v824_v59 = vpop.f32.mrb[6].mxu0  ;;  %v1122_v60 = vadd.f32 %v858_v57, %v857_v55  ;;  %v860_v61 = vpop.f32.mrb[6].mxu1 }
 0x100   :  { %v825_v62 = vpop.f32.mrb[7].mxu0  ;;  %v861_v63 = vpop.f32.mrb[7].mxu1 }
 0x101   :  { %v826_v0 = vadd.f32 %v825_v62, %v824_v59  ;;  %v1124_v1 = vadd.f32 %v861_v63, %v860_v61 }
 0x105   :  { %v827_v2 = vpop.f32.mrb[8].mxu0  ;;  %v879_v3 = vpop.f32.mrb[8].mxu1 }
 0x106   :  { %v476_v4 = vadd.f32 %v879_v3, %v823_v58  ;;  %v828_v5 = vpop.f32.mrb[9].mxu0  ;;  %v467_v6 = vpop.f32.mrb[9].mxu1 }
 0x107   :  { %v829_v7 = vadd.f32 %v828_v5, %v827_v2  ;;  %v468_v8 = vadd.f32 %v817_v46, %v467_v6  ;;  %v830_v9 = vpop.f32.mrb[10].mxu0  ;;  %v880_v10 = vpop.f32.mrb[10].mxu1 }
 0x108   :  { %v785_v11 = vpack.c.bf16 %v476_v4, %v476_v4  ;;  %v479_v12 = vadd.f32 %v880_v10, %v826_v0  ;;  %v831_v13 = vpop.f32.mrb[11].mxu0  ;;  %v470_v14 = vpop.f32.mrb[11].mxu1  ;;  %v653_v20 = vmul.f32 %v476_v4, %v476_v4  ;;  %v615_v27 = vsel %vm611_vm2, %v476_v4, 0.0 }
 0x109   :  { %v783_v15 = vpack.c.bf16 %v468_v8, %v468_v8  ;;  %v832_v16 = vadd.f32 %v831_v13, %v830_v9  ;;  %v651_v18 = vmul.f32 %v468_v8, %v468_v8  ;;  %v471_v19 = vadd.f32 %v820_v52, %v470_v14 }
 0x10a   :  { %597 = vst.msk [vmem:[%s1234_s2 + $0x8] sm:$0xf] %vm594_vm1, %v785_v11  ;;  %v786_v17 = vpack.c.bf16 %v479_v12, %v479_v12  ;;  %v612_v21 = vsel %vm611_vm2, %v468_v8, 0.0  ;;  %v654_v28 = vmul.f32 %v479_v12, %v479_v12  ;;  %v670_v38 = vsel %vm611_vm2, %v653_v20, 0.0 }
 0x10b   :  { %595 = vst.msk [vmem:[%s1234_s2] sm:$0xf] %vm594_vm1, %v783_v15  ;;  %v784_v22 = vpack.c.bf16 %v471_v19, %v471_v19  ;;  %v613_v23 = vsel %vm611_vm2, %v471_v19, 0.0  ;;  %v652_v24 = vmul.f32 %v471_v19, %v471_v19  ;;  %v667_v32 = vsel %vm611_vm2, %v651_v18, 0.0 }
 0x10c   :  { %598 = vst.msk [vmem:[%s1234_s2 + $0xc] sm:$0xf] %vm594_vm1, %v786_v17  ;;  %v614_v29 = vadd.f32 %v613_v23, %v612_v21  ;;  %v617_v39 = vsel %vm611_vm2, %v479_v12, 0.0  ;;  %v672_v54 = vsel %vm611_vm2, %v654_v28, 0.0 }
 0x10d   :  { %v833_v25 = vpop.f32.mrb[12].mxu0  ;;  %v883_v26 = vpop.f32.mrb[12].mxu1  ;;  %596 = vst.msk [vmem:[%s1234_s2 + $0x4] sm:$0xf] %vm594_vm1, %v784_v22  ;;  %v668_v33 = vsel %vm611_vm2, %v652_v24, 0.0 }
 0x10e   :  { %v834_v30 = vpop.f32.mrb[13].mxu0  ;;  %v483_v31 = vpop.f32.mrb[13].mxu1  ;;  %v616_v40 = vadd.f32 %v615_v27, %v614_v29  ;;  %v669_v41 = vadd.f32 %v668_v33, %v667_v32 }
 0x10f   :  { %v835_v34 = vadd.f32 %v834_v30, %v833_v25  ;;  %v484_v35 = vadd.f32 %v829_v7, %v483_v31  ;;  %v836_v36 = vpop.f32.mrb[14].mxu0  ;;  %v884_v37 = vpop.f32.mrb[14].mxu1 }
 0x110   :  { %v837_v42 = vpop.f32.mrb[15].mxu0  ;;  %v486_v43 = vpop.f32.mrb[15].mxu1  ;;  %v671_v49 = vadd.f32 %v670_v38, %v669_v41  ;;  %v618_v50 = vadd.f32 %v617_v39, %v616_v40 }
 0x111   :  { %v492_v44 = vadd.f32 %v883_v26, %v835_v34  ;;  %v787_v45 = vpack.c.bf16 %v484_v35, %v484_v35  ;;  %v619_v46 = vsel %vm611_vm2, %v484_v35, 0.0  ;;  %v655_v47 = vmul.f32 %v484_v35, %v484_v35 }
 0x112   :  { %v838_v51 = vadd.f32 %v837_v42, %v836_v36  ;;  %v487_v52 = vadd.f32 %v832_v16, %v486_v43  ;;  %v620_v57 = vadd.f32 %v619_v46, %v618_v50  ;;  %v673_v58 = vadd.f32 %v672_v54, %v671_v49 }
 0x113   :  { %v789_v55 = vpack.c.bf16 %v492_v44, %v492_v44  ;;  %599 = vst.msk [vmem:[%s1234_s2 + $0x10] sm:$0xf] %vm594_vm1, %v787_v45  ;;  %v674_v56 = vsel %vm611_vm2, %v655_v47, 0.0  ;;  %v657_v62 = vmul.f32 %v492_v44, %v492_v44  ;;  %v623_v14 = vsel %vm611_vm2, %v492_v44, 0.0 }
 0x114   :  { %v495_v59 = vadd.f32 %v884_v37, %v838_v51  ;;  %v788_v61 = vpack.c.bf16 %v487_v52, %v487_v52  ;;  %v621_v63 = vsel %vm611_vm2, %v487_v52, 0.0  ;;  %v656_v0 = vmul.f32 %v487_v52, %v487_v52 }
 0x115   :  { %601 = vst.msk [vmem:[%s1234_s2 + $0x18] sm:$0xf] %vm594_vm1, %v789_v55  ;;  %v839_v2 = vpop.f32.mrb[16].mxu0  ;;  %v887_v3 = vpop.f32.mrb[16].mxu1  ;;  %v675_v4 = vadd.f32 %v674_v56, %v673_v58  ;;  %v622_v9 = vadd.f32 %v621_v63, %v620_v57  ;;  %v678_v18 = vsel %vm611_vm2, %v657_v62, 0.0 }
 0x116   :  { %v790_v5 = vpack.c.bf16 %v495_v59, %v495_v59  ;;  %v658_v6 = vmul.f32 %v495_v59, %v495_v59  ;;  %600 = vst.msk [vmem:[%s1234_s2 + $0x14] sm:$0xf] %vm594_vm1, %v788_v61  ;;  %v840_v7 = vpop.f32.mrb[17].mxu0  ;;  %v499_v8 = vpop.f32.mrb[17].mxu1  ;;  %v676_v10 = vsel %vm611_vm2, %v656_v0, 0.0  ;;  %v625_v22 = vsel %vm611_vm2, %v495_v59, 0.0 }
 0x117   :  { %v841_v11 = vadd.f32 %v840_v7, %v839_v2  ;;  %v842_v12 = vpop.f32.mrb[18].mxu0  ;;  %v888_v13 = vpop.f32.mrb[18].mxu1  ;;  %v677_v15 = vadd.f32 %v676_v10, %v675_v4  ;;  %v624_v19 = vadd.f32 %v623_v14, %v622_v9 }
 0x118   :  { %602 = vst.msk [vmem:[%s1234_s2 + $0x1c] sm:$0xf] %vm594_vm1, %v790_v5  ;;  %v843_v16 = vpop.f32.mrb[19].mxu0  ;;  %v502_v17 = vpop.f32.mrb[19].mxu1  ;;  %v680_v23 = vsel %vm611_vm2, %v658_v6, 0.0 }
 0x119   :  { %v844_v20 = vadd.f32 %v843_v16, %v842_v12  ;;  %v500_v21 = vadd.f32 %v841_v11, %v499_v8  ;;  %v679_v24 = vadd.f32 %v678_v18, %v677_v15  ;;  %v626_v26 = vadd.f32 %v625_v22, %v624_v19 }
 0x11b   :  { %v791_v25 = vpack.c.bf16 %v500_v21, %v500_v21  ;;  %v627_v27 = vsel %vm611_vm2, %v500_v21, 0.0  ;;  %v659_v28 = vmul.f32 %v500_v21, %v500_v21  ;;  %v681_v29 = vadd.f32 %v680_v23, %v679_v24 }
 0x11c   :  { %v503_v30 = vadd.f32 %v844_v20, %v502_v17  ;;  %v628_v31 = vadd.f32 %v627_v27, %v626_v26 }
 0x11d   :  { %603 = vst.msk [vmem:[%s1234_s2 + $0x20] sm:$0xf] %vm594_vm1, %v791_v25  ;;  %v682_v32 = vsel %vm611_vm2, %v659_v28, 0.0  ;;  %v845_v33 = vpop.f32.mrb[20].mxu0  ;;  %v891_v34 = vpop.f32.mrb[20].mxu1 }
 0x11e   :  { %v683_v35 = vadd.f32 %v682_v32, %v681_v29  ;;  %v792_v36 = vpack.c.bf16 %v503_v30, %v503_v30  ;;  %v629_v37 = vsel %vm611_vm2, %v503_v30, 0.0  ;;  %v660_v38 = vmul.f32 %v503_v30, %v503_v30  ;;  %v846_v39 = vpop.f32.mrb[21].mxu0  ;;  %v515_v40 = vpop.f32.mrb[21].mxu1 }
 0x11f   :  { %v630_v41 = vadd.f32 %v629_v37, %v628_v31  ;;  %v524_v42 = vadd.f32 %v891_v34, %v1122_v60  ;;  %v847_v43 = vadd.f32 %v846_v39, %v845_v33  ;;  %v516_v44 = vadd.f32 %v1118_v48, %v515_v40  ;;  %v848_v45 = vpop.f32.mrb[22].mxu0  ;;  %v892_v46 = vpop.f32.mrb[22].mxu1 }
 0x120   :  { %604 = vst.msk [vmem:[%s1234_s2 + $0x24] sm:$0xf] %vm594_vm1, %v792_v36  ;;  %v684_v47 = vsel %vm611_vm2, %v660_v38, 0.0  ;;  %v527_v49 = vadd.f32 %v892_v46, %v1124_v1  ;;  %v849_v50 = vpop.f32.mrb[23].mxu0  ;;  %v518_v51 = vpop.f32.mrb[23].mxu1 }
 0x121   :  { %v685_v52 = vadd.f32 %v684_v47, %v683_v35  ;;  %v797_v54 = vpack.c.bf16 %v524_v42, %v524_v42  ;;  %v508_v55 = vadd.f32 %v887_v3, %v847_v43  ;;  %v795_v60 = vpack.c.bf16 %v516_v44, %v516_v44 }
 0x122   :  { %v798_v48 = vpack.c.bf16 %v527_v49, %v527_v49  ;;  %v850_v59 = vadd.f32 %v849_v50, %v848_v45  ;;  %v519_v61 = vadd.f32 %v1120_v53, %v518_v51  ;;  %v663_v3 = vmul.f32 %v516_v44, %v516_v44 }
 0x123   :  { %609 = vst.msk [vmem:[%s1234_s2 + $0x38] sm:$0xf] %vm594_vm1, %v797_v54  ;;  %v793_v56 = vpack.c.bf16 %v508_v55, %v508_v55  ;;  %v631_v57 = vsel %vm611_vm2, %v508_v55, 0.0  ;;  %v661_v58 = vmul.f32 %v508_v55, %v508_v55  ;;  %607 = vst.msk [vmem:[%s1234_s2 + $0x30] sm:$0xf] %vm594_vm1, %v795_v60  ;;  %v635_v7 = vsel %vm611_vm2, %v516_v44, 0.0 }
 0x124   :  { %v632_v1 = vadd.f32 %v631_v57, %v630_v41  ;;  %610 = vst.msk [vmem:[%s1234_s2 + $0x3c] sm:$0xf] %vm594_vm1, %v798_v48  ;;  %v511_v0 = vadd.f32 %v888_v13, %v850_v59  ;;  %v796_v2 = vpack.c.bf16 %v519_v61, %v519_v61  ;;  %v664_v9 = vmul.f32 %v519_v61, %v519_v61 }
 0x125   :  { %605 = vst.msk [vmem:[%s1234_s2 + $0x28] sm:$0xf] %vm594_vm1, %v793_v56  ;;  %v686_v62 = vsel %vm611_vm2, %v661_v58, 0.0  ;;  %v665_v12 = vmul.f32 %v524_v42, %v524_v42  ;;  %v690_v13 = vsel %vm611_vm2, %v663_v3, 0.0  ;;  %v637_v14 = vsel %vm611_vm2, %v519_v61, 0.0 }
 0x126   :  { %v687_v63 = vadd.f32 %v686_v62, %v685_v52  ;;  %v794_v4 = vpack.c.bf16 %v511_v0, %v511_v0  ;;  %v633_v5 = vsel %vm611_vm2, %v511_v0, 0.0  ;;  %v662_v6 = vmul.f32 %v511_v0, %v511_v0  ;;  %608 = vst.msk [vmem:[%s1234_s2 + $0x34] sm:$0xf] %vm594_vm1, %v796_v2 }
 0x127   :  { %v634_v53 = vadd.f32 %v633_v5, %v632_v1  ;;  %v639_v17 = vsel %vm611_vm2, %v524_v42, 0.0  ;;  %v666_v18 = vmul.f32 %v527_v49, %v527_v49  ;;  %v692_v19 = vsel %vm611_vm2, %v664_v9, 0.0 }
 0x128   :  { %606 = vst.msk [vmem:[%s1234_s2 + $0x2c] sm:$0xf] %vm594_vm1, %v794_v4  ;;  %v688_v8 = vsel %vm611_vm2, %v662_v6, 0.0  ;;  %v694_v22 = vsel %vm611_vm2, %v665_v12, 0.0  ;;  %v641_v23 = vsel %vm611_vm2, %v527_v49, 0.0 }
 0x129   :  { %v689_v10 = vadd.f32 %v688_v8, %v687_v63  ;;  %v636_v11 = vadd.f32 %v635_v7, %v634_v53  ;;  %v696_v26 = vsel %vm611_vm2, %v666_v18, 0.0 }
 0x12b   :  { %v638_v15 = vadd.f32 %v637_v14, %v636_v11  ;;  %v691_v16 = vadd.f32 %v690_v13, %v689_v10 }
 0x12d   :  { %v640_v20 = vadd.f32 %v639_v17, %v638_v15  ;;  %v693_v21 = vadd.f32 %v692_v19, %v691_v16 }
 0x12f   :  { %v642_v24 = vadd.f32 %v641_v23, %v640_v20  ;;  %v695_v25 = vadd.f32 %v694_v22, %v693_v21 }
 0x131   :  { %v643_v27 = vrot.slane %v642_v24, 4  ;;  %v697_v28 = vadd.f32 %v696_v26, %v695_v25 }
 0x133   :  { %v644_v29 = vadd.f32 %v643_v27, %v642_v24  ;;  %v698_v30 = vrot.slane %v697_v28, 4 }
 0x135   :  { %v645_v31 = vrot.slane %v644_v29, 2  ;;  %v699_v32 = vadd.f32 %v698_v30, %v697_v28 }
 0x137   :  { %v646_v33 = vadd.f32 %v645_v31, %v644_v29  ;;  %v700_v34 = vrot.slane %v699_v32, 2 }
 0x139   :  { %v647_v35 = vrot.slane %v646_v33, 1  ;;  %v701_v36 = vadd.f32 %v700_v34, %v699_v32 }
 0x13b   :  { %v648_v37 = vadd.f32 %v647_v35, %v646_v33  ;;  %v702_v38 = vrot.slane %v701_v36, 1 }
 0x13d   :  { %650 = vst.msk [vmem:[%s1235_s3] sm:$0x1] %vm649_vm3, %v648_v37  ;;  %v703_v39 = vadd.f32 %v702_v38, %v701_v36 }
 0x13f   :  { %704 = vst.msk [vmem:[%s1236_s4] sm:$0x1] %vm649_vm3, %v703_v39 }

// kernel: generator_forward.8
= control target key start
LH: loop header
LB: loop body
LE: loop exit
PB: predicated region body
PF: predicated region fallthrough
CT: control target
= control target key end

     0   :  { %v1849_v0 = vmov 0   ;;  %vm439_vm0 = vcmask 130048   ;;  %vm1081_vm1 = vcmask 257024   ;;  %vm1146_vm2 = vcmask 261120   ;;  %s2740_s1 = inlined_call_operand.vmem [shape: bf16[144,32], index: 1, kind: input, shape index: {}]   ;;  %s2741_s0 = inlined_call_operand.vmem [shape: bf16[512,144], index: 0, kind: input, shape index: {}]   ;;  %s2742_s2 = inlined_call_operand.vmem [shape: bf16[512,32], index: 2, kind: output, shape index: {0}]   ;;  %s2743_s3 = inlined_call_operand.vmem [shape: f32[1,1,32], index: 3, kind: output, shape index: {1}]   ;;  %s2744_s4 = inlined_call_operand.vmem [shape: f32[1,1,32], index: 4, kind: output, shape index: {2}]  }
   0x1   :  { %536 = vmatprep.subr.bf16.mxu0 %v1849_v0  ;;  %v1744_v1 = vld [vmem:[%s2740_s1] sm:$0xff]   ;;  %1725 = vmatprep.subr.bf16.mxu1 %v1849_v0  ;;  %v1745_v2 = vld [vmem:[%s2740_s1 + $0x8] sm:$0xff]   ;;  %v1746_v3 = vld [vmem:[%s2740_s1 + $0x10] sm:$0xff]   ;;  %vm1280_vm3 = vcmask 253952  }
   0x2   :  { %537 = vmatpush1.bf16.msra.mxu0 %v1744_v1  ;;  %1734 = vmatpush1.bf16.msra.mxu1 %v1744_v1  ;;  %v1747_v4 = vld [vmem:[%s2740_s1 + $0x18] sm:$0xff]   ;;  %v1755_v5 = vld [vmem:[%s2741_s0 + $0x4] ss:$8 sps:$4 sm:$0xff]   ;;  %v1750_v9 = vld [vmem:[%s2740_s1 + $0x30] sm:$0xff]  }
   0x3   :  { %538 = vmatprep.subr.bf16.mxu0 %v1849_v0  ;;  %1726 = vmatprep.subr.bf16.mxu1 %v1849_v0  ;;  %v1748_v6 = vld [vmem:[%s2740_s1 + $0x20] sm:$0xff]   ;;  %v1749_v7 = vld [vmem:[%s2740_s1 + $0x28] sm:$0xff]   ;;  %v1751_v10 = vld [vmem:[%s2740_s1 + $0x38] sm:$0xff]  }
   0x4   :  { %1565 = vmatprep.mubr.msk.bf16.mxu0 %vm439_vm0, %v1755_v5  ;;  %v1779_v8 = vld [vmem:[%s2741_s0 + $0x104] ss:$8 sps:$4 sm:$0xff]   ;;  %v1753_v12 = vld [vmem:[%s2741_s0] ss:$8 sps:$4 sm:$0xff]   ;;  %v1756_v13 = vld [vmem:[%s2741_s0 + $0x14] ss:$8 sps:$4 sm:$0xff]  }
   0x5   :  { %1581 = vmatprep.mubr.msk.bf16.mxu1 %vm439_vm0, %v1779_v8  ;;  %v1752_v11 = vld [vmem:[%s2740_s1 + $0x40] sm:$0xff]   ;;  %v1783_v15 = vld [vmem:[%s2741_s0 + $0x114] ss:$8 sps:$4 sm:$0xff]   ;;  %v1758_v16 = vld [vmem:[%s2741_s0 + $0x10] ss:$8 sps:$4 sm:$0xff]  }
   0x6   :  { %539 = vmatpush1.bf16.msra.mxu0 %v1745_v2  ;;  %1735 = vmatpush1.bf16.msra.mxu1 %v1745_v2  ;;  %v1777_v14 = vld [vmem:[%s2741_s0 + $0x100] ss:$8 sps:$4 sm:$0xff]   ;;  %v1759_v17 = vld [vmem:[%s2741_s0 + $0x24] ss:$8 sps:$4 sm:$0xff]   ;;  %v1785_v18 = vld [vmem:[%s2741_s0 + $0x110] ss:$8 sps:$4 sm:$0xff]  }
   0x7   :  { %540 = vmatprep.subr.bf16.mxu0 %v1849_v0  ;;  %1727 = vmatprep.subr.bf16.mxu1 %v1849_v0  ;;  %v1789_v19 = vld [vmem:[%s2741_s0 + $0x124] ss:$8 sps:$4 sm:$0xff]   ;;  %v1761_v20 = vld [vmem:[%s2741_s0 + $0x20] ss:$8 sps:$4 sm:$0xff]   ;;  %v1762_v21 = vld [vmem:[%s2741_s0 + $0x34] ss:$8 sps:$4 sm:$0xff]  }
   0x8   :  { %v1791_v22 = vld [vmem:[%s2741_s0 + $0x120] ss:$8 sps:$4 sm:$0xff]   ;;  %v1795_v23 = vld [vmem:[%s2741_s0 + $0x134] ss:$8 sps:$4 sm:$0xff]   ;;  %v1764_v24 = vld [vmem:[%s2741_s0 + $0x30] ss:$8 sps:$4 sm:$0xff]  }
   0x9   :  { %v1797_v25 = vld [vmem:[%s2741_s0 + $0x130] ss:$8 sps:$4 sm:$0xff]   ;;  %v1765_v26 = vld [vmem:[%s2741_s0 + $0x44] ss:$8 sps:$4 sm:$0xff]   ;;  %v1767_v28 = vld [vmem:[%s2741_s0 + $0x40] ss:$8 sps:$4 sm:$0xff]  }
   0xa   :  { %541 = vmatpush1.bf16.msra.mxu0 %v1746_v3  ;;  %1736 = vmatpush1.bf16.msra.mxu1 %v1746_v3  ;;  %v1801_v27 = vld [vmem:[%s2741_s0 + $0x144] ss:$8 sps:$4 sm:$0xff]   ;;  %v1803_v29 = vld [vmem:[%s2741_s0 + $0x140] ss:$8 sps:$4 sm:$0xff]   ;;  %v1768_v30 = vld [vmem:[%s2741_s0 + $0x54] ss:$8 sps:$4 sm:$0xff]  }
   0xb   :  { %542 = vmatprep.subr.bf16.mxu0 %v1849_v0  ;;  %1728 = vmatprep.subr.bf16.mxu1 %v1849_v0  ;;  %v1807_v31 = vld [vmem:[%s2741_s0 + $0x154] ss:$8 sps:$4 sm:$0xff]   ;;  %v1770_v32 = vld [vmem:[%s2741_s0 + $0x50] ss:$8 sps:$4 sm:$0xff]   ;;  %v1771_v34 = vld [vmem:[%s2741_s0 + $0x64] ss:$8 sps:$4 sm:$0xff]  }
   0xc   :  { %v1809_v33 = vld [vmem:[%s2741_s0 + $0x150] ss:$8 sps:$4 sm:$0xff]   ;;  %v1813_v35 = vld [vmem:[%s2741_s0 + $0x164] ss:$8 sps:$4 sm:$0xff]   ;;  %v1773_v36 = vld [vmem:[%s2741_s0 + $0x60] ss:$8 sps:$4 sm:$0xff]  }
   0xd   :  { %v1815_v37 = vld [vmem:[%s2741_s0 + $0x160] ss:$8 sps:$4 sm:$0xff]   ;;  %v1774_v38 = vld [vmem:[%s2741_s0 + $0x74] ss:$8 sps:$4 sm:$0xff]   ;;  %v1776_v40 = vld [vmem:[%s2741_s0 + $0x70] ss:$8 sps:$4 sm:$0xff]  }
   0xe   :  { %543 = vmatpush1.bf16.msra.mxu0 %v1747_v4  ;;  %1737 = vmatpush1.bf16.msra.mxu1 %v1747_v4  ;;  %v1819_v39 = vld [vmem:[%s2741_s0 + $0x174] ss:$8 sps:$4 sm:$0xff]   ;;  %v1821_v41 = vld [vmem:[%s2741_s0 + $0x170] ss:$8 sps:$4 sm:$0xff]   ;;  %v1780_v42 = vld [vmem:[%s2741_s0 + $0x84] ss:$8 sps:$4 sm:$0xff]  }
   0xf   :  { %544 = vmatprep.subr.bf16.mxu0 %v1849_v0  ;;  %1729 = vmatprep.subr.bf16.mxu1 %v1849_v0  ;;  %v1825_v43 = vld [vmem:[%s2741_s0 + $0x184] ss:$8 sps:$4 sm:$0xff]   ;;  %v1782_v44 = vld [vmem:[%s2741_s0 + $0x80] ss:$8 sps:$4 sm:$0xff]   ;;  %v1786_v46 = vld [vmem:[%s2741_s0 + $0x94] ss:$8 sps:$4 sm:$0xff]  }
  0x10   :  { %v1827_v45 = vld [vmem:[%s2741_s0 + $0x180] ss:$8 sps:$4 sm:$0xff]   ;;  %v1828_v47 = vld [vmem:[%s2741_s0 + $0x194] ss:$8 sps:$4 sm:$0xff]   ;;  %v1788_v48 = vld [vmem:[%s2741_s0 + $0x90] ss:$8 sps:$4 sm:$0xff]  }
  0x11   :  { %v1830_v49 = vld [vmem:[%s2741_s0 + $0x190] ss:$8 sps:$4 sm:$0xff]   ;;  %v1792_v50 = vld [vmem:[%s2741_s0 + $0xa4] ss:$8 sps:$4 sm:$0xff]   ;;  %v1794_v52 = vld [vmem:[%s2741_s0 + $0xa0] ss:$8 sps:$4 sm:$0xff]  }
  0x12   :  { %545 = vmatpush1.bf16.msra.mxu0 %v1748_v6  ;;  %1738 = vmatpush1.bf16.msra.mxu1 %v1748_v6  ;;  %v1831_v51 = vld [vmem:[%s2741_s0 + $0x1a4] ss:$8 sps:$4 sm:$0xff]   ;;  %v1833_v53 = vld [vmem:[%s2741_s0 + $0x1a0] ss:$8 sps:$4 sm:$0xff]   ;;  %v1798_v54 = vld [vmem:[%s2741_s0 + $0xb4] ss:$8 sps:$4 sm:$0xff]  }
  0x13   :  { %546 = vmatprep.subr.bf16.mxu0 %v1849_v0  ;;  %1730 = vmatprep.subr.bf16.mxu1 %v1849_v0  ;;  %v1834_v55 = vld [vmem:[%s2741_s0 + $0x1b4] ss:$8 sps:$4 sm:$0xff]   ;;  %v1800_v56 = vld [vmem:[%s2741_s0 + $0xb0] ss:$8 sps:$4 sm:$0xff]   ;;  %v1804_v58 = vld [vmem:[%s2741_s0 + $0xc4] ss:$8 sps:$4 sm:$0xff]  }
  0x14   :  { %v1836_v57 = vld [vmem:[%s2741_s0 + $0x1b0] ss:$8 sps:$4 sm:$0xff]   ;;  %v1837_v59 = vld [vmem:[%s2741_s0 + $0x1c4] ss:$8 sps:$4 sm:$0xff]   ;;  %v1806_v60 = vld [vmem:[%s2741_s0 + $0xc0] ss:$8 sps:$4 sm:$0xff]  }
  0x15   :  { %v1839_v61 = vld [vmem:[%s2741_s0 + $0x1c0] ss:$8 sps:$4 sm:$0xff]   ;;  %v1810_v62 = vld [vmem:[%s2741_s0 + $0xd4] ss:$8 sps:$4 sm:$0xff]   ;;  %v1842_v1 = vld [vmem:[%s2741_s0 + $0x1d0] ss:$8 sps:$4 sm:$0xff]  }
  0x16   :  { %547 = vmatpush1.bf16.msra.mxu0 %v1749_v7  ;;  %1739 = vmatpush1.bf16.msra.mxu1 %v1749_v7  ;;  %v1840_v63 = vld [vmem:[%s2741_s0 + $0x1d4] ss:$8 sps:$4 sm:$0xff]   ;;  %v1816_v2 = vld [vmem:[%s2741_s0 + $0xe4] ss:$8 sps:$4 sm:$0xff]   ;;  %v1818_v4 = vld [vmem:[%s2741_s0 + $0xe0] ss:$8 sps:$4 sm:$0xff]  }
  0x17   :  { %548 = vmatprep.subr.bf16.mxu0 %v1849_v0  ;;  %1731 = vmatprep.subr.bf16.mxu1 %v1849_v0  ;;  %v1843_v3 = vld [vmem:[%s2741_s0 + $0x1e4] ss:$8 sps:$4 sm:$0xff]   ;;  %v1845_v5 = vld [vmem:[%s2741_s0 + $0x1e0] ss:$8 sps:$4 sm:$0xff]   ;;  %v1822_v6 = vld [vmem:[%s2741_s0 + $0xf4] ss:$8 sps:$4 sm:$0xff]  }
  0x18   :  { %v1846_v7 = vld [vmem:[%s2741_s0 + $0x1f4] ss:$8 sps:$4 sm:$0xff]   ;;  %v1824_v8 = vld [vmem:[%s2741_s0 + $0xf0] ss:$8 sps:$4 sm:$0xff]  }
  0x1a   :  { %549 = vmatpush1.bf16.msra.mxu0 %v1750_v9  ;;  %1740 = vmatpush1.bf16.msra.mxu1 %v1750_v9  ;;  %v1848_v9 = vld [vmem:[%s2741_s0 + $0x1f0] ss:$8 sps:$4 sm:$0xff]  }
  0x1b   :  { %550 = vmatprep.subr.bf16.mxu0 %v1849_v0  ;;  %1732 = vmatprep.subr.bf16.mxu1 %v1849_v0 }
  0x1e   :  { %551 = vmatpush1.bf16.msra.mxu0 %v1751_v10  ;;  %1741 = vmatpush1.bf16.msra.mxu1 %v1751_v10 }
  0x1f   :  { %552 = vmatprep.subr.bf16.mxu0 %v1849_v0  ;;  %1733 = vmatprep.subr.bf16.mxu1 %v1849_v0  ;;  %v1812_v0 = vld [vmem:[%s2741_s0 + $0xd0] ss:$8 sps:$4 sm:$0xff]  }
  0x22   :  { %553 = vmatpush1.bf16.msra.mxu0 %v1752_v11  ;;  %1742 = vmatpush1.bf16.msra.mxu1 %v1752_v11 }
  0x25   :  { %569 = vmatmul.mubr.bf16.vlgmr.msra.gmra.mrb[0].mxu0 %v1753_v12  ;;  %697 = vmatmul.mubr.bf16.vlgmr.msra.gmra.mrb[0].mxu1 %v1777_v14 }
  0x26   :  { %1566 = vmatprep.mubr.msk.bf16.mxu0 %vm439_vm0, %v1756_v13  ;;  %1582 = vmatprep.mubr.msk.bf16.mxu1 %vm439_vm0, %v1783_v15 }
  0x2d   :  { %577 = vmatmul.mubr.bf16.gmra.mrb[4].mxu0 %v1758_v16  ;;  %705 = vmatmul.mubr.bf16.gmra.mrb[4].mxu1 %v1785_v18 }
  0x2e   :  { %1567 = vmatprep.mubr.msk.bf16.mxu0 %vm439_vm0, %v1759_v17  ;;  %1583 = vmatprep.mubr.msk.bf16.mxu1 %vm439_vm0, %v1789_v19 }
  0x35   :  { %585 = vmatmul.mubr.bf16.gmra.mrb[8].mxu0 %v1761_v20  ;;  %713 = vmatmul.mubr.bf16.gmra.mrb[8].mxu1 %v1791_v22 }
  0x36   :  { %1568 = vmatprep.mubr.msk.bf16.mxu0 %vm439_vm0, %v1762_v21  ;;  %1584 = vmatprep.mubr.msk.bf16.mxu1 %vm439_vm0, %v1795_v23 }
  0x3d   :  { %593 = vmatmul.mubr.bf16.gmra.mrb[12].mxu0 %v1764_v24  ;;  %721 = vmatmul.mubr.bf16.gmra.mrb[12].mxu1 %v1797_v25 }
  0x3e   :  { %1569 = vmatprep.mubr.msk.bf16.mxu0 %vm439_vm0, %v1765_v26  ;;  %1585 = vmatprep.mubr.msk.bf16.mxu1 %vm439_vm0, %v1801_v27 }
  0x45   :  { %601 = vmatmul.mubr.bf16.gmra.mrb[16].mxu0 %v1767_v28  ;;  %729 = vmatmul.mubr.bf16.gmra.mrb[16].mxu1 %v1803_v29 }
  0x46   :  { %1570 = vmatprep.mubr.msk.bf16.mxu0 %vm439_vm0, %v1768_v30  ;;  %1586 = vmatprep.mubr.msk.bf16.mxu1 %vm439_vm0, %v1807_v31 }
  0x4d   :  { %609 = vmatmul.mubr.bf16.gmra.mrb[20].mxu0 %v1770_v32  ;;  %737 = vmatmul.mubr.bf16.gmra.mrb[20].mxu1 %v1809_v33 }
  0x4e   :  { %1571 = vmatprep.mubr.msk.bf16.mxu0 %vm439_vm0, %v1771_v34  ;;  %1587 = vmatprep.mubr.msk.bf16.mxu1 %vm439_vm0, %v1813_v35 }
  0x55   :  { %617 = vmatmul.mubr.bf16.gmra.mrb[24].mxu0 %v1773_v36  ;;  %745 = vmatmul.mubr.bf16.gmra.mrb[24].mxu1 %v1815_v37 }
  0x56   :  { %1572 = vmatprep.mubr.msk.bf16.mxu0 %vm439_vm0, %v1774_v38  ;;  %1588 = vmatprep.mubr.msk.bf16.mxu1 %vm439_vm0, %v1819_v39 }
  0x5d   :  { %625 = vmatmul.mubr.bf16.gmra.mrb[28].mxu0 %v1776_v40  ;;  %753 = vmatmul.mubr.bf16.gmra.mrb[28].mxu1 %v1821_v41 }
  0x5e   :  { %1573 = vmatprep.mubr.msk.bf16.mxu0 %vm439_vm0, %v1780_v42  ;;  %1589 = vmatprep.mubr.msk.bf16.mxu1 %vm439_vm0, %v1825_v43 }
  0x65   :  { %633 = vmatmul.mubr.bf16.gmra.mrb[32].mxu0 %v1782_v44  ;;  %761 = vmatmul.mubr.bf16.gmra.mrb[32].mxu1 %v1827_v45 }
  0x66   :  { %1574 = vmatprep.mubr.msk.bf16.mxu0 %vm439_vm0, %v1786_v46  ;;  %1590 = vmatprep.mubr.msk.bf16.mxu1 %vm439_vm0, %v1828_v47 }
  0x6d   :  { %641 = vmatmul.mubr.bf16.gmra.mrb[36].mxu0 %v1788_v48  ;;  %769 = vmatmul.mubr.bf16.gmra.mrb[36].mxu1 %v1830_v49 }
  0x6e   :  { %1575 = vmatprep.mubr.msk.bf16.mxu0 %vm439_vm0, %v1792_v50  ;;  %1591 = vmatprep.mubr.msk.bf16.mxu1 %vm439_vm0, %v1831_v51 }
  0x75   :  { %649 = vmatmul.mubr.bf16.gmra.mrb[40].mxu0 %v1794_v52  ;;  %777 = vmatmul.mubr.bf16.gmra.mrb[40].mxu1 %v1833_v53 }
  0x76   :  { %1576 = vmatprep.mubr.msk.bf16.mxu0 %vm439_vm0, %v1798_v54  ;;  %1592 = vmatprep.mubr.msk.bf16.mxu1 %vm439_vm0, %v1834_v55 }
  0x7d   :  { %657 = vmatmul.mubr.bf16.gmra.mrb[44].mxu0 %v1800_v56  ;;  %785 = vmatmul.mubr.bf16.gmra.mrb[44].mxu1 %v1836_v57 }
  0x7e   :  { %1577 = vmatprep.mubr.msk.bf16.mxu0 %vm439_vm0, %v1804_v58  ;;  %1593 = vmatprep.mubr.msk.bf16.mxu1 %vm439_vm0, %v1837_v59 }
  0x85   :  { %665 = vmatmul.mubr.bf16.gmra.mrb[48].mxu0 %v1806_v60  ;;  %793 = vmatmul.mubr.bf16.gmra.mrb[48].mxu1 %v1839_v61 }
  0x86   :  { %1578 = vmatprep.mubr.msk.bf16.mxu0 %vm439_vm0, %v1810_v62  ;;  %1594 = vmatprep.mubr.msk.bf16.mxu1 %vm439_vm0, %v1840_v63 }
  0x8d   :  { %673 = vmatmul.mubr.bf16.gmra.mrb[52].mxu0 %v1812_v0  ;;  %801 = vmatmul.mubr.bf16.gmra.mrb[52].mxu1 %v1842_v1 }
  0x8e   :  { %1579 = vmatprep.mubr.msk.bf16.mxu0 %vm439_vm0, %v1816_v2  ;;  %1595 = vmatprep.mubr.msk.bf16.mxu1 %vm439_vm0, %v1843_v3 }
  0x95   :  { %681 = vmatmul.mubr.bf16.gmra.mrb[56].mxu0 %v1818_v4  ;;  %809 = vmatmul.mubr.bf16.gmra.mrb[56].mxu1 %v1845_v5 }
  0x96   :  { %1580 = vmatprep.mubr.msk.bf16.mxu0 %vm439_vm0, %v1822_v6  ;;  %1596 = vmatprep.mubr.msk.bf16.mxu1 %vm439_vm0, %v1846_v7 }
  0x9d   :  { %689 = vmatmul.mubr.bf16.gmra.mrb[60].mxu0 %v1824_v8  ;;  %817 = vmatmul.mubr.bf16.gmra.mrb[60].mxu1 %v1848_v9 }
  0xf8   :  { %v570_v10 = vpop.f32.mrb[0].mxu0  ;;  %v2126_v11 = vpop.f32.mrb[0].mxu1 }
  0xf9   :  { %v1661_v12 = vpack.c.bf16 %v570_v10, %v570_v10  ;;  %v1282_v13 = vmul.f32 %v570_v10, %v570_v10  ;;  %v572_v14 = vpop.f32.mrb[1].mxu0  ;;  %v1693_v15 = vpack.c.bf16 %v2126_v11, %v2126_v11  ;;  %v700_v16 = vpop.f32.mrb[1].mxu1  ;;  %v1147_v19 = vsel %vm1146_vm2, %v570_v10, 0.0 }
  0xfa   :  { %v573_v17 = vpop.f32.mrb[2].mxu0  ;;  %v2130_v18 = vpop.f32.mrb[2].mxu1 }
  0xfb   :  { %1082 = vst.msk [vmem:[%s2742_s2] sm:$0xf] %vm1081_vm1, %v1661_v12  ;;  %v1662_v20 = vpack.c.bf16 %v573_v17, %v573_v17  ;;  %v1148_v21 = vsel %vm1146_vm2, %v573_v17, 0.0  ;;  %v1283_v22 = vmul.f32 %v573_v17, %v573_v17  ;;  %v575_v23 = vpop.f32.mrb[3].mxu0  ;;  %1114 = vst.msk [vmem:[%s2742_s2 + $0x80] sm:$0xf] %vm1081_vm1, %v1693_v15  ;;  %v1694_v26 = vpack.c.bf16 %v2130_v18, %v2130_v18 }
  0xfc   :  { %v703_v24 = vpop.f32.mrb[3].mxu1  ;;  %v1149_v25 = vadd.f32 %v1148_v21, %v1147_v19  ;;  %v1346_v27 = vsel %vm1146_vm2, %v1282_v13, 0.0 }
  0xfd   :  { %1083 = vst.msk [vmem:[%s2742_s2 + $0x4] sm:$0xf] %vm1081_vm1, %v1662_v20  ;;  %v1347_v28 = vsel %vm1146_vm2, %v1283_v22, 0.0  ;;  %1115 = vst.msk [vmem:[%s2742_s2 + $0x84] sm:$0xf] %vm1081_vm1, %v1694_v26 }
  0xfe   :  { %v1348_v29 = vadd.f32 %v1347_v28, %v1346_v27 }
 0x100   :  { %v578_v30 = vpop.f32.mrb[4].mxu0  ;;  %v2154_v31 = vpop.f32.mrb[4].mxu1 }
 0x101   :  { %v1663_v32 = vpack.c.bf16 %v578_v30, %v578_v30  ;;  %v1150_v33 = vsel %vm1146_vm2, %v578_v30, 0.0  ;;  %v1284_v34 = vmul.f32 %v578_v30, %v578_v30  ;;  %v580_v35 = vpop.f32.mrb[5].mxu0  ;;  %v1695_v36 = vpack.c.bf16 %v2154_v31, %v2154_v31  ;;  %v708_v37 = vpop.f32.mrb[5].mxu1 }
 0x102   :  { %v1151_v38 = vadd.f32 %v1150_v33, %v1149_v25  ;;  %v581_v39 = vpop.f32.mrb[6].mxu0  ;;  %v2159_v40 = vpop.f32.mrb[6].mxu1 }
 0x103   :  { %1084 = vst.msk [vmem:[%s2742_s2 + $0x8] sm:$0xf] %vm1081_vm1, %v1663_v32  ;;  %v1349_v41 = vsel %vm1146_vm2, %v1284_v34, 0.0  ;;  %v1664_v42 = vpack.c.bf16 %v581_v39, %v581_v39  ;;  %v1152_v43 = vsel %vm1146_vm2, %v581_v39, 0.0  ;;  %v1285_v44 = vmul.f32 %v581_v39, %v581_v39  ;;  %v583_v45 = vpop.f32.mrb[7].mxu0  ;;  %v711_v46 = vpop.f32.mrb[7].mxu1 }
 0x104   :  { %1116 = vst.msk [vmem:[%s2742_s2 + $0x88] sm:$0xf] %vm1081_vm1, %v1695_v36  ;;  %v1350_v47 = vadd.f32 %v1349_v41, %v1348_v29  ;;  %v1153_v48 = vadd.f32 %v1152_v43, %v1151_v38  ;;  %v1696_v49 = vpack.c.bf16 %v2159_v40, %v2159_v40 }
 0x105   :  { %1085 = vst.msk [vmem:[%s2742_s2 + $0xc] sm:$0xf] %vm1081_vm1, %v1664_v42  ;;  %v1351_v50 = vsel %vm1146_vm2, %v1285_v44, 0.0 }
 0x106   :  { %v1352_v51 = vadd.f32 %v1351_v50, %v1350_v47  ;;  %1117 = vst.msk [vmem:[%s2742_s2 + $0x8c] sm:$0xf] %vm1081_vm1, %v1696_v49 }
 0x108   :  { %v586_v52 = vpop.f32.mrb[8].mxu0  ;;  %v2182_v53 = vpop.f32.mrb[8].mxu1 }
 0x109   :  { %v1665_v54 = vpack.c.bf16 %v586_v52, %v586_v52  ;;  %v1154_v55 = vsel %vm1146_vm2, %v586_v52, 0.0  ;;  %v1286_v56 = vmul.f32 %v586_v52, %v586_v52  ;;  %v588_v57 = vpop.f32.mrb[9].mxu0  ;;  %v1697_v58 = vpack.c.bf16 %v2182_v53, %v2182_v53  ;;  %v716_v59 = vpop.f32.mrb[9].mxu1 }
 0x10a   :  { %v1155_v60 = vadd.f32 %v1154_v55, %v1153_v48  ;;  %v589_v61 = vpop.f32.mrb[10].mxu0  ;;  %v2187_v62 = vpop.f32.mrb[10].mxu1 }
 0x10b   :  { %1086 = vst.msk [vmem:[%s2742_s2 + $0x10] sm:$0xf] %vm1081_vm1, %v1665_v54  ;;  %v1353_v63 = vsel %vm1146_vm2, %v1286_v56, 0.0  ;;  %v1666_v0 = vpack.c.bf16 %v589_v61, %v589_v61  ;;  %v1156_v1 = vsel %vm1146_vm2, %v589_v61, 0.0  ;;  %v1287_v2 = vmul.f32 %v589_v61, %v589_v61  ;;  %v591_v3 = vpop.f32.mrb[11].mxu0  ;;  %v719_v4 = vpop.f32.mrb[11].mxu1 }
 0x10c   :  { %1118 = vst.msk [vmem:[%s2742_s2 + $0x90] sm:$0xf] %vm1081_vm1, %v1697_v58  ;;  %v1354_v5 = vadd.f32 %v1353_v63, %v1352_v51  ;;  %v1157_v6 = vadd.f32 %v1156_v1, %v1155_v60  ;;  %v1698_v7 = vpack.c.bf16 %v2187_v62, %v2187_v62 }
 0x10d   :  { %1087 = vst.msk [vmem:[%s2742_s2 + $0x14] sm:$0xf] %vm1081_vm1, %v1666_v0  ;;  %v1355_v8 = vsel %vm1146_vm2, %v1287_v2, 0.0 }
 0x10e   :  { %v1356_v9 = vadd.f32 %v1355_v8, %v1354_v5  ;;  %1119 = vst.msk [vmem:[%s2742_s2 + $0x94] sm:$0xf] %vm1081_vm1, %v1698_v7 }
 0x110   :  { %v594_v10 = vpop.f32.mrb[12].mxu0  ;;  %v2210_v12 = vpop.f32.mrb[12].mxu1 }
 0x111   :  { %v1667_v13 = vpack.c.bf16 %v594_v10, %v594_v10  ;;  %v1158_v14 = vsel %vm1146_vm2, %v594_v10, 0.0  ;;  %v1288_v15 = vmul.f32 %v594_v10, %v594_v10  ;;  %v596_v16 = vpop.f32.mrb[13].mxu0  ;;  %v1699_v17 = vpack.c.bf16 %v2210_v12, %v2210_v12  ;;  %v724_v19 = vpop.f32.mrb[13].mxu1 }
 0x112   :  { %v1159_v20 = vadd.f32 %v1158_v14, %v1157_v6  ;;  %v597_v21 = vpop.f32.mrb[14].mxu0  ;;  %v2215_v22 = vpop.f32.mrb[14].mxu1 }
 0x113   :  { %1088 = vst.msk [vmem:[%s2742_s2 + $0x18] sm:$0xf] %vm1081_vm1, %v1667_v13  ;;  %v1357_v23 = vsel %vm1146_vm2, %v1288_v15, 0.0  ;;  %v1668_v24 = vpack.c.bf16 %v597_v21, %v597_v21  ;;  %v1160_v25 = vsel %vm1146_vm2, %v597_v21, 0.0  ;;  %v1289_v26 = vmul.f32 %v597_v21, %v597_v21  ;;  %v599_v27 = vpop.f32.mrb[15].mxu0  ;;  %v727_v28 = vpop.f32.mrb[15].mxu1 }
 0x114   :  { %1120 = vst.msk [vmem:[%s2742_s2 + $0x98] sm:$0xf] %vm1081_vm1, %v1699_v17  ;;  %v1358_v29 = vadd.f32 %v1357_v23, %v1356_v9  ;;  %v1161_v30 = vadd.f32 %v1160_v25, %v1159_v20  ;;  %v1700_v32 = vpack.c.bf16 %v2215_v22, %v2215_v22 }
 0x115   :  { %1089 = vst.msk [vmem:[%s2742_s2 + $0x1c] sm:$0xf] %vm1081_vm1, %v1668_v24  ;;  %v1359_v33 = vsel %vm1146_vm2, %v1289_v26, 0.0 }
 0x116   :  { %v1360_v34 = vadd.f32 %v1359_v33, %v1358_v29  ;;  %1121 = vst.msk [vmem:[%s2742_s2 + $0x9c] sm:$0xf] %vm1081_vm1, %v1700_v32 }
 0x118   :  { %v602_v35 = vpop.f32.mrb[16].mxu0  ;;  %v2238_v36 = vpop.f32.mrb[16].mxu1 }
 0x119   :  { %v1669_v37 = vpack.c.bf16 %v602_v35, %v602_v35  ;;  %v1162_v38 = vsel %vm1146_vm2, %v602_v35, 0.0  ;;  %v1290_v39 = vmul.f32 %v602_v35, %v602_v35  ;;  %v604_v41 = vpop.f32.mrb[17].mxu0  ;;  %v1701_v42 = vpack.c.bf16 %v2238_v36, %v2238_v36  ;;  %v732_v43 = vpop.f32.mrb[17].mxu1 }
 0x11a   :  { %v1163_v44 = vadd.f32 %v1162_v38, %v1161_v30  ;;  %v605_v45 = vpop.f32.mrb[18].mxu0  ;;  %v2243_v46 = vpop.f32.mrb[18].mxu1 }
 0x11b   :  { %1090 = vst.msk [vmem:[%s2742_s2 + $0x20] sm:$0xf] %vm1081_vm1, %v1669_v37  ;;  %v1361_v47 = vsel %vm1146_vm2, %v1290_v39, 0.0  ;;  %v1670_v48 = vpack.c.bf16 %v605_v45, %v605_v45  ;;  %v1164_v49 = vsel %vm1146_vm2, %v605_v45, 0.0  ;;  %v1291_v50 = vmul.f32 %v605_v45, %v605_v45  ;;  %v607_v51 = vpop.f32.mrb[19].mxu0  ;;  %v735_v52 = vpop.f32.mrb[19].mxu1 }
 0x11c   :  { %1122 = vst.msk [vmem:[%s2742_s2 + $0xa0] sm:$0xf] %vm1081_vm1, %v1701_v42  ;;  %v1362_v54 = vadd.f32 %v1361_v47, %v1360_v34  ;;  %v1165_v55 = vadd.f32 %v1164_v49, %v1163_v44  ;;  %v1702_v56 = vpack.c.bf16 %v2243_v46, %v2243_v46 }
 0x11d   :  { %1091 = vst.msk [vmem:[%s2742_s2 + $0x24] sm:$0xf] %vm1081_vm1, %v1670_v48  ;;  %v1363_v57 = vsel %vm1146_vm2, %v1291_v50, 0.0 }
 0x11e   :  { %v1364_v58 = vadd.f32 %v1363_v57, %v1362_v54  ;;  %1123 = vst.msk [vmem:[%s2742_s2 + $0xa4] sm:$0xf] %vm1081_vm1, %v1702_v56 }
 0x120   :  { %v610_v59 = vpop.f32.mrb[20].mxu0  ;;  %v2266_v60 = vpop.f32.mrb[20].mxu1 }
 0x121   :  { %v1671_v61 = vpack.c.bf16 %v610_v59, %v610_v59  ;;  %v1166_v63 = vsel %vm1146_vm2, %v610_v59, 0.0  ;;  %v1292_v0 = vmul.f32 %v610_v59, %v610_v59  ;;  %v612_v1 = vpop.f32.mrb[21].mxu0  ;;  %v1703_v2 = vpack.c.bf16 %v2266_v60, %v2266_v60  ;;  %v740_v3 = vpop.f32.mrb[21].mxu1 }
 0x122   :  { %v1167_v4 = vadd.f32 %v1166_v63, %v1165_v55  ;;  %v613_v5 = vpop.f32.mrb[22].mxu0  ;;  %v2271_v6 = vpop.f32.mrb[22].mxu1 }
 0x123   :  { %1092 = vst.msk [vmem:[%s2742_s2 + $0x28] sm:$0xf] %vm1081_vm1, %v1671_v61  ;;  %v1365_v7 = vsel %vm1146_vm2, %v1292_v0, 0.0  ;;  %v1672_v8 = vpack.c.bf16 %v613_v5, %v613_v5  ;;  %v1168_v9 = vsel %vm1146_vm2, %v613_v5, 0.0  ;;  %v1293_v10 = vmul.f32 %v613_v5, %v613_v5  ;;  %v615_v13 = vpop.f32.mrb[23].mxu0  ;;  %v743_v14 = vpop.f32.mrb[23].mxu1 }
 0x124   :  { %1124 = vst.msk [vmem:[%s2742_s2 + $0xa8] sm:$0xf] %vm1081_vm1, %v1703_v2  ;;  %v1366_v15 = vadd.f32 %v1365_v7, %v1364_v58  ;;  %v1169_v16 = vadd.f32 %v1168_v9, %v1167_v4  ;;  %v1704_v17 = vpack.c.bf16 %v2271_v6, %v2271_v6 }
 0x125   :  { %1093 = vst.msk [vmem:[%s2742_s2 + $0x2c] sm:$0xf] %vm1081_vm1, %v1672_v8  ;;  %v1367_v19 = vsel %vm1146_vm2, %v1293_v10, 0.0 }
 0x126   :  { %v1368_v20 = vadd.f32 %v1367_v19, %v1366_v15  ;;  %1125 = vst.msk [vmem:[%s2742_s2 + $0xac] sm:$0xf] %vm1081_vm1, %v1704_v17 }
 0x128   :  { %v618_v21 = vpop.f32.mrb[24].mxu0  ;;  %v2294_v23 = vpop.f32.mrb[24].mxu1 }
 0x129   :  { %v1673_v24 = vpack.c.bf16 %v618_v21, %v618_v21  ;;  %v1170_v25 = vsel %vm1146_vm2, %v618_v21, 0.0  ;;  %v1294_v26 = vmul.f32 %v618_v21, %v618_v21  ;;  %v620_v27 = vpop.f32.mrb[25].mxu0  ;;  %v1705_v28 = vpack.c.bf16 %v2294_v23, %v2294_v23  ;;  %v748_v29 = vpop.f32.mrb[25].mxu1 }
 0x12a   :  { %v1171_v30 = vadd.f32 %v1170_v25, %v1169_v16  ;;  %v621_v32 = vpop.f32.mrb[26].mxu0  ;;  %v2299_v33 = vpop.f32.mrb[26].mxu1 }
 0x12b   :  { %1094 = vst.msk [vmem:[%s2742_s2 + $0x30] sm:$0xf] %vm1081_vm1, %v1673_v24  ;;  %v1369_v34 = vsel %vm1146_vm2, %v1294_v26, 0.0  ;;  %v1674_v35 = vpack.c.bf16 %v621_v32, %v621_v32  ;;  %v1172_v37 = vsel %vm1146_vm2, %v621_v32, 0.0  ;;  %v1295_v38 = vmul.f32 %v621_v32, %v621_v32  ;;  %v623_v39 = vpop.f32.mrb[27].mxu0  ;;  %v751_v41 = vpop.f32.mrb[27].mxu1 }
 0x12c   :  { %1126 = vst.msk [vmem:[%s2742_s2 + $0xb0] sm:$0xf] %vm1081_vm1, %v1705_v28  ;;  %v1370_v42 = vadd.f32 %v1369_v34, %v1368_v20  ;;  %v1173_v43 = vadd.f32 %v1172_v37, %v1171_v30  ;;  %v1706_v44 = vpack.c.bf16 %v2299_v33, %v2299_v33 }
 0x12d   :  { %1095 = vst.msk [vmem:[%s2742_s2 + $0x34] sm:$0xf] %vm1081_vm1, %v1674_v35  ;;  %v1371_v45 = vsel %vm1146_vm2, %v1295_v38, 0.0 }
 0x12e   :  { %v1372_v47 = vadd.f32 %v1371_v45, %v1370_v42  ;;  %1127 = vst.msk [vmem:[%s2742_s2 + $0xb4] sm:$0xf] %vm1081_vm1, %v1706_v44 }
 0x130   :  { %v626_v48 = vpop.f32.mrb[28].mxu0  ;;  %v2322_v49 = vpop.f32.mrb[28].mxu1 }
 0x131   :  { %v1675_v50 = vpack.c.bf16 %v626_v48, %v626_v48  ;;  %v1174_v51 = vsel %vm1146_vm2, %v626_v48, 0.0  ;;  %v1296_v52 = vmul.f32 %v626_v48, %v626_v48  ;;  %v628_v54 = vpop.f32.mrb[29].mxu0  ;;  %v1707_v55 = vpack.c.bf16 %v2322_v49, %v2322_v49  ;;  %v756_v56 = vpop.f32.mrb[29].mxu1 }
 0x132   :  { %v1175_v57 = vadd.f32 %v1174_v51, %v1173_v43  ;;  %v629_v58 = vpop.f32.mrb[30].mxu0  ;;  %v2327_v59 = vpop.f32.mrb[30].mxu1 }
 0x133   :  { %1096 = vst.msk [vmem:[%s2742_s2 + $0x38] sm:$0xf] %vm1081_vm1, %v1675_v50  ;;  %v1373_v61 = vsel %vm1146_vm2, %v1296_v52, 0.0  ;;  %v1676_v63 = vpack.c.bf16 %v629_v58, %v629_v58  ;;  %v1176_v0 = vsel %vm1146_vm2, %v629_v58, 0.0  ;;  %v1297_v1 = vmul.f32 %v629_v58, %v629_v58  ;;  %v631_v2 = vpop.f32.mrb[31].mxu0  ;;  %v759_v3 = vpop.f32.mrb[31].mxu1 }
 0x134   :  { %1128 = vst.msk [vmem:[%s2742_s2 + $0xb8] sm:$0xf] %vm1081_vm1, %v1707_v55  ;;  %v1374_v4 = vadd.f32 %v1373_v61, %v1372_v47  ;;  %v1177_v5 = vadd.f32 %v1176_v0, %v1175_v57  ;;  %v1708_v7 = vpack.c.bf16 %v2327_v59, %v2327_v59 }
 0x135   :  { %1097 = vst.msk [vmem:[%s2742_s2 + $0x3c] sm:$0xf] %vm1081_vm1, %v1676_v63  ;;  %v1375_v8 = vsel %vm1146_vm2, %v1297_v1, 0.0 }
 0x136   :  { %v1376_v9 = vadd.f32 %v1375_v8, %v1374_v4  ;;  %1129 = vst.msk [vmem:[%s2742_s2 + $0xbc] sm:$0xf] %vm1081_vm1, %v1708_v7 }
 0x138   :  { %v634_v10 = vpop.f32.mrb[32].mxu0  ;;  %v2350_v13 = vpop.f32.mrb[32].mxu1 }
 0x139   :  { %v1677_v14 = vpack.c.bf16 %v634_v10, %v634_v10  ;;  %v1178_v15 = vsel %vm1146_vm2, %v634_v10, 0.0  ;;  %v1298_v16 = vmul.f32 %v634_v10, %v634_v10  ;;  %v636_v17 = vpop.f32.mrb[33].mxu0  ;;  %v1709_v19 = vpack.c.bf16 %v2350_v13, %v2350_v13  ;;  %v764_v20 = vpop.f32.mrb[33].mxu1 }
 0x13a   :  { %v1179_v21 = vadd.f32 %v1178_v15, %v1177_v5  ;;  %v637_v24 = vpop.f32.mrb[34].mxu0  ;;  %v2355_v25 = vpop.f32.mrb[34].mxu1 }
 0x13b   :  { %1098 = vst.msk [vmem:[%s2742_s2 + $0x40] sm:$0xf] %vm1081_vm1, %v1677_v14  ;;  %v1377_v26 = vsel %vm1146_vm2, %v1298_v16, 0.0  ;;  %v1678_v27 = vpack.c.bf16 %v637_v24, %v637_v24  ;;  %v1180_v28 = vsel %vm1146_vm2, %v637_v24, 0.0  ;;  %v1299_v29 = vmul.f32 %v637_v24, %v637_v24  ;;  %v639_v30 = vpop.f32.mrb[35].mxu0  ;;  %v767_v32 = vpop.f32.mrb[35].mxu1 }
 0x13c   :  { %1130 = vst.msk [vmem:[%s2742_s2 + $0xc0] sm:$0xf] %vm1081_vm1, %v1709_v19  ;;  %v1378_v34 = vadd.f32 %v1377_v26, %v1376_v9  ;;  %v1181_v35 = vadd.f32 %v1180_v28, %v1179_v21  ;;  %v1710_v37 = vpack.c.bf16 %v2355_v25, %v2355_v25 }
 0x13d   :  { %1099 = vst.msk [vmem:[%s2742_s2 + $0x44] sm:$0xf] %vm1081_vm1, %v1678_v27  ;;  %v1379_v38 = vsel %vm1146_vm2, %v1299_v29, 0.0 }
 0x13e   :  { %v1380_v39 = vadd.f32 %v1379_v38, %v1378_v34  ;;  %1131 = vst.msk [vmem:[%s2742_s2 + $0xc4] sm:$0xf] %vm1081_vm1, %v1710_v37 }
 0x140   :  { %v642_v41 = vpop.f32.mrb[36].mxu0  ;;  %v2378_v42 = vpop.f32.mrb[36].mxu1 }
 0x141   :  { %v1679_v43 = vpack.c.bf16 %v642_v41, %v642_v41  ;;  %v1182_v44 = vsel %vm1146_vm2, %v642_v41, 0.0  ;;  %v1300_v45 = vmul.f32 %v642_v41, %v642_v41  ;;  %v644_v47 = vpop.f32.mrb[37].mxu0  ;;  %v1711_v48 = vpack.c.bf16 %v2378_v42, %v2378_v42  ;;  %v772_v50 = vpop.f32.mrb[37].mxu1 }
 0x142   :  { %v1183_v51 = vadd.f32 %v1182_v44, %v1181_v35  ;;  %v645_v52 = vpop.f32.mrb[38].mxu0  ;;  %v2383_v54 = vpop.f32.mrb[38].mxu1 }
 0x143   :  { %1100 = vst.msk [vmem:[%s2742_s2 + $0x48] sm:$0xf] %vm1081_vm1, %v1679_v43  ;;  %v1381_v55 = vsel %vm1146_vm2, %v1300_v45, 0.0  ;;  %v1680_v56 = vpack.c.bf16 %v645_v52, %v645_v52  ;;  %v1184_v57 = vsel %vm1146_vm2, %v645_v52, 0.0  ;;  %v1301_v58 = vmul.f32 %v645_v52, %v645_v52  ;;  %v647_v61 = vpop.f32.mrb[39].mxu0  ;;  %v775_v63 = vpop.f32.mrb[39].mxu1 }
 0x144   :  { %1132 = vst.msk [vmem:[%s2742_s2 + $0xc8] sm:$0xf] %vm1081_vm1, %v1711_v48  ;;  %v1382_v0 = vadd.f32 %v1381_v55, %v1380_v39  ;;  %v1185_v1 = vadd.f32 %v1184_v57, %v1183_v51  ;;  %v1712_v2 = vpack.c.bf16 %v2383_v54, %v2383_v54 }
 0x145   :  { %1101 = vst.msk [vmem:[%s2742_s2 + $0x4c] sm:$0xf] %vm1081_vm1, %v1680_v56  ;;  %v1383_v3 = vsel %vm1146_vm2, %v1301_v58, 0.0 }
 0x146   :  { %v1384_v4 = vadd.f32 %v1383_v3, %v1382_v0  ;;  %1133 = vst.msk [vmem:[%s2742_s2 + $0xcc] sm:$0xf] %vm1081_vm1, %v1712_v2 }
 0x148   :  { %v650_v5 = vpop.f32.mrb[40].mxu0  ;;  %v2406_v7 = vpop.f32.mrb[40].mxu1 }
 0x149   :  { %v1681_v8 = vpack.c.bf16 %v650_v5, %v650_v5  ;;  %v1186_v9 = vsel %vm1146_vm2, %v650_v5, 0.0  ;;  %v1302_v10 = vmul.f32 %v650_v5, %v650_v5  ;;  %v652_v14 = vpop.f32.mrb[41].mxu0  ;;  %v1713_v15 = vpack.c.bf16 %v2406_v7, %v2406_v7  ;;  %v780_v16 = vpop.f32.mrb[41].mxu1 }
 0x14a   :  { %v1187_v17 = vadd.f32 %v1186_v9, %v1185_v1  ;;  %v653_v19 = vpop.f32.mrb[42].mxu0  ;;  %v2411_v20 = vpop.f32.mrb[42].mxu1 }
 0x14b   :  { %1102 = vst.msk [vmem:[%s2742_s2 + $0x50] sm:$0xf] %vm1081_vm1, %v1681_v8  ;;  %v1385_v21 = vsel %vm1146_vm2, %v1302_v10, 0.0  ;;  %v1682_v24 = vpack.c.bf16 %v653_v19, %v653_v19  ;;  %v1188_v26 = vsel %vm1146_vm2, %v653_v19, 0.0  ;;  %v1303_v27 = vmul.f32 %v653_v19, %v653_v19  ;;  %v655_v28 = vpop.f32.mrb[43].mxu0  ;;  %v783_v29 = vpop.f32.mrb[43].mxu1 }
 0x14c   :  { %1134 = vst.msk [vmem:[%s2742_s2 + $0xd0] sm:$0xf] %vm1081_vm1, %v1713_v15  ;;  %v1386_v30 = vadd.f32 %v1385_v21, %v1384_v4  ;;  %v1189_v32 = vadd.f32 %v1188_v26, %v1187_v17  ;;  %v1714_v34 = vpack.c.bf16 %v2411_v20, %v2411_v20 }
 0x14d   :  { %1103 = vst.msk [vmem:[%s2742_s2 + $0x54] sm:$0xf] %vm1081_vm1, %v1682_v24  ;;  %v1387_v35 = vsel %vm1146_vm2, %v1303_v27, 0.0 }
 0x14e   :  { %v1388_v37 = vadd.f32 %v1387_v35, %v1386_v30  ;;  %1135 = vst.msk [vmem:[%s2742_s2 + $0xd4] sm:$0xf] %vm1081_vm1, %v1714_v34 }
 0x150   :  { %v658_v38 = vpop.f32.mrb[44].mxu0  ;;  %v2434_v39 = vpop.f32.mrb[44].mxu1 }
 0x151   :  { %v1683_v41 = vpack.c.bf16 %v658_v38, %v658_v38  ;;  %v1190_v43 = vsel %vm1146_vm2, %v658_v38, 0.0  ;;  %v1304_v44 = vmul.f32 %v658_v38, %v658_v38  ;;  %v660_v45 = vpop.f32.mrb[45].mxu0  ;;  %v1715_v47 = vpack.c.bf16 %v2434_v39, %v2434_v39  ;;  %v788_v48 = vpop.f32.mrb[45].mxu1 }
 0x152   :  { %v1191_v50 = vadd.f32 %v1190_v43, %v1189_v32  ;;  %v661_v51 = vpop.f32.mrb[46].mxu0  ;;  %v2439_v52 = vpop.f32.mrb[46].mxu1 }
 0x153   :  { %1104 = vst.msk [vmem:[%s2742_s2 + $0x58] sm:$0xf] %vm1081_vm1, %v1683_v41  ;;  %v1389_v55 = vsel %vm1146_vm2, %v1304_v44, 0.0  ;;  %v1684_v56 = vpack.c.bf16 %v661_v51, %v661_v51  ;;  %v1192_v57 = vsel %vm1146_vm2, %v661_v51, 0.0  ;;  %v1305_v58 = vmul.f32 %v661_v51, %v661_v51  ;;  %v663_v61 = vpop.f32.mrb[47].mxu0  ;;  %v791_v63 = vpop.f32.mrb[47].mxu1 }
 0x154   :  { %1136 = vst.msk [vmem:[%s2742_s2 + $0xd8] sm:$0xf] %vm1081_vm1, %v1715_v47  ;;  %v1390_v0 = vadd.f32 %v1389_v55, %v1388_v37  ;;  %v1193_v1 = vadd.f32 %v1192_v57, %v1191_v50  ;;  %v1716_v2 = vpack.c.bf16 %v2439_v52, %v2439_v52 }
 0x155   :  { %1105 = vst.msk [vmem:[%s2742_s2 + $0x5c] sm:$0xf] %vm1081_vm1, %v1684_v56  ;;  %v1391_v3 = vsel %vm1146_vm2, %v1305_v58, 0.0 }
 0x156   :  { %v1392_v4 = vadd.f32 %v1391_v3, %v1390_v0  ;;  %1137 = vst.msk [vmem:[%s2742_s2 + $0xdc] sm:$0xf] %vm1081_vm1, %v1716_v2 }
 0x158   :  { %v666_v5 = vpop.f32.mrb[48].mxu0  ;;  %v2462_v8 = vpop.f32.mrb[48].mxu1 }
 0x159   :  { %v1685_v9 = vpack.c.bf16 %v666_v5, %v666_v5  ;;  %v1194_v10 = vsel %vm1146_vm2, %v666_v5, 0.0  ;;  %v1306_v14 = vmul.f32 %v666_v5, %v666_v5  ;;  %v668_v15 = vpop.f32.mrb[49].mxu0  ;;  %v1717_v16 = vpack.c.bf16 %v2462_v8, %v2462_v8  ;;  %v796_v17 = vpop.f32.mrb[49].mxu1 }
 0x15a   :  { %v1195_v19 = vadd.f32 %v1194_v10, %v1193_v1  ;;  %v669_v21 = vpop.f32.mrb[50].mxu0  ;;  %v2467_v24 = vpop.f32.mrb[50].mxu1 }
 0x15b   :  { %1106 = vst.msk [vmem:[%s2742_s2 + $0x60] sm:$0xf] %vm1081_vm1, %v1685_v9  ;;  %v1393_v26 = vsel %vm1146_vm2, %v1306_v14, 0.0  ;;  %v1686_v27 = vpack.c.bf16 %v669_v21, %v669_v21  ;;  %v1196_v28 = vsel %vm1146_vm2, %v669_v21, 0.0  ;;  %v1307_v29 = vmul.f32 %v669_v21, %v669_v21  ;;  %v671_v30 = vpop.f32.mrb[51].mxu0  ;;  %v799_v32 = vpop.f32.mrb[51].mxu1 }
 0x15c   :  { %1138 = vst.msk [vmem:[%s2742_s2 + $0xe0] sm:$0xf] %vm1081_vm1, %v1717_v16  ;;  %v1394_v34 = vadd.f32 %v1393_v26, %v1392_v4  ;;  %v1197_v35 = vadd.f32 %v1196_v28, %v1195_v19  ;;  %v1718_v37 = vpack.c.bf16 %v2467_v24, %v2467_v24 }
 0x15d   :  { %1107 = vst.msk [vmem:[%s2742_s2 + $0x64] sm:$0xf] %vm1081_vm1, %v1686_v27  ;;  %v1395_v38 = vsel %vm1146_vm2, %v1307_v29, 0.0 }
 0x15e   :  { %v1396_v41 = vadd.f32 %v1395_v38, %v1394_v34  ;;  %1139 = vst.msk [vmem:[%s2742_s2 + $0xe4] sm:$0xf] %vm1081_vm1, %v1718_v37 }
 0x160   :  { %v674_v43 = vpop.f32.mrb[52].mxu0  ;;  %v2490_v44 = vpop.f32.mrb[52].mxu1 }
 0x161   :  { %v1687_v45 = vpack.c.bf16 %v674_v43, %v674_v43  ;;  %v1198_v47 = vsel %vm1146_vm2, %v674_v43, 0.0  ;;  %v1308_v48 = vmul.f32 %v674_v43, %v674_v43  ;;  %v676_v50 = vpop.f32.mrb[53].mxu0  ;;  %v1719_v51 = vpack.c.bf16 %v2490_v44, %v2490_v44  ;;  %v804_v55 = vpop.f32.mrb[53].mxu1 }
 0x162   :  { %v1199_v56 = vadd.f32 %v1198_v47, %v1197_v35  ;;  %v677_v57 = vpop.f32.mrb[54].mxu0  ;;  %v2495_v58 = vpop.f32.mrb[54].mxu1 }
 0x163   :  { %1108 = vst.msk [vmem:[%s2742_s2 + $0x68] sm:$0xf] %vm1081_vm1, %v1687_v45  ;;  %v1397_v61 = vsel %vm1146_vm2, %v1308_v48, 0.0  ;;  %v1688_v63 = vpack.c.bf16 %v677_v57, %v677_v57  ;;  %v1200_v0 = vsel %vm1146_vm2, %v677_v57, 0.0  ;;  %v1309_v1 = vmul.f32 %v677_v57, %v677_v57  ;;  %v679_v2 = vpop.f32.mrb[55].mxu0  ;;  %v807_v3 = vpop.f32.mrb[55].mxu1 }
 0x164   :  { %1140 = vst.msk [vmem:[%s2742_s2 + $0xe8] sm:$0xf] %vm1081_vm1, %v1719_v51  ;;  %v1398_v4 = vadd.f32 %v1397_v61, %v1396_v41  ;;  %v1201_v5 = vadd.f32 %v1200_v0, %v1199_v56  ;;  %v1720_v9 = vpack.c.bf16 %v2495_v58, %v2495_v58  ;;  %v1314_v3 = vmul.f32 %v2126_v11, %v2126_v11 }
 0x165   :  { %1109 = vst.msk [vmem:[%s2742_s2 + $0x6c] sm:$0xf] %vm1081_vm1, %v1688_v63  ;;  %v1399_v10 = vsel %vm1146_vm2, %v1309_v1, 0.0 }
 0x166   :  { %v1400_v14 = vadd.f32 %v1399_v10, %v1398_v4  ;;  %1141 = vst.msk [vmem:[%s2742_s2 + $0xec] sm:$0xf] %vm1081_vm1, %v1720_v9 }
 0x168   :  { %v682_v15 = vpop.f32.mrb[56].mxu0  ;;  %v2518_v16 = vpop.f32.mrb[56].mxu1 }
 0x169   :  { %v1689_v17 = vpack.c.bf16 %v682_v15, %v682_v15  ;;  %v1202_v19 = vsel %vm1146_vm2, %v682_v15, 0.0  ;;  %v1310_v21 = vmul.f32 %v682_v15, %v682_v15  ;;  %v684_v26 = vpop.f32.mrb[57].mxu0  ;;  %v1721_v27 = vpack.c.bf16 %v2518_v16, %v2518_v16  ;;  %v812_v28 = vpop.f32.mrb[57].mxu1 }
 0x16a   :  { %v1203_v29 = vadd.f32 %v1202_v19, %v1201_v5  ;;  %v685_v30 = vpop.f32.mrb[58].mxu0  ;;  %v2523_v32 = vpop.f32.mrb[58].mxu1 }
 0x16b   :  { %1110 = vst.msk [vmem:[%s2742_s2 + $0x70] sm:$0xf] %vm1081_vm1, %v1689_v17  ;;  %v1401_v34 = vsel %vm1146_vm2, %v1310_v21, 0.0  ;;  %v1690_v35 = vpack.c.bf16 %v685_v30, %v685_v30  ;;  %v1204_v37 = vsel %vm1146_vm2, %v685_v30, 0.0  ;;  %v1311_v38 = vmul.f32 %v685_v30, %v685_v30  ;;  %v687_v41 = vpop.f32.mrb[59].mxu0  ;;  %v815_v43 = vpop.f32.mrb[59].mxu1 }
 0x16c   :  { %1142 = vst.msk [vmem:[%s2742_s2 + $0xf0] sm:$0xf] %vm1081_vm1, %v1721_v27  ;;  %v1402_v45 = vadd.f32 %v1401_v34, %v1400_v14  ;;  %v1205_v47 = vadd.f32 %v1204_v37, %v1203_v29  ;;  %v1722_v48 = vpack.c.bf16 %v2523_v32, %v2523_v32  ;;  %v1210_v29 = vsel %vm1146_vm2, %v2126_v11, 0.0 }
 0x16d   :  { %1111 = vst.msk [vmem:[%s2742_s2 + $0x74] sm:$0xf] %vm1081_vm1, %v1690_v35  ;;  %v1403_v50 = vsel %vm1146_vm2, %v1311_v38, 0.0  ;;  %v1315_v30 = vmul.f32 %v2130_v18, %v2130_v18  ;;  %v1409_v38 = vsel %vm1146_vm2, %v1314_v3, 0.0  ;;  %v1212_v11 = vsel %vm1146_vm2, %v2130_v18, 0.0 }
 0x16e   :  { %v1404_v51 = vadd.f32 %v1403_v50, %v1402_v45  ;;  %1143 = vst.msk [vmem:[%s2742_s2 + $0xf4] sm:$0xf] %vm1081_vm1, %v1722_v48  ;;  %v1316_v41 = vmul.f32 %v2154_v31, %v2154_v31  ;;  %v1214_v48 = vsel %vm1146_vm2, %v2154_v31, 0.0  ;;  %v1317_v50 = vmul.f32 %v2159_v40, %v2159_v40 }
 0x16f   :  { %v1216_v18 = vsel %vm1146_vm2, %v2159_v40, 0.0  ;;  %v1218_v31 = vsel %vm1146_vm2, %v2182_v53, 0.0  ;;  %v1220_v40 = vsel %vm1146_vm2, %v2187_v62, 0.0 }
 0x170   :  { %v690_v55 = vpop.f32.mrb[60].mxu0  ;;  %v2546_v56 = vpop.f32.mrb[60].mxu1 }
 0x171   :  { %v1691_v57 = vpack.c.bf16 %v690_v55, %v690_v55  ;;  %v1206_v61 = vsel %vm1146_vm2, %v690_v55, 0.0  ;;  %v1312_v63 = vmul.f32 %v690_v55, %v690_v55  ;;  %v692_v0 = vpop.f32.mrb[61].mxu0  ;;  %v1723_v1 = vpack.c.bf16 %v2546_v56, %v2546_v56  ;;  %v820_v2 = vpop.f32.mrb[61].mxu1 }
 0x172   :  { %v1207_v4 = vadd.f32 %v1206_v61, %v1205_v47  ;;  %v693_v5 = vpop.f32.mrb[62].mxu0  ;;  %v2553_v9 = vpop.f32.mrb[62].mxu1  ;;  %v1411_v47 = vsel %vm1146_vm2, %v1315_v30, 0.0  ;;  %v1318_v61 = vmul.f32 %v2182_v53, %v2182_v53  ;;  %v1319_v2 = vmul.f32 %v2187_v62, %v2187_v62 }
 0x173   :  { %1112 = vst.msk [vmem:[%s2742_s2 + $0x78] sm:$0xf] %vm1081_vm1, %v1691_v57  ;;  %v1405_v10 = vsel %vm1146_vm2, %v1312_v63, 0.0  ;;  %v1692_v14 = vpack.c.bf16 %v693_v5, %v693_v5  ;;  %v1208_v15 = vsel %vm1146_vm2, %v693_v5, 0.0  ;;  %v1313_v17 = vmul.f32 %v693_v5, %v693_v5  ;;  %v695_v19 = vpop.f32.mrb[63].mxu0  ;;  %v823_v21 = vpop.f32.mrb[63].mxu1 }
 0x174   :  { %1144 = vst.msk [vmem:[%s2742_s2 + $0xf8] sm:$0xf] %vm1081_vm1, %v1723_v1  ;;  %v1406_v26 = vadd.f32 %v1405_v10, %v1404_v51  ;;  %v1209_v27 = vadd.f32 %v1208_v15, %v1207_v4  ;;  %v1724_v28 = vpack.c.bf16 %v2553_v9, %v2553_v9  ;;  %v1413_v57 = vsel %vm1146_vm2, %v1316_v41, 0.0 }
 0x175   :  { %1113 = vst.msk [vmem:[%s2742_s2 + $0x7c] sm:$0xf] %vm1081_vm1, %v1692_v14  ;;  %v1407_v34 = vsel %vm1146_vm2, %v1313_v17, 0.0  ;;  %v1415_v1 = vsel %vm1146_vm2, %v1317_v50, 0.0  ;;  %v1417_v5 = vsel %vm1146_vm2, %v1318_v61, 0.0  ;;  %v1320_v10 = vmul.f32 %v2210_v12, %v2210_v12 }
 0x176   :  { %v1211_v35 = vadd.f32 %v1210_v29, %v1209_v27  ;;  %v1408_v37 = vadd.f32 %v1407_v34, %v1406_v26  ;;  %1145 = vst.msk [vmem:[%s2742_s2 + $0xfc] sm:$0xf] %vm1081_vm1, %v1724_v28  ;;  %v1419_v17 = vsel %vm1146_vm2, %v1319_v2, 0.0  ;;  %v1222_v53 = vsel %vm1146_vm2, %v2210_v12, 0.0 }
 0x177   :  { %v1321_v19 = vmul.f32 %v2215_v22, %v2215_v22  ;;  %v1421_v27 = vsel %vm1146_vm2, %v1320_v10, 0.0  ;;  %v1224_v62 = vsel %vm1146_vm2, %v2215_v22, 0.0  ;;  %v1322_v28 = vmul.f32 %v2238_v36, %v2238_v36 }
 0x178   :  { %v1213_v43 = vadd.f32 %v1212_v11, %v1211_v35  ;;  %v1410_v45 = vadd.f32 %v1409_v38, %v1408_v37  ;;  %v1226_v12 = vsel %vm1146_vm2, %v2238_v36, 0.0  ;;  %v1323_v35 = vmul.f32 %v2243_v46, %v2243_v46 }
 0x179   :  { %v1423_v34 = vsel %vm1146_vm2, %v1321_v19, 0.0  ;;  %v1425_v11 = vsel %vm1146_vm2, %v1322_v28, 0.0  ;;  %v1228_v22 = vsel %vm1146_vm2, %v2243_v46, 0.0  ;;  %v1324_v41 = vmul.f32 %v2266_v60, %v2266_v60 }
 0x17a   :  { %v1215_v51 = vadd.f32 %v1214_v48, %v1213_v43  ;;  %v1412_v55 = vadd.f32 %v1411_v47, %v1410_v45  ;;  %v1427_v47 = vsel %vm1146_vm2, %v1323_v35, 0.0  ;;  %v1230_v36 = vsel %vm1146_vm2, %v2266_v60, 0.0 }
 0x17b   :  { %v1325_v48 = vmul.f32 %v2271_v6, %v2271_v6  ;;  %v1232_v46 = vsel %vm1146_vm2, %v2271_v6, 0.0  ;;  %v1234_v60 = vsel %vm1146_vm2, %v2294_v23, 0.0  ;;  %v1236_v6 = vsel %vm1146_vm2, %v2299_v33, 0.0 }
 0x17c   :  { %v1217_v63 = vadd.f32 %v1216_v18, %v1215_v51  ;;  %v1414_v0 = vadd.f32 %v1413_v57, %v1412_v55  ;;  %v1429_v55 = vsel %vm1146_vm2, %v1324_v41, 0.0  ;;  %v1326_v57 = vmul.f32 %v2294_v23, %v2294_v23 }
 0x17d   :  { %v1238_v23 = vsel %vm1146_vm2, %v2322_v49, 0.0  ;;  %v1329_v10 = vmul.f32 %v2327_v59, %v2327_v59  ;;  %v1334_v41 = vmul.f32 %v2406_v7, %v2406_v7 }
 0x17e   :  { %v1219_v3 = vadd.f32 %v1218_v31, %v1217_v63  ;;  %v1416_v4 = vadd.f32 %v1415_v1, %v1414_v0  ;;  %v1431_v63 = vsel %vm1146_vm2, %v1325_v48, 0.0  ;;  %v1327_v0 = vmul.f32 %v2299_v33, %v2299_v33 }
 0x17f   :  { %v1433_v2 = vsel %vm1146_vm2, %v1326_v57, 0.0  ;;  %v1240_v33 = vsel %vm1146_vm2, %v2327_v59, 0.0  ;;  %v1244_v59 = vsel %vm1146_vm2, %v2355_v25, 0.0 }
 0x180   :  { %v1221_v14 = vadd.f32 %v1220_v40, %v1219_v3  ;;  %v1418_v15 = vadd.f32 %v1417_v5, %v1416_v4  ;;  %v1328_v3 = vmul.f32 %v2322_v49, %v2322_v49  ;;  %v1435_v40 = vsel %vm1146_vm2, %v1327_v0, 0.0 }
 0x181   :  { %v1242_v49 = vsel %vm1146_vm2, %v2350_v13, 0.0 }
 0x182   :  { %v1223_v21 = vadd.f32 %v1222_v53, %v1221_v14  ;;  %v1420_v26 = vadd.f32 %v1419_v17, %v1418_v15  ;;  %v1437_v17 = vsel %vm1146_vm2, %v1328_v3, 0.0  ;;  %v1330_v53 = vmul.f32 %v2350_v13, %v2350_v13 }
 0x183   :  { %v1246_v13 = vsel %vm1146_vm2, %v2378_v42, 0.0  ;;  %v1339_v3 = vmul.f32 %v2467_v24, %v2467_v24 }
 0x184   :  { %v1225_v29 = vadd.f32 %v1224_v62, %v1223_v21  ;;  %v1422_v30 = vadd.f32 %v1421_v27, %v1420_v26  ;;  %v1439_v26 = vsel %vm1146_vm2, %v1329_v10, 0.0  ;;  %v1331_v27 = vmul.f32 %v2355_v25, %v2355_v25 }
 0x185   :  { %v1248_v25 = vsel %vm1146_vm2, %v2383_v54, 0.0 }
 0x186   :  { %v1424_v37 = vadd.f32 %v1423_v34, %v1422_v30  ;;  %v1227_v38 = vadd.f32 %v1226_v12, %v1225_v29  ;;  %v1441_v29 = vsel %vm1146_vm2, %v1330_v53, 0.0  ;;  %v1332_v30 = vmul.f32 %v2378_v42, %v2378_v42 }
 0x187   :  { %v1443_v35 = vsel %vm1146_vm2, %v1331_v27, 0.0  ;;  %v1250_v42 = vsel %vm1146_vm2, %v2406_v7, 0.0  ;;  %v1254_v7 = vsel %vm1146_vm2, %v2434_v39, 0.0 }
 0x188   :  { %v1229_v43 = vadd.f32 %v1228_v22, %v1227_v38  ;;  %v1426_v45 = vadd.f32 %v1425_v11, %v1424_v37  ;;  %v1333_v37 = vmul.f32 %v2383_v54, %v2383_v54  ;;  %v1445_v22 = vsel %vm1146_vm2, %v1332_v30, 0.0 }
 0x189   :  { %v1252_v54 = vsel %vm1146_vm2, %v2411_v20, 0.0  ;;  %v1268_v30 = vsel %vm1146_vm2, %v2523_v32, 0.0 }
 0x18a   :  { %v1231_v50 = vadd.f32 %v1230_v36, %v1229_v43  ;;  %v1428_v51 = vadd.f32 %v1427_v47, %v1426_v45  ;;  %v1447_v47 = vsel %vm1146_vm2, %v1333_v37, 0.0  ;;  %v1335_v36 = vmul.f32 %v2411_v20, %v2411_v20 }
 0x18b   :  { %v1256_v20 = vsel %vm1146_vm2, %v2439_v52, 0.0  ;;  %v1345_v37 = vmul.f32 %v2553_v9, %v2553_v9 }
 0x18c   :  { %v1233_v18 = vadd.f32 %v1232_v46, %v1231_v50  ;;  %v1430_v61 = vadd.f32 %v1429_v55, %v1428_v51  ;;  %v1449_v51 = vsel %vm1146_vm2, %v1334_v41, 0.0  ;;  %v1336_v55 = vmul.f32 %v2434_v39, %v2434_v39 }
 0x18d   :  { %v1258_v39 = vsel %vm1146_vm2, %v2462_v8, 0.0 }
 0x18e   :  { %v1235_v1 = vadd.f32 %v1234_v60, %v1233_v18  ;;  %v1432_v31 = vadd.f32 %v1431_v63, %v1430_v61  ;;  %v1451_v18 = vsel %vm1146_vm2, %v1335_v36, 0.0  ;;  %v1337_v61 = vmul.f32 %v2439_v52, %v2439_v52 }
 0x18f   :  { %v1453_v0 = vsel %vm1146_vm2, %v1336_v55, 0.0  ;;  %v1260_v52 = vsel %vm1146_vm2, %v2467_v24, 0.0  ;;  %v1264_v24 = vsel %vm1146_vm2, %v2495_v58, 0.0 }
 0x190   :  { %v1237_v4 = vadd.f32 %v1236_v6, %v1235_v1  ;;  %v1434_v5 = vadd.f32 %v1433_v2, %v1432_v31  ;;  %v1338_v1 = vmul.f32 %v2462_v8, %v2462_v8  ;;  %v1455_v6 = vsel %vm1146_vm2, %v1337_v61, 0.0 }
 0x191   :  { %v1262_v8 = vsel %vm1146_vm2, %v2490_v44, 0.0 }
 0x192   :  { %v1239_v14 = vadd.f32 %v1238_v23, %v1237_v4  ;;  %v1436_v15 = vadd.f32 %v1435_v40, %v1434_v5  ;;  %v1457_v40 = vsel %vm1146_vm2, %v1338_v1, 0.0  ;;  %v1340_v23 = vmul.f32 %v2490_v44, %v2490_v44 }
 0x193   :  { %v1266_v44 = vsel %vm1146_vm2, %v2518_v16, 0.0 }
 0x194   :  { %v1241_v19 = vadd.f32 %v1240_v33, %v1239_v14  ;;  %v1438_v21 = vadd.f32 %v1437_v17, %v1436_v15  ;;  %v1459_v15 = vsel %vm1146_vm2, %v1339_v3, 0.0  ;;  %v1341_v17 = vmul.f32 %v2495_v58, %v2495_v58 }
 0x196   :  { %v1243_v62 = vadd.f32 %v1242_v49, %v1241_v19  ;;  %v1440_v28 = vadd.f32 %v1439_v26, %v1438_v21  ;;  %v1461_v19 = vsel %vm1146_vm2, %v1340_v23, 0.0  ;;  %v1342_v21 = vmul.f32 %v2518_v16, %v2518_v16 }
 0x197   :  { %v1463_v27 = vsel %vm1146_vm2, %v1341_v17, 0.0 }
 0x198   :  { %v1442_v34 = vadd.f32 %v1441_v29, %v1440_v28  ;;  %v1245_v12 = vadd.f32 %v1244_v59, %v1243_v62  ;;  %v1343_v62 = vmul.f32 %v2523_v32, %v2523_v32  ;;  %v1344_v28 = vmul.f32 %v2546_v56, %v2546_v56 }
 0x199   :  { %v1465_v58 = vsel %vm1146_vm2, %v1342_v21, 0.0  ;;  %v1471_v32 = vsel %vm1146_vm2, %v1345_v37, 0.0 }
 0x19a   :  { %v1444_v38 = vadd.f32 %v1443_v35, %v1442_v34  ;;  %v1247_v11 = vadd.f32 %v1246_v13, %v1245_v12  ;;  %v1270_v34 = vsel %vm1146_vm2, %v2546_v56, 0.0  ;;  %v1467_v16 = vsel %vm1146_vm2, %v1343_v62, 0.0 }
 0x19b   :  { %v1469_v13 = vsel %vm1146_vm2, %v1344_v28, 0.0 }
 0x19c   :  { %v1446_v43 = vadd.f32 %v1445_v22, %v1444_v38  ;;  %v1249_v45 = vadd.f32 %v1248_v25, %v1247_v11  ;;  %v1272_v22 = vsel %vm1146_vm2, %v2553_v9, 0.0 }
 0x19e   :  { %v1448_v48 = vadd.f32 %v1447_v47, %v1446_v43  ;;  %v1251_v50 = vadd.f32 %v1250_v42, %v1249_v45 }
 0x1a0   :  { %v1450_v46 = vadd.f32 %v1449_v51, %v1448_v48  ;;  %v1253_v57 = vadd.f32 %v1252_v54, %v1251_v50 }
 0x1a2   :  { %v1452_v63 = vadd.f32 %v1451_v18, %v1450_v46  ;;  %v1255_v60 = vadd.f32 %v1254_v7, %v1253_v57 }
 0x1a4   :  { %v1454_v31 = vadd.f32 %v1453_v0, %v1452_v63  ;;  %v1257_v2 = vadd.f32 %v1256_v20, %v1255_v60 }
 0x1a6   :  { %v1456_v4 = vadd.f32 %v1455_v6, %v1454_v31  ;;  %v1259_v5 = vadd.f32 %v1258_v39, %v1257_v2 }
 0x1a8   :  { %v1458_v10 = vadd.f32 %v1457_v40, %v1456_v4  ;;  %v1261_v14 = vadd.f32 %v1260_v52, %v1259_v5 }
 0x1aa   :  { %v1460_v33 = vadd.f32 %v1459_v15, %v1458_v10  ;;  %v1263_v53 = vadd.f32 %v1262_v8, %v1261_v14 }
 0x1ac   :  { %v1462_v26 = vadd.f32 %v1461_v19, %v1460_v33  ;;  %v1265_v49 = vadd.f32 %v1264_v24, %v1263_v53 }
 0x1ae   :  { %v1464_v29 = vadd.f32 %v1463_v27, %v1462_v26  ;;  %v1267_v59 = vadd.f32 %v1266_v44, %v1265_v49 }
 0x1b0   :  { %v1466_v12 = vadd.f32 %v1465_v58, %v1464_v29  ;;  %v1269_v35 = vadd.f32 %v1268_v30, %v1267_v59 }
 0x1b2   :  { %v1468_v38 = vadd.f32 %v1467_v16, %v1466_v12  ;;  %v1271_v11 = vadd.f32 %v1270_v34, %v1269_v35 }
 0x1b4   :  { %v1470_v25 = vadd.f32 %v1469_v13, %v1468_v38  ;;  %v1273_v41 = vadd.f32 %v1272_v22, %v1271_v11 }
 0x1b6   :  { %v1274_v43 = vrot.slane %v1273_v41, 4  ;;  %v1472_v56 = vadd.f32 %v1471_v32, %v1470_v25 }
 0x1b8   :  { %v1275_v45 = vadd.f32 %v1274_v43, %v1273_v41  ;;  %v1473_v47 = vrot.slane %v1472_v56, 4 }
 0x1ba   :  { %v1276_v42 = vrot.slane %v1275_v45, 2  ;;  %v1474_v36 = vadd.f32 %v1473_v47, %v1472_v56 }
 0x1bc   :  { %v1277_v48 = vadd.f32 %v1276_v42, %v1275_v45  ;;  %v1475_v50 = vrot.slane %v1474_v36, 2 }
 0x1be   :  { %v1278_v51 = vrot.slane %v1277_v48, 1  ;;  %v1476_v54 = vadd.f32 %v1475_v50, %v1474_v36 }
 0x1c0   :  { %v1279_v55 = vadd.f32 %v1278_v51, %v1277_v48  ;;  %v1477_v46 = vrot.slane %v1476_v54, 1 }
 0x1c2   :  { %1281 = vst.msk [vmem:[%s2743_s3] sm:$0x1] %vm1280_vm3, %v1279_v55  ;;  %v1478_v9 = vadd.f32 %v1477_v46, %v1476_v54 }
 0x1c4   :  { %1479 = vst.msk [vmem:[%s2744_s4] sm:$0x1] %vm1280_vm3, %v1478_v9 }

// kernel: generator_forward.9
= control target key start
LH: loop header
LB: loop body
LE: loop exit
PB: predicated region body
PF: predicated region fallthrough
CT: control target
= control target key end

     0   :  { %s1382_s9 = smov 0   ;;  %s1614_s0 = inlined_call_operand.vmem [shape: bf16[2048,72], index: 0, kind: input, shape index: {}]   ;;  %s1615_s1 = inlined_call_operand.vmem [shape: bf16[72,12], index: 1, kind: input, shape index: {}]   ;;  %s1616_s2 = inlined_call_operand.vmem [shape: f32[2048,12], index: 2, kind: output, shape index: {}]  }
   0x1 LB: > { %s983_s10 = sadd.s32 4294967295, %s1365_s9   ;;  %p987_p0 = scmp.ge.s32.totalorder %s1365_s9, 1  ;;  %s1365_s9 = sphi %s1382_s9, %s12_s9  }
   0x2   : > { %p113_p1 = scmp.lt.s32.totalorder %s1365_s9, 5 }
   0x4   : > { %p114_p2 = pnand %p987_p0, %p113_p1 }
   0x5   : > { %v1194_v0 = vld [vmem:[%s1615_s1] sm:$0xff] (!%p114_p2)   ;;  %v1195_v1 = vld [vmem:[%s1615_s1 + $0x8] sm:$0xff] (!%p114_p2)   ;;  %s988_s15 = sshll.u32 (!%p114_p2), %s983_s10, 6  ;;  %v1196_v2 = vld [vmem:[%s1615_s1 + $0x10] sm:$0xff] (!%p114_p2)   ;;  %vm408_vm0 = vcmask (!%p114_p2), 588800   ;;  %vm505_vm1 = vcmask (!%p114_p2), 1043456  }
   0x6   : > { %117 = sbr.rel (%p114_p2) target bundleno = 316 (0x13c), region = 28  ;;  %1100 = vmatprep.subr.bf16.mxu0 (!%p114_p2), %v1194_v0  ;;  %1174 = vmatprep.subr.bf16.mxu1 (!%p114_p2), %v1194_v0  ;;  %p136_p3 = scmp.lt.s32.totalorder (!%p114_p2), %s988_s15, 255  ;;  %v1197_v3 = vld [vmem:[%s1615_s1 + $0x18] sm:$0xff] (!%p114_p2)   ;;  %v1198_v6 = vld [vmem:[%s1615_s1 + $0x20] ss:$0 sps:$4 sm:$0xff] (!%p114_p2)   ;;  %vm862_vm2 = vcmask (!%p114_p2), 97280  }
   0x7   : > { %1101 = vmatpush3.bf16.msra.mxu0 (!%p114_p2), %v1194_v0  ;;  %1179 = vmatpush3.bf16.msra.mxu1 (!%p114_p2), %v1194_v0  ;;  %v507_v7 = vsel (!%p114_p2), %vm505_vm1, %v1198_v6, 0 }
   0x8   : > { %1102 = vmatprep.subr.bf16.mxu0 (!%p114_p2), %v1195_v1  ;;  %1175 = vmatprep.subr.bf16.mxu1 (!%p114_p2), %v1195_v1 }
   0xb   : > { %1103 = vmatpush3.bf16.msra.mxu0 (!%p114_p2), %v1195_v1  ;;  %1180 = vmatpush3.bf16.msra.mxu1 (!%p114_p2), %v1195_v1 }
   0xc   : > { %1104 = vmatprep.subr.bf16.mxu0 (!%p114_p2), %v1196_v2  ;;  %1176 = vmatprep.subr.bf16.mxu1 (!%p114_p2), %v1196_v2 }
   0xd   : > { %s1618_s15 = smov (!%p136_p3, %s988_s15), 255 }
   0xe   : > { %s989_s18 = sshll.u32 %s1618_s15, 2  ;;  %s991_s26 = sshll.u32 %s1618_s15, 3 }
   0xf   : > { %s1408_s23 = scalar_lea.vmem %s1614_s0, %s989_s18  ;;  %1105 = vmatpush3.bf16.msra.mxu0 %v1196_v2  ;;  %1181 = vmatpush3.bf16.msra.mxu1 %v1196_v2  ;;  %s1481_s29 = scalar_lea.vmem %s1616_s2, %s991_s26 }
  0x10   : > { %v1199_v4 = vld [vmem:[%s1408_s23] sm:$0xff]   ;;  %1106 = vmatprep.subr.bf16.mxu0 %v1197_v3  ;;  %1177 = vmatprep.subr.bf16.mxu1 %v1197_v3  ;;  %v1201_v8 = vld [vmem:[%s1408_s23 + $0x8] sm:$0xff]   ;;  %v1203_v10 = vld [vmem:[%s1408_s23 + $0x10] sm:$0xff]  }
  0x11   : > { %v1200_v5 = vld [vmem:[%s1408_s23 + $0x80] sm:$0xff]   ;;  %1110 = vmatprep.mubr.msk.bf16.mxu0 %vm408_vm0, %v1199_v4  ;;  %v1202_v9 = vld [vmem:[%s1408_s23 + $0x88] sm:$0xff]   ;;  %v1204_v11 = vld [vmem:[%s1408_s23 + $0x90] sm:$0xff]  }
  0x12   : > { %1142 = vmatprep.mubr.msk.bf16.mxu1 %vm408_vm0, %v1200_v5  ;;  %v1205_v12 = vld [vmem:[%s1408_s23 + $0x18] sm:$0xff]   ;;  %v1207_v14 = vld [vmem:[%s1408_s23 + $0x20] sm:$0xff]   ;;  %v1209_v16 = vld [vmem:[%s1408_s23 + $0x28] sm:$0xff]  }
  0x13   : > { %1107 = vmatpush3.bf16.msra.mxu0 %v1197_v3  ;;  %1182 = vmatpush3.bf16.msra.mxu1 %v1197_v3  ;;  %v1206_v13 = vld [vmem:[%s1408_s23 + $0x98] sm:$0xff]   ;;  %v1208_v15 = vld [vmem:[%s1408_s23 + $0xa0] sm:$0xff]   ;;  %v1210_v17 = vld [vmem:[%s1408_s23 + $0xa8] sm:$0xff]  }
  0x14   : > { %1184 = vmatprep.subr.msk.bf16.mxu0 %vm505_vm1, %v1198_v6  ;;  %1185 = vmatprep.subr.msk.bf16.mxu1 %vm505_vm1, %v1198_v6  ;;  %v1211_v18 = vld [vmem:[%s1408_s23 + $0x30] sm:$0xff]   ;;  %v1213_v20 = vld [vmem:[%s1408_s23 + $0x38] sm:$0xff]   ;;  %v1215_v22 = vld [vmem:[%s1408_s23 + $0x40] sm:$0xff]  }
  0x15   : > { %v1212_v19 = vld [vmem:[%s1408_s23 + $0xb0] sm:$0xff]   ;;  %v1214_v21 = vld [vmem:[%s1408_s23 + $0xb8] sm:$0xff]   ;;  %v1216_v23 = vld [vmem:[%s1408_s23 + $0xc0] sm:$0xff]  }
  0x16   : > { %v1217_v24 = vld [vmem:[%s1408_s23 + $0x48] sm:$0xff]   ;;  %v1219_v26 = vld [vmem:[%s1408_s23 + $0x50] sm:$0xff]   ;;  %v1221_v28 = vld [vmem:[%s1408_s23 + $0x58] sm:$0xff]  }
  0x17   : > { %1109 = vmatpush3.bf16.msra.mxu0 %v507_v7  ;;  %1183 = vmatpush3.bf16.msra.mxu1 %v507_v7  ;;  %v1218_v25 = vld [vmem:[%s1408_s23 + $0xc8] sm:$0xff]   ;;  %v1220_v27 = vld [vmem:[%s1408_s23 + $0xd0] sm:$0xff]   ;;  %v1222_v29 = vld [vmem:[%s1408_s23 + $0xd8] sm:$0xff]  }
  0x18   : > { %v1223_v30 = vld [vmem:[%s1408_s23 + $0x60] sm:$0xff]   ;;  %v1225_v32 = vld [vmem:[%s1408_s23 + $0x68] sm:$0xff]   ;;  %v1227_v34 = vld [vmem:[%s1408_s23 + $0x70] sm:$0xff]  }
  0x19   : > { %v1224_v31 = vld [vmem:[%s1408_s23 + $0xe0] sm:$0xff]   ;;  %v1226_v33 = vld [vmem:[%s1408_s23 + $0xe8] sm:$0xff]   ;;  %v1228_v35 = vld [vmem:[%s1408_s23 + $0xf0] sm:$0xff]  }
  0x1a   : > { %1111 = vmatmul.mubr.msk.bf16.vlgmr.msra.gmra.mrb[0].mxu0 %vm408_vm0, %v1201_v8  ;;  %1143 = vmatmul.mubr.msk.bf16.vlgmr.msra.gmra.mrb[0].mxu1 %vm408_vm0, %v1202_v9  ;;  %v1229_v36 = vld [vmem:[%s1408_s23 + $0x78] sm:$0xff]  }
  0x1b   : > { %1114 = vmatprep.mubr.msk.bf16.mxu0 %vm408_vm0, %v1203_v10  ;;  %1146 = vmatprep.mubr.msk.bf16.mxu1 %vm408_vm0, %v1204_v11  ;;  %v1230_v37 = vld [vmem:[%s1408_s23 + $0xf8] sm:$0xff]  }
  0x22   : > { %1115 = vmatmul.mubr.msk.bf16.gmra.mrb[4].mxu0 %vm408_vm0, %v1205_v12  ;;  %1147 = vmatmul.mubr.msk.bf16.gmra.mrb[4].mxu1 %vm408_vm0, %v1206_v13 }
  0x23   : > { %1118 = vmatprep.mubr.msk.bf16.mxu0 %vm408_vm0, %v1207_v14  ;;  %1150 = vmatprep.mubr.msk.bf16.mxu1 %vm408_vm0, %v1208_v15 }
  0x2a   : > { %1119 = vmatmul.mubr.msk.bf16.gmra.mrb[8].mxu0 %vm408_vm0, %v1209_v16  ;;  %1151 = vmatmul.mubr.msk.bf16.gmra.mrb[8].mxu1 %vm408_vm0, %v1210_v17 }
  0x2b   : > { %1122 = vmatprep.mubr.msk.bf16.mxu0 %vm408_vm0, %v1211_v18  ;;  %1154 = vmatprep.mubr.msk.bf16.mxu1 %vm408_vm0, %v1212_v19 }
  0x32   : > { %1123 = vmatmul.mubr.msk.bf16.gmra.mrb[12].mxu0 %vm408_vm0, %v1213_v20  ;;  %1155 = vmatmul.mubr.msk.bf16.gmra.mrb[12].mxu1 %vm408_vm0, %v1214_v21 }
  0x33   : > { %1126 = vmatprep.mubr.msk.bf16.mxu0 %vm408_vm0, %v1215_v22  ;;  %1158 = vmatprep.mubr.msk.bf16.mxu1 %vm408_vm0, %v1216_v23 }
  0x3a   : > { %1127 = vmatmul.mubr.msk.bf16.gmra.mrb[16].mxu0 %vm408_vm0, %v1217_v24  ;;  %1159 = vmatmul.mubr.msk.bf16.gmra.mrb[16].mxu1 %vm408_vm0, %v1218_v25 }
  0x3b   : > { %1130 = vmatprep.mubr.msk.bf16.mxu0 %vm408_vm0, %v1219_v26  ;;  %1162 = vmatprep.mubr.msk.bf16.mxu1 %vm408_vm0, %v1220_v27 }
  0x42   : > { %1131 = vmatmul.mubr.msk.bf16.gmra.mrb[20].mxu0 %vm408_vm0, %v1221_v28  ;;  %1163 = vmatmul.mubr.msk.bf16.gmra.mrb[20].mxu1 %vm408_vm0, %v1222_v29 }
  0x43   : > { %1134 = vmatprep.mubr.msk.bf16.mxu0 %vm408_vm0, %v1223_v30  ;;  %1166 = vmatprep.mubr.msk.bf16.mxu1 %vm408_vm0, %v1224_v31 }
  0x4a   : > { %1135 = vmatmul.mubr.msk.bf16.gmra.mrb[24].mxu0 %vm408_vm0, %v1225_v32  ;;  %1167 = vmatmul.mubr.msk.bf16.gmra.mrb[24].mxu1 %vm408_vm0, %v1226_v33 }
  0x4b   : > { %1138 = vmatprep.mubr.msk.bf16.mxu0 %vm408_vm0, %v1227_v34  ;;  %1170 = vmatprep.mubr.msk.bf16.mxu1 %vm408_vm0, %v1228_v35 }
  0x52   : > { %1139 = vmatmul.mubr.msk.bf16.gmra.mrb[28].mxu0 %vm408_vm0, %v1229_v36  ;;  %1171 = vmatmul.mubr.msk.bf16.gmra.mrb[28].mxu1 %vm408_vm0, %v1230_v37 }
  0xed   : > { %v1112_v38 = vpop.f32.mrb[0].mxu0  ;;  %v1144_v39 = vpop.f32.mrb[0].mxu1 }
  0xee   : > { %1231 = vtanh.f32 %v1112_v38  ;;  %v543_v40 = vpop.f32.mrb[1].mxu0  ;;  %v671_v41 = vpop.f32.mrb[1].mxu1 }
  0xef   : > { %1233 = vtanh.f32 %v1144_v39  ;;  %v1113_v42 = vpop.f32.mrb[2].mxu0  ;;  %v1145_v43 = vpop.f32.mrb[2].mxu1 }
  0xf0   : > { %1235 = vtanh.f32 %v543_v40  ;;  %v546_v44 = vpop.f32.mrb[3].mxu0  ;;  %v674_v45 = vpop.f32.mrb[3].mxu1 }
  0xf1   : > { %1237 = vtanh.f32 %v671_v41 }
  0xf2   : > { %1239 = vtanh.f32 %v1113_v42 }
  0xf3   : > { %1241 = vtanh.f32 %v1145_v43 }
  0xf4   : > { %1243 = vtanh.f32 %v546_v44 }
  0xf5   : > { %1245 = vtanh.f32 %v674_v45  ;;  %v1116_v46 = vpop.f32.mrb[4].mxu0  ;;  %v1148_v47 = vpop.f32.mrb[4].mxu1 }
  0xf6   : > { %1247 = vtanh.f32 %v1116_v46  ;;  %v559_v48 = vpop.f32.mrb[5].mxu0  ;;  %v687_v49 = vpop.f32.mrb[5].mxu1 }
  0xf7   : > { %1249 = vtanh.f32 %v1148_v47  ;;  %v1117_v50 = vpop.f32.mrb[6].mxu0  ;;  %v1149_v51 = vpop.f32.mrb[6].mxu1 }
  0xf8   : > { %v1232_v52 = vpop.eup %1231  ;;  %1251 = vtanh.f32 %v559_v48  ;;  %v562_v53 = vpop.f32.mrb[7].mxu0 }
  0xf9   : > { %v690_v54 = vpop.f32.mrb[7].mxu1  ;;  %v1234_v55 = vpop.eup %1233  ;;  %865 = vst.msk [vmem:[%s1481_s29 + $0x10] sm:$0xff] %vm862_vm2, %v1232_v52  ;;  %1253 = vtanh.f32 %v687_v49 }
  0xfa   : > { %v1236_v56 = vpop.eup %1235  ;;  %897 = vst.msk [vmem:[%s1481_s29 + $0x110] sm:$0xff] %vm862_vm2, %v1234_v55  ;;  %1255 = vtanh.f32 %v1117_v50 }
  0xfb   : > { %v1238_v57 = vpop.eup %1237  ;;  %863 = vst.msk [vmem:[%s1481_s29] sm:$0xff] %vm862_vm2, %v1236_v56  ;;  %1257 = vtanh.f32 %v1149_v51 }
  0xfc   : > { %v1240_v58 = vpop.eup %1239  ;;  %895 = vst.msk [vmem:[%s1481_s29 + $0x100] sm:$0xff] %vm862_vm2, %v1238_v57  ;;  %1259 = vtanh.f32 %v562_v53 }
  0xfd   : > { %v1242_v59 = vpop.eup %1241  ;;  %866 = vst.msk [vmem:[%s1481_s29 + $0x18] sm:$0xff] %vm862_vm2, %v1240_v58  ;;  %1261 = vtanh.f32 %v690_v54  ;;  %v1120_v60 = vpop.f32.mrb[8].mxu0 }
  0xfe   : > { %v1152_v61 = vpop.f32.mrb[8].mxu1  ;;  %v1244_v62 = vpop.eup %1243  ;;  %898 = vst.msk [vmem:[%s1481_s29 + $0x118] sm:$0xff] %vm862_vm2, %v1242_v59  ;;  %1263 = vtanh.f32 %v1120_v60 }
  0xff   : > { %v575_v63 = vpop.f32.mrb[9].mxu0  ;;  %v703_v0 = vpop.f32.mrb[9].mxu1  ;;  %864 = vst.msk [vmem:[%s1481_s29 + $0x8] sm:$0xff] %vm862_vm2, %v1244_v62  ;;  %1265 = vtanh.f32 %v1152_v61 }
 0x100   : > { %v1246_v1 = vpop.eup %1245  ;;  %v1121_v2 = vpop.f32.mrb[10].mxu0  ;;  %1267 = vtanh.f32 %v575_v63 }
 0x101   : > { %v1153_v3 = vpop.f32.mrb[10].mxu1  ;;  %v1248_v4 = vpop.eup %1247  ;;  %896 = vst.msk [vmem:[%s1481_s29 + $0x108] sm:$0xff] %vm862_vm2, %v1246_v1  ;;  %1269 = vtanh.f32 %v703_v0 }
 0x102   : > { %v578_v5 = vpop.f32.mrb[11].mxu0  ;;  %v706_v6 = vpop.f32.mrb[11].mxu1  ;;  %869 = vst.msk [vmem:[%s1481_s29 + $0x30] sm:$0xff] %vm862_vm2, %v1248_v4  ;;  %1271 = vtanh.f32 %v1121_v2 }
 0x103   : > { %v1250_v7 = vpop.eup %1249  ;;  %1273 = vtanh.f32 %v1153_v3 }
 0x104   : > { %v1252_v8 = vpop.eup %1251  ;;  %901 = vst.msk [vmem:[%s1481_s29 + $0x130] sm:$0xff] %vm862_vm2, %v1250_v7  ;;  %1275 = vtanh.f32 %v578_v5 }
 0x105   : > { %v1254_v9 = vpop.eup %1253  ;;  %867 = vst.msk [vmem:[%s1481_s29 + $0x20] sm:$0xff] %vm862_vm2, %v1252_v8  ;;  %1277 = vtanh.f32 %v706_v6  ;;  %v1124_v12 = vpop.f32.mrb[12].mxu0 }
 0x106   : > { %v1256_v10 = vpop.eup %1255  ;;  %899 = vst.msk [vmem:[%s1481_s29 + $0x120] sm:$0xff] %vm862_vm2, %v1254_v9  ;;  %v1156_v13 = vpop.f32.mrb[12].mxu1  ;;  %1279 = vtanh.f32 %v1124_v12 }
 0x107   : > { %v1258_v11 = vpop.eup %1257  ;;  %870 = vst.msk [vmem:[%s1481_s29 + $0x38] sm:$0xff] %vm862_vm2, %v1256_v10  ;;  %v591_v15 = vpop.f32.mrb[13].mxu0  ;;  %1281 = vtanh.f32 %v1156_v13 }
 0x108   : > { %v1260_v14 = vpop.eup %1259  ;;  %902 = vst.msk [vmem:[%s1481_s29 + $0x138] sm:$0xff] %vm862_vm2, %v1258_v11  ;;  %v719_v16 = vpop.f32.mrb[13].mxu1  ;;  %1283 = vtanh.f32 %v591_v15 }
 0x109   : > { %v1262_v17 = vpop.eup %1261  ;;  %868 = vst.msk [vmem:[%s1481_s29 + $0x28] sm:$0xff] %vm862_vm2, %v1260_v14  ;;  %v1125_v18 = vpop.f32.mrb[14].mxu0  ;;  %1285 = vtanh.f32 %v719_v16 }
 0x10a   : > { %v1157_v19 = vpop.f32.mrb[14].mxu1  ;;  %v1264_v20 = vpop.eup %1263  ;;  %900 = vst.msk [vmem:[%s1481_s29 + $0x128] sm:$0xff] %vm862_vm2, %v1262_v17  ;;  %1287 = vtanh.f32 %v1125_v18 }
 0x10b   : > { %v594_v21 = vpop.f32.mrb[15].mxu0  ;;  %v722_v22 = vpop.f32.mrb[15].mxu1  ;;  %873 = vst.msk [vmem:[%s1481_s29 + $0x50] sm:$0xff] %vm862_vm2, %v1264_v20  ;;  %1289 = vtanh.f32 %v1157_v19 }
 0x10c   : > { %v1266_v23 = vpop.eup %1265  ;;  %1291 = vtanh.f32 %v594_v21 }
 0x10d   : > { %v1268_v24 = vpop.eup %1267  ;;  %905 = vst.msk [vmem:[%s1481_s29 + $0x150] sm:$0xff] %vm862_vm2, %v1266_v23  ;;  %1293 = vtanh.f32 %v722_v22  ;;  %v1128_v28 = vpop.f32.mrb[16].mxu0 }
 0x10e   : > { %v1270_v25 = vpop.eup %1269  ;;  %871 = vst.msk [vmem:[%s1481_s29 + $0x40] sm:$0xff] %vm862_vm2, %v1268_v24  ;;  %v1160_v29 = vpop.f32.mrb[16].mxu1  ;;  %1295 = vtanh.f32 %v1128_v28 }
 0x10f   : > { %v1272_v26 = vpop.eup %1271  ;;  %903 = vst.msk [vmem:[%s1481_s29 + $0x140] sm:$0xff] %vm862_vm2, %v1270_v25  ;;  %v607_v31 = vpop.f32.mrb[17].mxu0  ;;  %1297 = vtanh.f32 %v1160_v29 }
 0x110   : > { %v1274_v27 = vpop.eup %1273  ;;  %874 = vst.msk [vmem:[%s1481_s29 + $0x58] sm:$0xff] %vm862_vm2, %v1272_v26  ;;  %v735_v32 = vpop.f32.mrb[17].mxu1  ;;  %1299 = vtanh.f32 %v607_v31 }
 0x111   : > { %v1276_v30 = vpop.eup %1275  ;;  %906 = vst.msk [vmem:[%s1481_s29 + $0x158] sm:$0xff] %vm862_vm2, %v1274_v27  ;;  %v1129_v34 = vpop.f32.mrb[18].mxu0  ;;  %1301 = vtanh.f32 %v735_v32 }
 0x112   : > { %v1278_v33 = vpop.eup %1277  ;;  %872 = vst.msk [vmem:[%s1481_s29 + $0x48] sm:$0xff] %vm862_vm2, %v1276_v30  ;;  %v1161_v35 = vpop.f32.mrb[18].mxu1  ;;  %1303 = vtanh.f32 %v1129_v34 }
 0x113   : > { %v1280_v36 = vpop.eup %1279  ;;  %904 = vst.msk [vmem:[%s1481_s29 + $0x148] sm:$0xff] %vm862_vm2, %v1278_v33  ;;  %v610_v37 = vpop.f32.mrb[19].mxu0  ;;  %1305 = vtanh.f32 %v1161_v35 }
 0x114   : > { %v738_v38 = vpop.f32.mrb[19].mxu1  ;;  %v1282_v39 = vpop.eup %1281  ;;  %877 = vst.msk [vmem:[%s1481_s29 + $0x70] sm:$0xff] %vm862_vm2, %v1280_v36  ;;  %1307 = vtanh.f32 %v610_v37 }
 0x115   : > { %v1284_v40 = vpop.eup %1283  ;;  %909 = vst.msk [vmem:[%s1481_s29 + $0x170] sm:$0xff] %vm862_vm2, %v1282_v39  ;;  %1309 = vtanh.f32 %v738_v38  ;;  %v1132_v44 = vpop.f32.mrb[20].mxu0 }
 0x116   : > { %v1286_v41 = vpop.eup %1285  ;;  %875 = vst.msk [vmem:[%s1481_s29 + $0x60] sm:$0xff] %vm862_vm2, %v1284_v40  ;;  %v1164_v45 = vpop.f32.mrb[20].mxu1  ;;  %1311 = vtanh.f32 %v1132_v44 }
 0x117   : > { %v1288_v42 = vpop.eup %1287  ;;  %907 = vst.msk [vmem:[%s1481_s29 + $0x160] sm:$0xff] %vm862_vm2, %v1286_v41  ;;  %v623_v47 = vpop.f32.mrb[21].mxu0  ;;  %1313 = vtanh.f32 %v1164_v45 }
 0x118   : > { %v1290_v43 = vpop.eup %1289  ;;  %878 = vst.msk [vmem:[%s1481_s29 + $0x78] sm:$0xff] %vm862_vm2, %v1288_v42  ;;  %v751_v48 = vpop.f32.mrb[21].mxu1  ;;  %1315 = vtanh.f32 %v623_v47 }
 0x119   : > { %v1292_v46 = vpop.eup %1291  ;;  %910 = vst.msk [vmem:[%s1481_s29 + $0x178] sm:$0xff] %vm862_vm2, %v1290_v43  ;;  %v1133_v50 = vpop.f32.mrb[22].mxu0  ;;  %1317 = vtanh.f32 %v751_v48 }
 0x11a   : > { %v1294_v49 = vpop.eup %1293  ;;  %876 = vst.msk [vmem:[%s1481_s29 + $0x68] sm:$0xff] %vm862_vm2, %v1292_v46  ;;  %v1165_v51 = vpop.f32.mrb[22].mxu1  ;;  %1319 = vtanh.f32 %v1133_v50 }
 0x11b   : > { %v1296_v52 = vpop.eup %1295  ;;  %908 = vst.msk [vmem:[%s1481_s29 + $0x168] sm:$0xff] %vm862_vm2, %v1294_v49  ;;  %v626_v53 = vpop.f32.mrb[23].mxu0  ;;  %1321 = vtanh.f32 %v1165_v51 }
 0x11c   : > { %v754_v54 = vpop.f32.mrb[23].mxu1  ;;  %v1298_v55 = vpop.eup %1297  ;;  %881 = vst.msk [vmem:[%s1481_s29 + $0x90] sm:$0xff] %vm862_vm2, %v1296_v52  ;;  %1323 = vtanh.f32 %v626_v53 }
 0x11d   : > { %v1300_v56 = vpop.eup %1299  ;;  %913 = vst.msk [vmem:[%s1481_s29 + $0x190] sm:$0xff] %vm862_vm2, %v1298_v55  ;;  %1325 = vtanh.f32 %v754_v54  ;;  %v1136_v60 = vpop.f32.mrb[24].mxu0 }
 0x11e   : > { %v1302_v57 = vpop.eup %1301  ;;  %879 = vst.msk [vmem:[%s1481_s29 + $0x80] sm:$0xff] %vm862_vm2, %v1300_v56  ;;  %v1168_v61 = vpop.f32.mrb[24].mxu1  ;;  %1327 = vtanh.f32 %v1136_v60 }
 0x11f   : > { %v1304_v58 = vpop.eup %1303  ;;  %911 = vst.msk [vmem:[%s1481_s29 + $0x180] sm:$0xff] %vm862_vm2, %v1302_v57  ;;  %v639_v63 = vpop.f32.mrb[25].mxu0  ;;  %1329 = vtanh.f32 %v1168_v61 }
 0x120   : > { %v1306_v59 = vpop.eup %1305  ;;  %882 = vst.msk [vmem:[%s1481_s29 + $0x98] sm:$0xff] %vm862_vm2, %v1304_v58  ;;  %v767_v0 = vpop.f32.mrb[25].mxu1  ;;  %1331 = vtanh.f32 %v639_v63 }
 0x121   : > { %v1308_v62 = vpop.eup %1307  ;;  %914 = vst.msk [vmem:[%s1481_s29 + $0x198] sm:$0xff] %vm862_vm2, %v1306_v59  ;;  %v1137_v2 = vpop.f32.mrb[26].mxu0  ;;  %1333 = vtanh.f32 %v767_v0 }
 0x122   : > { %v1310_v1 = vpop.eup %1309  ;;  %880 = vst.msk [vmem:[%s1481_s29 + $0x88] sm:$0xff] %vm862_vm2, %v1308_v62  ;;  %v1169_v3 = vpop.f32.mrb[26].mxu1  ;;  %1335 = vtanh.f32 %v1137_v2 }
 0x123   : > { %v1312_v4 = vpop.eup %1311  ;;  %912 = vst.msk [vmem:[%s1481_s29 + $0x188] sm:$0xff] %vm862_vm2, %v1310_v1  ;;  %v642_v5 = vpop.f32.mrb[27].mxu0  ;;  %1337 = vtanh.f32 %v1169_v3 }
 0x124   : > { %v770_v6 = vpop.f32.mrb[27].mxu1  ;;  %v1314_v7 = vpop.eup %1313  ;;  %885 = vst.msk [vmem:[%s1481_s29 + $0xb0] sm:$0xff] %vm862_vm2, %v1312_v4  ;;  %1339 = vtanh.f32 %v642_v5 }
 0x125   : > { %v1316_v8 = vpop.eup %1315  ;;  %917 = vst.msk [vmem:[%s1481_s29 + $0x1b0] sm:$0xff] %vm862_vm2, %v1314_v7  ;;  %1341 = vtanh.f32 %v770_v6  ;;  %v1140_v12 = vpop.f32.mrb[28].mxu0 }
 0x126   : > { %v1318_v9 = vpop.eup %1317  ;;  %883 = vst.msk [vmem:[%s1481_s29 + $0xa0] sm:$0xff] %vm862_vm2, %v1316_v8  ;;  %v1172_v13 = vpop.f32.mrb[28].mxu1  ;;  %1343 = vtanh.f32 %v1140_v12 }
 0x127   : > { %v1320_v10 = vpop.eup %1319  ;;  %915 = vst.msk [vmem:[%s1481_s29 + $0x1a0] sm:$0xff] %vm862_vm2, %v1318_v9  ;;  %v655_v15 = vpop.f32.mrb[29].mxu0  ;;  %1345 = vtanh.f32 %v1172_v13 }
 0x128   : > { %v1322_v11 = vpop.eup %1321  ;;  %886 = vst.msk [vmem:[%s1481_s29 + $0xb8] sm:$0xff] %vm862_vm2, %v1320_v10  ;;  %v783_v16 = vpop.f32.mrb[29].mxu1  ;;  %1347 = vtanh.f32 %v655_v15 }
 0x129   : > { %v1324_v14 = vpop.eup %1323  ;;  %918 = vst.msk [vmem:[%s1481_s29 + $0x1b8] sm:$0xff] %vm862_vm2, %v1322_v11  ;;  %v1141_v18 = vpop.f32.mrb[30].mxu0  ;;  %1349 = vtanh.f32 %v783_v16 }
 0x12a   : > { %v1326_v17 = vpop.eup %1325  ;;  %884 = vst.msk [vmem:[%s1481_s29 + $0xa8] sm:$0xff] %vm862_vm2, %v1324_v14  ;;  %v1173_v19 = vpop.f32.mrb[30].mxu1  ;;  %1351 = vtanh.f32 %v1141_v18 }
 0x12b   : > { %v1328_v20 = vpop.eup %1327  ;;  %916 = vst.msk [vmem:[%s1481_s29 + $0x1a8] sm:$0xff] %vm862_vm2, %v1326_v17  ;;  %v658_v21 = vpop.f32.mrb[31].mxu0  ;;  %1353 = vtanh.f32 %v1173_v19 }
 0x12c   : > { %v786_v22 = vpop.f32.mrb[31].mxu1  ;;  %v1330_v23 = vpop.eup %1329  ;;  %889 = vst.msk [vmem:[%s1481_s29 + $0xd0] sm:$0xff] %vm862_vm2, %v1328_v20  ;;  %1355 = vtanh.f32 %v658_v21 }
 0x12d   : > { %v1332_v24 = vpop.eup %1331  ;;  %921 = vst.msk [vmem:[%s1481_s29 + $0x1d0] sm:$0xff] %vm862_vm2, %v1330_v23  ;;  %1357 = vtanh.f32 %v786_v22 }
 0x12e   : > { %v1334_v25 = vpop.eup %1333  ;;  %887 = vst.msk [vmem:[%s1481_s29 + $0xc0] sm:$0xff] %vm862_vm2, %v1332_v24 }
 0x12f   : > { %v1336_v26 = vpop.eup %1335  ;;  %919 = vst.msk [vmem:[%s1481_s29 + $0x1c0] sm:$0xff] %vm862_vm2, %v1334_v25 }
 0x130   : > { %v1338_v27 = vpop.eup %1337  ;;  %890 = vst.msk [vmem:[%s1481_s29 + $0xd8] sm:$0xff] %vm862_vm2, %v1336_v26 }
 0x131   : > { %v1340_v28 = vpop.eup %1339  ;;  %922 = vst.msk [vmem:[%s1481_s29 + $0x1d8] sm:$0xff] %vm862_vm2, %v1338_v27 }
 0x132   : > { %v1342_v29 = vpop.eup %1341  ;;  %888 = vst.msk [vmem:[%s1481_s29 + $0xc8] sm:$0xff] %vm862_vm2, %v1340_v28 }
 0x133   : > { %v1344_v30 = vpop.eup %1343  ;;  %920 = vst.msk [vmem:[%s1481_s29 + $0x1c8] sm:$0xff] %vm862_vm2, %v1342_v29 }
 0x134   : > { %v1346_v31 = vpop.eup %1345  ;;  %893 = vst.msk [vmem:[%s1481_s29 + $0xf0] sm:$0xff] %vm862_vm2, %v1344_v30 }
 0x135   : > { %v1348_v32 = vpop.eup %1347  ;;  %925 = vst.msk [vmem:[%s1481_s29 + $0x1f0] sm:$0xff] %vm862_vm2, %v1346_v31 }
 0x136   : > { %v1350_v33 = vpop.eup %1349  ;;  %891 = vst.msk [vmem:[%s1481_s29 + $0xe0] sm:$0xff] %vm862_vm2, %v1348_v32 }
 0x137   : > { %v1352_v34 = vpop.eup %1351  ;;  %923 = vst.msk [vmem:[%s1481_s29 + $0x1e0] sm:$0xff] %vm862_vm2, %v1350_v33 }
 0x138   : > { %v1354_v35 = vpop.eup %1353  ;;  %894 = vst.msk [vmem:[%s1481_s29 + $0xf8] sm:$0xff] %vm862_vm2, %v1352_v34 }
 0x139   : > { %v1356_v36 = vpop.eup %1355  ;;  %926 = vst.msk [vmem:[%s1481_s29 + $0x1f8] sm:$0xff] %vm862_vm2, %v1354_v35 }
 0x13a   : > { %v1358_v37 = vpop.eup %1357  ;;  %892 = vst.msk [vmem:[%s1481_s29 + $0xe8] sm:$0xff] %vm862_vm2, %v1356_v36 }
 0x13b   : > { %924 = vst.msk [vmem:[%s1481_s29 + $0x1e8] sm:$0xff] %vm862_vm2, %v1358_v37 }
 0x13c PF: > { %s12_s9 = sadd.s32 1, %s1365_s9  }
 0x13d   : > { %p9_p4 = scmp.ge.s32.totalorder %s12_s9, 6  }
 0x13f   :  { %11 = sbr.rel (!%p9_p4) target bundleno = 1 (0x1), region = 58 }

</bundles_post_ra>
